<compile_context>
chip_gen: v7x
topology: tpu7x:2x2x1
jax: 0.10.0
libtpu: 0.0.40
codegen_flags: <defaults>
</compile_context>

<pallas_src>
import jax
import jax.numpy as jnp
from jax import lax
from jax.experimental import pallas as pl
from jax.experimental.pallas import tpu as pltpu

NUM_CLASSES = 4
TGT_TILE = 32          # target macro-tile rows (matches int8 native (32,128) tiling)


def _default_n_split(n_chunks):
    """Use 2 output partitions only on multi-TensorCore chips (v7x); 1 elsewhere."""
    if n_chunks < 2 or n_chunks % 2 != 0:
        return 1
    try:
        kind = jax.devices()[0].device_kind.lower()
    except Exception:
        kind = ""
    return 2 if ("v7" in kind or "7x" in kind) else 1


def _make_kernel(*, n_batch, n_classes, block_rows, sub_rows, true_labs, un_labels,
                 un_channel, ignore_index, nll_batch_is_channel):
    """Build the Pallas kernel with all static config baked in."""
    assert block_rows % TGT_TILE == 0 and TGT_TILE % sub_rows == 0
    num_macro = block_rows // TGT_TILE
    subs_per_macro = TGT_TILE // sub_rows

    def sub_tile_contrib(pred_ref, t_subs, r0):
        """Loss contribution of one (sub_rows, 128) pixel tile, summed over batch/chan."""
        nlls = []                      # per batch sample, (sub_rows, 128) f32
        wsum = [0.0] * n_classes       # sum over batch of focal weights per channel

        for n in range(n_batch):
            xs = [pred_ref[n * n_classes + c, pl.ds(r0, sub_rows), :].astype(jnp.float32)
                  for c in range(n_classes)]

            # Shared-max logsumexp: one max chain + 4 exps feed both `den` and the
            # uncertain-channel logsumexp (6 EUP ops instead of 8).
            m = xs[0]
            for c in range(1, n_classes):
                m = jnp.maximum(m, xs[c])
            es = [jnp.exp(x - m) for x in xs]
            s_all = es[0]
            for e in es[1:]:
                s_all = s_all + e
            su = es[un_labels[0]]
            for c in un_labels[1:]:
                su = su + es[c]
            # TODO(synk): shared-max reuse can underflow su to 0 when every uncertain
            # logit is >~88 below the global max; tiny floor keeps it finite.
            su = jnp.maximum(su, jnp.float32(1e-37))
            log_s_all = jnp.log(s_all)
            den = m + log_s_all

            # Build `outputs`, replicating the in-place write order of the PyTorch code
            # (the un-channel write may be overwritten by the true_labs write).
            out_vals = [0.0] * n_classes          # untouched channels stay exactly 0
            out_vals[un_channel] = jnp.log(su) - log_s_all   # == lse(un) - den
            for c in true_labs:
                out_vals[c] = xs[c] - den

            # focal weights (alpha=1, gamma=2), accumulated over batch per channel
            for c in range(n_classes):
                o = out_vals[c]
                if isinstance(o, float):
                    w = (1.0 - o) ** 2            # compile-time constant (== 1.0)
                else:
                    d = 1.0 - o
                    w = d * d
                wsum[c] = w if n == 0 else wsum[c] + w

            # nll_loss(reduction='none'): -outputs[target]; 0 where target==ignore_index
            t_n = t_subs[n]
            g = jnp.zeros((sub_rows, 128), jnp.float32)
            for c in range(n_classes):
                if isinstance(out_vals[c], float):
                    continue                      # zero channel -> gather gives 0 anyway
                g = jnp.where(t_n == c, out_vals[c], g)
            nlls.append(jnp.where(t_n == ignore_index, 0.0, -g))

        # Combine: sum_{n,c} w[n,c] * nll[broadcast index], following PyTorch's
        # (N,C,H,W) * (N,H,W) broadcast (nll index = c if N==C else 0).
        contrib = None
        for c in range(n_classes):
            nll_c = nlls[c] if nll_batch_is_channel else nlls[0]
            if isinstance(wsum[c], float):
                term = nll_c if wsum[c] == 1.0 else nll_c * wsum[c]
            else:
                term = nll_c * wsum[c]
            contrib = term if contrib is None else contrib + term
        return contrib

    def kernel(pred_ref, tgt_ref, out_ref, acc_ref):
        i = pl.program_id(1)

        @pl.when(i == 0)
        def _init():
            acc_ref[...] = jnp.zeros_like(acc_ref)

        def body(mi, carry):
            q0 = pl.multiple_of(mi * TGT_TILE, TGT_TILE)
            # Targets: one 32-row-aligned load per macro-tile per sample (int8-tiling
            # safe), widened to i32 in registers; sub-tiles slice statically (cheap).
            t_macros = [tgt_ref[n, pl.ds(q0, TGT_TILE), :].astype(jnp.int32)
                        for n in range(n_batch)]
            for j in range(subs_per_macro):
                r0 = pl.multiple_of(q0 + j * sub_rows, sub_rows)
                t_subs = [t[j * sub_rows:(j + 1) * sub_rows, :] for t in t_macros]
                carry = carry + sub_tile_contrib(pred_ref, t_subs, r0)
            return carry

        block_acc = lax.fori_loop(0, num_macro, body,
                                  jnp.zeros((sub_rows, 128), jnp.float32))
        acc_ref[...] += block_acc                 # single VMEM RMW per grid step

        @pl.when(i == pl.num_programs(1) - 1)
        def _finalize():
            out_ref[...] = jnp.sum(acc_ref[...], axis=0, keepdims=True)[None]

    return kernel


def focal_loss(inputs, targets, true_labs, *, ignore_index=-100, alpha=1.0, gamma=2,
               block_rows_target=512, n_split=None):
    """inputs: (N, 4, H, W) logits (f32 or bf16, NCHW as in PyTorch);
    targets: (N, H, W) int labels in {0..3} or ignore_index.  Returns the scalar loss."""
    n, c, h, w = inputs.shape
    assert c == NUM_CLASSES
    assert gamma == 2, "Focal module hard-codes gamma=2"
    true_labs = tuple(int(x) for x in true_labs)
    un_labels = tuple(i for i in range(NUM_CLASSES) if i not in true_labs)
    assert len(un_labels) >= 1, "need at least one non-true label"
    un_channel = 0 if 0 in un_labels else 1
    # The original module's (1-outputs)**2 * nll broadcast is only defined for N in {1, C}.
    assert n == 1 or n == c, "Focal's focal-term broadcast requires batch N in {1, 4}"
    nll_batch_is_channel = (n == c) and n != 1

    # --- choose block size (multiple of 32 rows of 128 pixels) and pad to fit ---
    pix = h * w
    rows_needed = -(-pix // 128)
    target_rows = max(TGT_TILE, (block_rows_target // TGT_TILE) * TGT_TILE)
    if rows_needed <= target_rows:
        block_rows = -(-rows_needed // TGT_TILE) * TGT_TILE
        total_rows = block_rows
    else:
        block_rows = target_rows
        total_rows = -(-rows_needed // block_rows) * block_rows
    n_chunks = total_rows // block_rows

    if n_split is None:
        n_split = _default_n_split(n_chunks)
    if n_chunks % n_split != 0:
        n_split = 1
    cps = n_chunks // n_split                     # pixel-chunks per partition

    itemsize = jnp.dtype(inputs.dtype).itemsize
    pack = max(1, 4 // itemsize)                  # 1 for f32, 2 for bf16
    sub_rows = 32 if n == 1 else min(32, 8 * pack)

    # Targets as int8 when ignore_index fits (shrinks that HBM stream 4x).
    tgt_dtype = jnp.int8 if -128 <= int(ignore_index) <= 127 else jnp.int32

    # Free reshapes (no transpose); pad (only if needed) with ignore_index so padded
    # pixels contribute exactly zero; preds stay in their HBM dtype (bf16 ok).
    pix_pad = total_rows * 128
    pred_flat = inputs.reshape(n * c, pix)
    tgt_flat = targets.reshape(n, pix).astype(tgt_dtype)
    if pix_pad != pix:
        pred_flat = jnp.pad(pred_flat, ((0, 0), (0, pix_pad - pix)))
        tgt_flat = jnp.pad(tgt_flat, ((0, 0), (0, pix_pad - pix)),
                           constant_values=int(ignore_index))
    pred3 = pred_flat.reshape(n * c, total_rows, 128)
    tgt3 = tgt_flat.reshape(n, total_rows, 128)

    kernel = _make_kernel(
        n_batch=n, n_classes=c, block_rows=block_rows, sub_rows=sub_rows,
        true_labs=true_labs, un_labels=un_labels, un_channel=un_channel,
        ignore_index=int(ignore_index), nll_batch_is_channel=nll_batch_is_channel)

    # Raise the scoped-VMEM limit only when the double-buffered blocks need it
    # (matters on v5e's 16 MiB default if block_rows is pushed well past 512).
    block_bytes = 2 * (n * c * block_rows * 128 * itemsize
                       + n * block_rows * 128 * jnp.dtype(tgt_dtype).itemsize)
    compiler_kwargs = dict(dimension_semantics=("parallel", "arbitrary"))
    if block_bytes > 12 * 1024 * 1024:
        compiler_kwargs["vmem_limit_bytes"] = min(
            int(block_bytes * 3 // 2), 64 * 1024 * 1024)

    partials = pl.pallas_call(
        kernel,
        out_shape=jax.ShapeDtypeStruct((n_split, 1, 128), jnp.float32),
        grid_spec=pltpu.PrefetchScalarGridSpec(
            num_scalar_prefetch=0,
            grid=(n_split, cps),
            in_specs=[
                pl.BlockSpec((n * c, block_rows, 128),
                             lambda s, i: (0, s * cps + i, 0)),
                pl.BlockSpec((n, block_rows, 128),
                             lambda s, i: (0, s * cps + i, 0)),
            ],
            out_specs=pl.BlockSpec((1, 1, 128), lambda s, i: (s, 0, 0)),
            scratch_shapes=[pltpu.VMEM((sub_rows, 128), jnp.float32)],
        ),
        compiler_params=pltpu.CompilerParams(**compiler_kwargs),
    )(pred3, tgt3)

    total = jnp.sum(partials)
    return (jnp.float32(alpha) * total) / jnp.float32(n * c * h * w)


def _reference(inputs, targets, true_labs, ignore_index=-100, alpha=1.0, gamma=2.0):
    """Pure-JAX reference mirroring the PyTorch forward (incl. its broadcast)."""
    C = NUM_CLASSES
    un_labels = [i for i in range(C) if i not in true_labs]
    den = jax.scipy.special.logsumexp(inputs, axis=1)                       # (N,H,W)
    outputs = jnp.zeros_like(inputs)
    un_lse = jax.scipy.special.logsumexp(inputs[:, jnp.array(un_labels)], axis=1) - den
    un_ch = 0 if 0 in un_labels else 1
    outputs = outputs.at[:, un_ch].set(un_lse)
    for c in true_labs:
        outputs = outputs.at[:, c].set(inputs[:, c] - den)
    valid = targets != ignore_index
    safe_t = jnp.where(valid, targets, 0)
    gathered = jnp.take_along_axis(outputs, safe_t[:, None], axis=1)[:, 0]
    nll = jnp.where(valid, -gathered, 0.0)                                  # (N,H,W)
    weight = alpha * (1.0 - outputs) ** gamma                               # (N,C,H,W)
    return jnp.mean(weight * nll)           # same (N,C,H,W)*(N,H,W) broadcast as PyTorch


if __name__ == "__main__":
    key = jax.random.PRNGKey(0)

    # Case 1: N == 4 (== C, so the module's focal-term broadcast is valid), with some
    # ignore_index pixels; true_labs=(2,3) exercises the un-channel-0 path and the
    # pad-to-32-rows path (H*W = 256 -> padded to 4096 pixels).
    k1, k2 = jax.random.split(key)
    N, C, H, W = 4, 4, 16, 16
    pred = jax.random.normal(k1, (N, C, H, W), dtype=jnp.float32)
    targets = jax.random.randint(k2, (N, H, W), 0, C, dtype=jnp.int32)
    targets = targets.at[0, :2, :3].set(-100)
    true_labs = (2, 3)
    loss = jax.block_until_ready(focal_loss(pred, targets, true_labs))
    ref = _reference(pred, targets, true_labs)
    assert jnp.allclose(loss, ref, rtol=1e-4, atol=1e-5), (float(loss), float(ref))

    # Case 2: N == 1, true_labs=(0,2) exercises the un-channel-1 path (sub_rows=32).
    k3, k4 = jax.random.split(k1)
    pred1 = jax.random.normal(k3, (1, C, H, W), dtype=jnp.float32)
    tgt1 = jax.random.randint(k4, (1, H, W), 0, C, dtype=jnp.int32)
    true_labs2 = (0, 2)
    loss1 = jax.block_until_ready(focal_loss(pred1, tgt1, true_labs2))
    ref1 = _reference(pred1, tgt1, true_labs2)
    assert jnp.allclose(loss1, ref1, rtol=1e-4, atol=1e-5), (float(loss1), float(ref1))

    # Case 3: multi-chunk grid + 2 output partitions + single un-label (true_labs=(1,2,3)),
    # with a small forced block size so the accumulate/finalize paths are exercised.
    k5, k6 = jax.random.split(k3)
    pred2 = jax.random.normal(k5, (4, C, 128, 128), dtype=jnp.float32)
    tgt2 = jax.random.randint(k6, (4, 128, 128), 0, C, dtype=jnp.int32)
    tgt2 = tgt2.at[1, 5:9, :].set(-100)
    true_labs3 = (1, 2, 3)
    loss2 = jax.block_until_ready(
        focal_loss(pred2, tgt2, true_labs3, block_rows_target=32, n_split=2))
    ref2 = _reference(pred2, tgt2, true_labs3)
    assert jnp.allclose(loss2, ref2, rtol=1e-4, atol=1e-5), (float(loss2), float(ref2))

    print("KERNEL_OK")
</pallas_src>

<mosaic_0001>
module attributes {stable_mosaic.version = 11 : i64} {
  func.func @kernel(%arg0: i32, %arg1: i32, %arg2: memref<16x32x128xf32, #tpu.memory_space<vmem>>, %arg3: memref<4x32x128xi8, #tpu.memory_space<vmem>>, %arg4: memref<1x1x128xf32, #tpu.memory_space<vmem>>, %arg5: memref<8x128xf32, #tpu.memory_space<vmem>>) attributes {dimension_semantics = [#tpu.dimension_semantics<parallel>, #tpu.dimension_semantics<arbitrary>], iteration_bounds = array<i64: 1, 1>, scalar_prefetch = 0 : i64, scratch_operands = 1 : i64, tpu.core_type = #tpu.core_type<tc>, window_params = [{transform_indices = @transform_0, window_bounds = array<i64: 16, 32, 128>}, {transform_indices = @transform_1, window_bounds = array<i64: 4, 32, 128>}, {transform_indices = @transform_2, window_bounds = array<i64: 1, 1, 128>}]} {
    %c0_i32 = arith.constant 0 : i32
    %0 = arith.cmpi eq, %arg1, %c0_i32 : i32
    %1 = arith.extui %0 : i1 to i32
    %c0_i32_0 = arith.constant 0 : i32
    %2 = arith.cmpi ne, %1, %c0_i32_0 : i32
    scf.if %2 {
      %cst_306 = arith.constant 0.000000e+00 : f32
      %1084 = vector.broadcast %cst_306 : f32 to vector<8x128xf32>
      %c0_307 = arith.constant 0 : index
      %c0_308 = arith.constant 0 : index
      %1085 = vector.load %arg5[%c0_307, %c0_308] : memref<8x128xf32, #tpu.memory_space<vmem>>, vector<8x128xf32>
      tpu.vector_store %arg5[%c0_307, %c0_308], %1084 {strides = array<i32>} : memref<8x128xf32, #tpu.memory_space<vmem>>, vector<8x128xf32>,
    } else {
    }
    %cst = arith.constant 0.000000e+00 : f32
    %3 = vector.broadcast %cst : f32 to vector<8x128xf32>
    %c0_i32_1 = arith.constant 0 : i32
    %c32_i32 = arith.constant 32 : i32
    %4 = arith.muli %c0_i32_1, %c32_i32 : i32
    %5 = tpu.assume_multiple %4, 32 : i32
    %c0 = arith.constant 0 : index
    %6 = arith.index_cast %5 : i32 to index
    %c0_2 = arith.constant 0 : index
    %7 = vector.load %arg3[%c0, %6, %c0_2] : memref<4x32x128xi8, #tpu.memory_space<vmem>>, vector<1x32x128xi8>
    %8 = vector.shape_cast %7 : vector<1x32x128xi8> to vector<32x128xi8>
    %9 = arith.extsi %8 : vector<32x128xi8> to vector<32x128xi32>
    %c1 = arith.constant 1 : index
    %10 = arith.index_cast %5 : i32 to index
    %c0_3 = arith.constant 0 : index
    %11 = vector.load %arg3[%c1, %10, %c0_3] : memref<4x32x128xi8, #tpu.memory_space<vmem>>, vector<1x32x128xi8>
    %12 = vector.shape_cast %11 : vector<1x32x128xi8> to vector<32x128xi8>
    %13 = arith.extsi %12 : vector<32x128xi8> to vector<32x128xi32>
    %c2 = arith.constant 2 : index
    %14 = arith.index_cast %5 : i32 to index
    %c0_4 = arith.constant 0 : index
    %15 = vector.load %arg3[%c2, %14, %c0_4] : memref<4x32x128xi8, #tpu.memory_space<vmem>>, vector<1x32x128xi8>
    %16 = vector.shape_cast %15 : vector<1x32x128xi8> to vector<32x128xi8>
    %17 = arith.extsi %16 : vector<32x128xi8> to vector<32x128xi32>
    %c3 = arith.constant 3 : index
    %18 = arith.index_cast %5 : i32 to index
    %c0_5 = arith.constant 0 : index
    %19 = vector.load %arg3[%c3, %18, %c0_5] : memref<4x32x128xi8, #tpu.memory_space<vmem>>, vector<1x32x128xi8>
    %20 = vector.shape_cast %19 : vector<1x32x128xi8> to vector<32x128xi8>
    %21 = arith.extsi %20 : vector<32x128xi8> to vector<32x128xi32>
    %c0_i32_6 = arith.constant 0 : i32
    %22 = arith.addi %5, %c0_i32_6 : i32
    %23 = tpu.assume_multiple %22, 8 : i32
    %24 = vector.extract_strided_slice %9 {offsets = [0, 0], sizes = [8, 128], strides = [1, 1]} : vector<32x128xi32> to vector<8x128xi32>
    %25 = vector.extract_strided_slice %13 {offsets = [0, 0], sizes = [8, 128], strides = [1, 1]} : vector<32x128xi32> to vector<8x128xi32>
    %26 = vector.extract_strided_slice %17 {offsets = [0, 0], sizes = [8, 128], strides = [1, 1]} : vector<32x128xi32> to vector<8x128xi32>
    %27 = vector.extract_strided_slice %21 {offsets = [0, 0], sizes = [8, 128], strides = [1, 1]} : vector<32x128xi32> to vector<8x128xi32>
    %c0_7 = arith.constant 0 : index
    %28 = arith.index_cast %23 : i32 to index
    %c0_8 = arith.constant 0 : index
    %29 = vector.load %arg2[%c0_7, %28, %c0_8] : memref<16x32x128xf32, #tpu.memory_space<vmem>>, vector<1x8x128xf32>
    %30 = vector.shape_cast %29 : vector<1x8x128xf32> to vector<8x128xf32>
    %c1_9 = arith.constant 1 : index
    %31 = arith.index_cast %23 : i32 to index
    %c0_10 = arith.constant 0 : index
    %32 = vector.load %arg2[%c1_9, %31, %c0_10] : memref<16x32x128xf32, #tpu.memory_space<vmem>>, vector<1x8x128xf32>
    %33 = vector.shape_cast %32 : vector<1x8x128xf32> to vector<8x128xf32>
    %c2_11 = arith.constant 2 : index
    %34 = arith.index_cast %23 : i32 to index
    %c0_12 = arith.constant 0 : index
    %35 = vector.load %arg2[%c2_11, %34, %c0_12] : memref<16x32x128xf32, #tpu.memory_space<vmem>>, vector<1x8x128xf32>
    %36 = vector.shape_cast %35 : vector<1x8x128xf32> to vector<8x128xf32>
    %c3_13 = arith.constant 3 : index
    %37 = arith.index_cast %23 : i32 to index
    %c0_14 = arith.constant 0 : index
    %38 = vector.load %arg2[%c3_13, %37, %c0_14] : memref<16x32x128xf32, #tpu.memory_space<vmem>>, vector<1x8x128xf32>
    %39 = vector.shape_cast %38 : vector<1x8x128xf32> to vector<8x128xf32>
    %40 = arith.maximumf %30, %33 : vector<8x128xf32>
    %41 = arith.maximumf %40, %36 : vector<8x128xf32>
    %42 = arith.maximumf %41, %39 : vector<8x128xf32>
    %43 = arith.subf %30, %42 : vector<8x128xf32>
    %44 = math.exp %43 : vector<8x128xf32>
    %45 = arith.subf %33, %42 : vector<8x128xf32>
    %46 = math.exp %45 : vector<8x128xf32>
    %47 = arith.subf %36, %42 : vector<8x128xf32>
    %48 = math.exp %47 : vector<8x128xf32>
    %49 = arith.subf %39, %42 : vector<8x128xf32>
    %50 = math.exp %49 : vector<8x128xf32>
    %51 = arith.addf %44, %46 : vector<8x128xf32>
    %52 = arith.addf %51, %48 : vector<8x128xf32>
    %53 = arith.addf %52, %50 : vector<8x128xf32>
    %54 = arith.addf %44, %46 : vector<8x128xf32>
    %cst_15 = arith.constant 9.99999991E-38 : f32
    %55 = vector.broadcast %cst_15 : f32 to vector<8x128xf32>
    %56 = arith.maximumf %54, %55 : vector<8x128xf32>
    %57 = math.log %53 : vector<8x128xf32>
    %58 = arith.addf %42, %57 : vector<8x128xf32>
    %59 = math.log %56 : vector<8x128xf32>
    %60 = arith.subf %59, %57 : vector<8x128xf32>
    %61 = arith.subf %36, %58 : vector<8x128xf32>
    %62 = arith.subf %39, %58 : vector<8x128xf32>
    %cst_16 = arith.constant 1.000000e+00 : f32
    %63 = vector.broadcast %cst_16 : f32 to vector<8x128xf32>
    %64 = arith.subf %63, %60 : vector<8x128xf32>
    %65 = arith.mulf %64, %64 : vector<8x128xf32>
    %cst_17 = arith.constant 1.000000e+00 : f32
    %66 = vector.broadcast %cst_17 : f32 to vector<8x128xf32>
    %67 = arith.subf %66, %61 : vector<8x128xf32>
    %68 = arith.mulf %67, %67 : vector<8x128xf32>
    %cst_18 = arith.constant 1.000000e+00 : f32
    %69 = vector.broadcast %cst_18 : f32 to vector<8x128xf32>
    %70 = arith.subf %69, %62 : vector<8x128xf32>
    %71 = arith.mulf %70, %70 : vector<8x128xf32>
    %cst_19 = arith.constant 0.000000e+00 : f32
    %72 = vector.broadcast %cst_19 : f32 to vector<8x128xf32>
    %c0_i32_20 = arith.constant 0 : i32
    %73 = vector.broadcast %c0_i32_20 : i32 to vector<8x128xi32>
    %74 = arith.cmpi eq, %24, %73 : vector<8x128xi32>
    %75 = arith.select %74, %60, %72 : vector<8x128xi1>, vector<8x128xf32>
    %c2_i32 = arith.constant 2 : i32
    %76 = vector.broadcast %c2_i32 : i32 to vector<8x128xi32>
    %77 = arith.cmpi eq, %24, %76 : vector<8x128xi32>
    %78 = arith.select %77, %61, %75 : vector<8x128xi1>, vector<8x128xf32>
    %c3_i32 = arith.constant 3 : i32
    %79 = vector.broadcast %c3_i32 : i32 to vector<8x128xi32>
    %80 = arith.cmpi eq, %24, %79 : vector<8x128xi32>
    %81 = arith.select %80, %62, %78 : vector<8x128xi1>, vector<8x128xf32>
    %c-100_i32 = arith.constant -100 : i32
    %82 = vector.broadcast %c-100_i32 : i32 to vector<8x128xi32>
    %83 = arith.cmpi eq, %24, %82 : vector<8x128xi32>
    %cst_21 = arith.constant 0.000000e+00 : f32
    %84 = vector.broadcast %cst_21 : f32 to vector<8x128xf32>
    %85 = arith.subf %84, %81 : vector<8x128xf32>
    %cst_22 = arith.constant 0.000000e+00 : f32
    %86 = vector.broadcast %cst_22 : f32 to vector<8x128xf32>
    %87 = arith.select %83, %86, %85 : vector<8x128xi1>, vector<8x128xf32>
    %c4 = arith.constant 4 : index
    %88 = arith.index_cast %23 : i32 to index
    %c0_23 = arith.constant 0 : index
    %89 = vector.load %arg2[%c4, %88, %c0_23] : memref<16x32x128xf32, #tpu.memory_space<vmem>>, vector<1x8x128xf32>
    %90 = vector.shape_cast %89 : vector<1x8x128xf32> to vector<8x128xf32>
    %c5 = arith.constant 5 : index
    %91 = arith.index_cast %23 : i32 to index
    %c0_24 = arith.constant 0 : index
    %92 = vector.load %arg2[%c5, %91, %c0_24] : memref<16x32x128xf32, #tpu.memory_space<vmem>>, vector<1x8x128xf32>
    %93 = vector.shape_cast %92 : vector<1x8x128xf32> to vector<8x128xf32>
    %c6 = arith.constant 6 : index
    %94 = arith.index_cast %23 : i32 to index
    %c0_25 = arith.constant 0 : index
    %95 = vector.load %arg2[%c6, %94, %c0_25] : memref<16x32x128xf32, #tpu.memory_space<vmem>>, vector<1x8x128xf32>
    %96 = vector.shape_cast %95 : vector<1x8x128xf32> to vector<8x128xf32>
    %c7 = arith.constant 7 : index
    %97 = arith.index_cast %23 : i32 to index
    %c0_26 = arith.constant 0 : index
    %98 = vector.load %arg2[%c7, %97, %c0_26] : memref<16x32x128xf32, #tpu.memory_space<vmem>>, vector<1x8x128xf32>
    %99 = vector.shape_cast %98 : vector<1x8x128xf32> to vector<8x128xf32>
    %100 = arith.maximumf %90, %93 : vector<8x128xf32>
    %101 = arith.maximumf %100, %96 : vector<8x128xf32>
    %102 = arith.maximumf %101, %99 : vector<8x128xf32>
    %103 = arith.subf %90, %102 : vector<8x128xf32>
    %104 = math.exp %103 : vector<8x128xf32>
    %105 = arith.subf %93, %102 : vector<8x128xf32>
    %106 = math.exp %105 : vector<8x128xf32>
    %107 = arith.subf %96, %102 : vector<8x128xf32>
    %108 = math.exp %107 : vector<8x128xf32>
    %109 = arith.subf %99, %102 : vector<8x128xf32>
    %110 = math.exp %109 : vector<8x128xf32>
    %111 = arith.addf %104, %106 : vector<8x128xf32>
    %112 = arith.addf %111, %108 : vector<8x128xf32>
    %113 = arith.addf %112, %110 : vector<8x128xf32>
    %114 = arith.addf %104, %106 : vector<8x128xf32>
    %cst_27 = arith.constant 9.99999991E-38 : f32
    %115 = vector.broadcast %cst_27 : f32 to vector<8x128xf32>
    %116 = arith.maximumf %114, %115 : vector<8x128xf32>
    %117 = math.log %113 : vector<8x128xf32>
    %118 = arith.addf %102, %117 : vector<8x128xf32>
    %119 = math.log %116 : vector<8x128xf32>
    %120 = arith.subf %119, %117 : vector<8x128xf32>
    %121 = arith.subf %96, %118 : vector<8x128xf32>
    %122 = arith.subf %99, %118 : vector<8x128xf32>
    %cst_28 = arith.constant 1.000000e+00 : f32
    %123 = vector.broadcast %cst_28 : f32 to vector<8x128xf32>
    %124 = arith.subf %123, %120 : vector<8x128xf32>
    %125 = arith.mulf %124, %124 : vector<8x128xf32>
    %126 = arith.addf %65, %125 : vector<8x128xf32>
    %cst_29 = arith.constant 1.000000e+00 : f32
    %127 = vector.broadcast %cst_29 : f32 to vector<8x128xf32>
    %128 = arith.subf %127, %121 : vector<8x128xf32>
    %129 = arith.mulf %128, %128 : vector<8x128xf32>
    %130 = arith.addf %68, %129 : vector<8x128xf32>
    %cst_30 = arith.constant 1.000000e+00 : f32
    %131 = vector.broadcast %cst_30 : f32 to vector<8x128xf32>
    %132 = arith.subf %131, %122 : vector<8x128xf32>
    %133 = arith.mulf %132, %132 : vector<8x128xf32>
    %134 = arith.addf %71, %133 : vector<8x128xf32>
    %cst_31 = arith.constant 0.000000e+00 : f32
    %135 = vector.broadcast %cst_31 : f32 to vector<8x128xf32>
    %c0_i32_32 = arith.constant 0 : i32
    %136 = vector.broadcast %c0_i32_32 : i32 to vector<8x128xi32>
    %137 = arith.cmpi eq, %25, %136 : vector<8x128xi32>
    %138 = arith.select %137, %120, %135 : vector<8x128xi1>, vector<8x128xf32>
    %c2_i32_33 = arith.constant 2 : i32
    %139 = vector.broadcast %c2_i32_33 : i32 to vector<8x128xi32>
    %140 = arith.cmpi eq, %25, %139 : vector<8x128xi32>
    %141 = arith.select %140, %121, %138 : vector<8x128xi1>, vector<8x128xf32>
    %c3_i32_34 = arith.constant 3 : i32
    %142 = vector.broadcast %c3_i32_34 : i32 to vector<8x128xi32>
    %143 = arith.cmpi eq, %25, %142 : vector<8x128xi32>
    %144 = arith.select %143, %122, %141 : vector<8x128xi1>, vector<8x128xf32>
    %c-100_i32_35 = arith.constant -100 : i32
    %145 = vector.broadcast %c-100_i32_35 : i32 to vector<8x128xi32>
    %146 = arith.cmpi eq, %25, %145 : vector<8x128xi32>
    %cst_36 = arith.constant 0.000000e+00 : f32
    %147 = vector.broadcast %cst_36 : f32 to vector<8x128xf32>
    %148 = arith.subf %147, %144 : vector<8x128xf32>
    %cst_37 = arith.constant 0.000000e+00 : f32
    %149 = vector.broadcast %cst_37 : f32 to vector<8x128xf32>
    %150 = arith.select %146, %149, %148 : vector<8x128xi1>, vector<8x128xf32>
    %c8 = arith.constant 8 : index
    %151 = arith.index_cast %23 : i32 to index
    %c0_38 = arith.constant 0 : index
    %152 = vector.load %arg2[%c8, %151, %c0_38] : memref<16x32x128xf32, #tpu.memory_space<vmem>>, vector<1x8x128xf32>
    %153 = vector.shape_cast %152 : vector<1x8x128xf32> to vector<8x128xf32>
    %c9 = arith.constant 9 : index
    %154 = arith.index_cast %23 : i32 to index
    %c0_39 = arith.constant 0 : index
    %155 = vector.load %arg2[%c9, %154, %c0_39] : memref<16x32x128xf32, #tpu.memory_space<vmem>>, vector<1x8x128xf32>
    %156 = vector.shape_cast %155 : vector<1x8x128xf32> to vector<8x128xf32>
    %c10 = arith.constant 10 : index
    %157 = arith.index_cast %23 : i32 to index
    %c0_40 = arith.constant 0 : index
    %158 = vector.load %arg2[%c10, %157, %c0_40] : memref<16x32x128xf32, #tpu.memory_space<vmem>>, vector<1x8x128xf32>
    %159 = vector.shape_cast %158 : vector<1x8x128xf32> to vector<8x128xf32>
    %c11 = arith.constant 11 : index
    %160 = arith.index_cast %23 : i32 to index
    %c0_41 = arith.constant 0 : index
    %161 = vector.load %arg2[%c11, %160, %c0_41] : memref<16x32x128xf32, #tpu.memory_space<vmem>>, vector<1x8x128xf32>
    %162 = vector.shape_cast %161 : vector<1x8x128xf32> to vector<8x128xf32>
    %163 = arith.maximumf %153, %156 : vector<8x128xf32>
    %164 = arith.maximumf %163, %159 : vector<8x128xf32>
    %165 = arith.maximumf %164, %162 : vector<8x128xf32>
    %166 = arith.subf %153, %165 : vector<8x128xf32>
    %167 = math.exp %166 : vector<8x128xf32>
    %168 = arith.subf %156, %165 : vector<8x128xf32>
    %169 = math.exp %168 : vector<8x128xf32>
    %170 = arith.subf %159, %165 : vector<8x128xf32>
    %171 = math.exp %170 : vector<8x128xf32>
    %172 = arith.subf %162, %165 : vector<8x128xf32>
    %173 = math.exp %172 : vector<8x128xf32>
    %174 = arith.addf %167, %169 : vector<8x128xf32>
    %175 = arith.addf %174, %171 : vector<8x128xf32>
    %176 = arith.addf %175, %173 : vector<8x128xf32>
    %177 = arith.addf %167, %169 : vector<8x128xf32>
    %cst_42 = arith.constant 9.99999991E-38 : f32
    %178 = vector.broadcast %cst_42 : f32 to vector<8x128xf32>
    %179 = arith.maximumf %177, %178 : vector<8x128xf32>
    %180 = math.log %176 : vector<8x128xf32>
    %181 = arith.addf %165, %180 : vector<8x128xf32>
    %182 = math.log %179 : vector<8x128xf32>
    %183 = arith.subf %182, %180 : vector<8x128xf32>
    %184 = arith.subf %159, %181 : vector<8x128xf32>
    %185 = arith.subf %162, %181 : vector<8x128xf32>
    %cst_43 = arith.constant 1.000000e+00 : f32
    %186 = vector.broadcast %cst_43 : f32 to vector<8x128xf32>
    %187 = arith.subf %186, %183 : vector<8x128xf32>
    %188 = arith.mulf %187, %187 : vector<8x128xf32>
    %189 = arith.addf %126, %188 : vector<8x128xf32>
    %cst_44 = arith.constant 1.000000e+00 : f32
    %190 = vector.broadcast %cst_44 : f32 to vector<8x128xf32>
    %191 = arith.subf %190, %184 : vector<8x128xf32>
    %192 = arith.mulf %191, %191 : vector<8x128xf32>
    %193 = arith.addf %130, %192 : vector<8x128xf32>
    %cst_45 = arith.constant 1.000000e+00 : f32
    %194 = vector.broadcast %cst_45 : f32 to vector<8x128xf32>
    %195 = arith.subf %194, %185 : vector<8x128xf32>
    %196 = arith.mulf %195, %195 : vector<8x128xf32>
    %197 = arith.addf %134, %196 : vector<8x128xf32>
    %cst_46 = arith.constant 0.000000e+00 : f32
    %198 = vector.broadcast %cst_46 : f32 to vector<8x128xf32>
    %c0_i32_47 = arith.constant 0 : i32
    %199 = vector.broadcast %c0_i32_47 : i32 to vector<8x128xi32>
    %200 = arith.cmpi eq, %26, %199 : vector<8x128xi32>
    %201 = arith.select %200, %183, %198 : vector<8x128xi1>, vector<8x128xf32>
    %c2_i32_48 = arith.constant 2 : i32
    %202 = vector.broadcast %c2_i32_48 : i32 to vector<8x128xi32>
    %203 = arith.cmpi eq, %26, %202 : vector<8x128xi32>
    %204 = arith.select %203, %184, %201 : vector<8x128xi1>, vector<8x128xf32>
    %c3_i32_49 = arith.constant 3 : i32
    %205 = vector.broadcast %c3_i32_49 : i32 to vector<8x128xi32>
    %206 = arith.cmpi eq, %26, %205 : vector<8x128xi32>
    %207 = arith.select %206, %185, %204 : vector<8x128xi1>, vector<8x128xf32>
    %c-100_i32_50 = arith.constant -100 : i32
    %208 = vector.broadcast %c-100_i32_50 : i32 to vector<8x128xi32>
    %209 = arith.cmpi eq, %26, %208 : vector<8x128xi32>
    %cst_51 = arith.constant 0.000000e+00 : f32
    %210 = vector.broadcast %cst_51 : f32 to vector<8x128xf32>
    %211 = arith.subf %210, %207 : vector<8x128xf32>
    %cst_52 = arith.constant 0.000000e+00 : f32
    %212 = vector.broadcast %cst_52 : f32 to vector<8x128xf32>
    %213 = arith.select %209, %212, %211 : vector<8x128xi1>, vector<8x128xf32>
    %c12 = arith.constant 12 : index
    %214 = arith.index_cast %23 : i32 to index
    %c0_53 = arith.constant 0 : index
    %215 = vector.load %arg2[%c12, %214, %c0_53] : memref<16x32x128xf32, #tpu.memory_space<vmem>>, vector<1x8x128xf32>
    %216 = vector.shape_cast %215 : vector<1x8x128xf32> to vector<8x128xf32>
    %c13 = arith.constant 13 : index
    %217 = arith.index_cast %23 : i32 to index
    %c0_54 = arith.constant 0 : index
    %218 = vector.load %arg2[%c13, %217, %c0_54] : memref<16x32x128xf32, #tpu.memory_space<vmem>>, vector<1x8x128xf32>
    %219 = vector.shape_cast %218 : vector<1x8x128xf32> to vector<8x128xf32>
    %c14 = arith.constant 14 : index
    %220 = arith.index_cast %23 : i32 to index
    %c0_55 = arith.constant 0 : index
    %221 = vector.load %arg2[%c14, %220, %c0_55] : memref<16x32x128xf32, #tpu.memory_space<vmem>>, vector<1x8x128xf32>
    %222 = vector.shape_cast %221 : vector<1x8x128xf32> to vector<8x128xf32>
    %c15 = arith.constant 15 : index
    %223 = arith.index_cast %23 : i32 to index
    %c0_56 = arith.constant 0 : index
    %224 = vector.load %arg2[%c15, %223, %c0_56] : memref<16x32x128xf32, #tpu.memory_space<vmem>>, vector<1x8x128xf32>
    %225 = vector.shape_cast %224 : vector<1x8x128xf32> to vector<8x128xf32>
    %226 = arith.maximumf %216, %219 : vector<8x128xf32>
    %227 = arith.maximumf %226, %222 : vector<8x128xf32>
    %228 = arith.maximumf %227, %225 : vector<8x128xf32>
    %229 = arith.subf %216, %228 : vector<8x128xf32>
    %230 = math.exp %229 : vector<8x128xf32>
    %231 = arith.subf %219, %228 : vector<8x128xf32>
    %232 = math.exp %231 : vector<8x128xf32>
    %233 = arith.subf %222, %228 : vector<8x128xf32>
    %234 = math.exp %233 : vector<8x128xf32>
    %235 = arith.subf %225, %228 : vector<8x128xf32>
    %236 = math.exp %235 : vector<8x128xf32>
    %237 = arith.addf %230, %232 : vector<8x128xf32>
    %238 = arith.addf %237, %234 : vector<8x128xf32>
    %239 = arith.addf %238, %236 : vector<8x128xf32>
    %240 = arith.addf %230, %232 : vector<8x128xf32>
    %cst_57 = arith.constant 9.99999991E-38 : f32
    %241 = vector.broadcast %cst_57 : f32 to vector<8x128xf32>
    %242 = arith.maximumf %240, %241 : vector<8x128xf32>
    %243 = math.log %239 : vector<8x128xf32>
    %244 = arith.addf %228, %243 : vector<8x128xf32>
    %245 = math.log %242 : vector<8x128xf32>
    %246 = arith.subf %245, %243 : vector<8x128xf32>
    %247 = arith.subf %222, %244 : vector<8x128xf32>
    %248 = arith.subf %225, %244 : vector<8x128xf32>
    %cst_58 = arith.constant 1.000000e+00 : f32
    %249 = vector.broadcast %cst_58 : f32 to vector<8x128xf32>
    %250 = arith.subf %249, %246 : vector<8x128xf32>
    %251 = arith.mulf %250, %250 : vector<8x128xf32>
    %252 = arith.addf %189, %251 : vector<8x128xf32>
    %cst_59 = arith.constant 1.000000e+00 : f32
    %253 = vector.broadcast %cst_59 : f32 to vector<8x128xf32>
    %254 = arith.subf %253, %247 : vector<8x128xf32>
    %255 = arith.mulf %254, %254 : vector<8x128xf32>
    %256 = arith.addf %193, %255 : vector<8x128xf32>
    %cst_60 = arith.constant 1.000000e+00 : f32
    %257 = vector.broadcast %cst_60 : f32 to vector<8x128xf32>
    %258 = arith.subf %257, %248 : vector<8x128xf32>
    %259 = arith.mulf %258, %258 : vector<8x128xf32>
    %260 = arith.addf %197, %259 : vector<8x128xf32>
    %cst_61 = arith.constant 0.000000e+00 : f32
    %261 = vector.broadcast %cst_61 : f32 to vector<8x128xf32>
    %c0_i32_62 = arith.constant 0 : i32
    %262 = vector.broadcast %c0_i32_62 : i32 to vector<8x128xi32>
    %263 = arith.cmpi eq, %27, %262 : vector<8x128xi32>
    %264 = arith.select %263, %246, %261 : vector<8x128xi1>, vector<8x128xf32>
    %c2_i32_63 = arith.constant 2 : i32
    %265 = vector.broadcast %c2_i32_63 : i32 to vector<8x128xi32>
    %266 = arith.cmpi eq, %27, %265 : vector<8x128xi32>
    %267 = arith.select %266, %247, %264 : vector<8x128xi1>, vector<8x128xf32>
    %c3_i32_64 = arith.constant 3 : i32
    %268 = vector.broadcast %c3_i32_64 : i32 to vector<8x128xi32>
    %269 = arith.cmpi eq, %27, %268 : vector<8x128xi32>
    %270 = arith.select %269, %248, %267 : vector<8x128xi1>, vector<8x128xf32>
    %c-100_i32_65 = arith.constant -100 : i32
    %271 = vector.broadcast %c-100_i32_65 : i32 to vector<8x128xi32>
    %272 = arith.cmpi eq, %27, %271 : vector<8x128xi32>
    %cst_66 = arith.constant 0.000000e+00 : f32
    %273 = vector.broadcast %cst_66 : f32 to vector<8x128xf32>
    %274 = arith.subf %273, %270 : vector<8x128xf32>
    %cst_67 = arith.constant 0.000000e+00 : f32
    %275 = vector.broadcast %cst_67 : f32 to vector<8x128xf32>
    %276 = arith.select %272, %275, %274 : vector<8x128xi1>, vector<8x128xf32>
    %277 = arith.mulf %87, %252 : vector<8x128xf32>
    %cst_68 = arith.constant 4.000000e+00 : f32
    %278 = vector.broadcast %cst_68 : f32 to vector<8x128xf32>
    %279 = arith.mulf %150, %278 : vector<8x128xf32>
    %280 = arith.addf %277, %279 : vector<8x128xf32>
    %281 = arith.mulf %213, %256 : vector<8x128xf32>
    %282 = arith.addf %280, %281 : vector<8x128xf32>
    %283 = arith.mulf %276, %260 : vector<8x128xf32>
    %284 = arith.addf %282, %283 : vector<8x128xf32>
    %285 = arith.addf %3, %284 : vector<8x128xf32>
    %c8_i32 = arith.constant 8 : i32
    %286 = arith.addi %5, %c8_i32 : i32
    %287 = tpu.assume_multiple %286, 8 : i32
    %288 = vector.extract_strided_slice %9 {offsets = [8, 0], sizes = [8, 128], strides = [1, 1]} : vector<32x128xi32> to vector<8x128xi32>
    %289 = vector.extract_strided_slice %13 {offsets = [8, 0], sizes = [8, 128], strides = [1, 1]} : vector<32x128xi32> to vector<8x128xi32>
    %290 = vector.extract_strided_slice %17 {offsets = [8, 0], sizes = [8, 128], strides = [1, 1]} : vector<32x128xi32> to vector<8x128xi32>
    %291 = vector.extract_strided_slice %21 {offsets = [8, 0], sizes = [8, 128], strides = [1, 1]} : vector<32x128xi32> to vector<8x128xi32>
    %c0_69 = arith.constant 0 : index
    %292 = arith.index_cast %287 : i32 to index
    %c0_70 = arith.constant 0 : index
    %293 = vector.load %arg2[%c0_69, %292, %c0_70] : memref<16x32x128xf32, #tpu.memory_space<vmem>>, vector<1x8x128xf32>
    %294 = vector.shape_cast %293 : vector<1x8x128xf32> to vector<8x128xf32>
    %c1_71 = arith.constant 1 : index
    %295 = arith.index_cast %287 : i32 to index
    %c0_72 = arith.constant 0 : index
    %296 = vector.load %arg2[%c1_71, %295, %c0_72] : memref<16x32x128xf32, #tpu.memory_space<vmem>>, vector<1x8x128xf32>
    %297 = vector.shape_cast %296 : vector<1x8x128xf32> to vector<8x128xf32>
    %c2_73 = arith.constant 2 : index
    %298 = arith.index_cast %287 : i32 to index
    %c0_74 = arith.constant 0 : index
    %299 = vector.load %arg2[%c2_73, %298, %c0_74] : memref<16x32x128xf32, #tpu.memory_space<vmem>>, vector<1x8x128xf32>
    %300 = vector.shape_cast %299 : vector<1x8x128xf32> to vector<8x128xf32>
    %c3_75 = arith.constant 3 : index
    %301 = arith.index_cast %287 : i32 to index
    %c0_76 = arith.constant 0 : index
    %302 = vector.load %arg2[%c3_75, %301, %c0_76] : memref<16x32x128xf32, #tpu.memory_space<vmem>>, vector<1x8x128xf32>
    %303 = vector.shape_cast %302 : vector<1x8x128xf32> to vector<8x128xf32>
    %304 = arith.maximumf %294, %297 : vector<8x128xf32>
    %305 = arith.maximumf %304, %300 : vector<8x128xf32>
    %306 = arith.maximumf %305, %303 : vector<8x128xf32>
    %307 = arith.subf %294, %306 : vector<8x128xf32>
    %308 = math.exp %307 : vector<8x128xf32>
    %309 = arith.subf %297, %306 : vector<8x128xf32>
    %310 = math.exp %309 : vector<8x128xf32>
    %311 = arith.subf %300, %306 : vector<8x128xf32>
    %312 = math.exp %311 : vector<8x128xf32>
    %313 = arith.subf %303, %306 : vector<8x128xf32>
    %314 = math.exp %313 : vector<8x128xf32>
    %315 = arith.addf %308, %310 : vector<8x128xf32>
    %316 = arith.addf %315, %312 : vector<8x128xf32>
    %317 = arith.addf %316, %314 : vector<8x128xf32>
    %318 = arith.addf %308, %310 : vector<8x128xf32>
    %cst_77 = arith.constant 9.99999991E-38 : f32
    %319 = vector.broadcast %cst_77 : f32 to vector<8x128xf32>
    %320 = arith.maximumf %318, %319 : vector<8x128xf32>
    %321 = math.log %317 : vector<8x128xf32>
    %322 = arith.addf %306, %321 : vector<8x128xf32>
    %323 = math.log %320 : vector<8x128xf32>
    %324 = arith.subf %323, %321 : vector<8x128xf32>
    %325 = arith.subf %300, %322 : vector<8x128xf32>
    %326 = arith.subf %303, %322 : vector<8x128xf32>
    %cst_78 = arith.constant 1.000000e+00 : f32
    %327 = vector.broadcast %cst_78 : f32 to vector<8x128xf32>
    %328 = arith.subf %327, %324 : vector<8x128xf32>
    %329 = arith.mulf %328, %328 : vector<8x128xf32>
    %cst_79 = arith.constant 1.000000e+00 : f32
    %330 = vector.broadcast %cst_79 : f32 to vector<8x128xf32>
    %331 = arith.subf %330, %325 : vector<8x128xf32>
    %332 = arith.mulf %331, %331 : vector<8x128xf32>
    %cst_80 = arith.constant 1.000000e+00 : f32
    %333 = vector.broadcast %cst_80 : f32 to vector<8x128xf32>
    %334 = arith.subf %333, %326 : vector<8x128xf32>
    %335 = arith.mulf %334, %334 : vector<8x128xf32>
    %cst_81 = arith.constant 0.000000e+00 : f32
    %336 = vector.broadcast %cst_81 : f32 to vector<8x128xf32>
    %c0_i32_82 = arith.constant 0 : i32
    %337 = vector.broadcast %c0_i32_82 : i32 to vector<8x128xi32>
    %338 = arith.cmpi eq, %288, %337 : vector<8x128xi32>
    %339 = arith.select %338, %324, %336 : vector<8x128xi1>, vector<8x128xf32>
    %c2_i32_83 = arith.constant 2 : i32
    %340 = vector.broadcast %c2_i32_83 : i32 to vector<8x128xi32>
    %341 = arith.cmpi eq, %288, %340 : vector<8x128xi32>
    %342 = arith.select %341, %325, %339 : vector<8x128xi1>, vector<8x128xf32>
    %c3_i32_84 = arith.constant 3 : i32
    %343 = vector.broadcast %c3_i32_84 : i32 to vector<8x128xi32>
    %344 = arith.cmpi eq, %288, %343 : vector<8x128xi32>
    %345 = arith.select %344, %326, %342 : vector<8x128xi1>, vector<8x128xf32>
    %c-100_i32_85 = arith.constant -100 : i32
    %346 = vector.broadcast %c-100_i32_85 : i32 to vector<8x128xi32>
    %347 = arith.cmpi eq, %288, %346 : vector<8x128xi32>
    %cst_86 = arith.constant 0.000000e+00 : f32
    %348 = vector.broadcast %cst_86 : f32 to vector<8x128xf32>
    %349 = arith.subf %348, %345 : vector<8x128xf32>
    %cst_87 = arith.constant 0.000000e+00 : f32
    %350 = vector.broadcast %cst_87 : f32 to vector<8x128xf32>
    %351 = arith.select %347, %350, %349 : vector<8x128xi1>, vector<8x128xf32>
    %c4_88 = arith.constant 4 : index
    %352 = arith.index_cast %287 : i32 to index
    %c0_89 = arith.constant 0 : index
    %353 = vector.load %arg2[%c4_88, %352, %c0_89] : memref<16x32x128xf32, #tpu.memory_space<vmem>>, vector<1x8x128xf32>
    %354 = vector.shape_cast %353 : vector<1x8x128xf32> to vector<8x128xf32>
    %c5_90 = arith.constant 5 : index
    %355 = arith.index_cast %287 : i32 to index
    %c0_91 = arith.constant 0 : index
    %356 = vector.load %arg2[%c5_90, %355, %c0_91] : memref<16x32x128xf32, #tpu.memory_space<vmem>>, vector<1x8x128xf32>
    %357 = vector.shape_cast %356 : vector<1x8x128xf32> to vector<8x128xf32>
    %c6_92 = arith.constant 6 : index
    %358 = arith.index_cast %287 : i32 to index
    %c0_93 = arith.constant 0 : index
    %359 = vector.load %arg2[%c6_92, %358, %c0_93] : memref<16x32x128xf32, #tpu.memory_space<vmem>>, vector<1x8x128xf32>
    %360 = vector.shape_cast %359 : vector<1x8x128xf32> to vector<8x128xf32>
    %c7_94 = arith.constant 7 : index
    %361 = arith.index_cast %287 : i32 to index
    %c0_95 = arith.constant 0 : index
    %362 = vector.load %arg2[%c7_94, %361, %c0_95] : memref<16x32x128xf32, #tpu.memory_space<vmem>>, vector<1x8x128xf32>
    %363 = vector.shape_cast %362 : vector<1x8x128xf32> to vector<8x128xf32>
    %364 = arith.maximumf %354, %357 : vector<8x128xf32>
    %365 = arith.maximumf %364, %360 : vector<8x128xf32>
    %366 = arith.maximumf %365, %363 : vector<8x128xf32>
    %367 = arith.subf %354, %366 : vector<8x128xf32>
    %368 = math.exp %367 : vector<8x128xf32>
    %369 = arith.subf %357, %366 : vector<8x128xf32>
    %370 = math.exp %369 : vector<8x128xf32>
    %371 = arith.subf %360, %366 : vector<8x128xf32>
    %372 = math.exp %371 : vector<8x128xf32>
    %373 = arith.subf %363, %366 : vector<8x128xf32>
    %374 = math.exp %373 : vector<8x128xf32>
    %375 = arith.addf %368, %370 : vector<8x128xf32>
    %376 = arith.addf %375, %372 : vector<8x128xf32>
    %377 = arith.addf %376, %374 : vector<8x128xf32>
    %378 = arith.addf %368, %370 : vector<8x128xf32>
    %cst_96 = arith.constant 9.99999991E-38 : f32
    %379 = vector.broadcast %cst_96 : f32 to vector<8x128xf32>
    %380 = arith.maximumf %378, %379 : vector<8x128xf32>
    %381 = math.log %377 : vector<8x128xf32>
    %382 = arith.addf %366, %381 : vector<8x128xf32>
    %383 = math.log %380 : vector<8x128xf32>
    %384 = arith.subf %383, %381 : vector<8x128xf32>
    %385 = arith.subf %360, %382 : vector<8x128xf32>
    %386 = arith.subf %363, %382 : vector<8x128xf32>
    %cst_97 = arith.constant 1.000000e+00 : f32
    %387 = vector.broadcast %cst_97 : f32 to vector<8x128xf32>
    %388 = arith.subf %387, %384 : vector<8x128xf32>
    %389 = arith.mulf %388, %388 : vector<8x128xf32>
    %390 = arith.addf %329, %389 : vector<8x128xf32>
    %cst_98 = arith.constant 1.000000e+00 : f32
    %391 = vector.broadcast %cst_98 : f32 to vector<8x128xf32>
    %392 = arith.subf %391, %385 : vector<8x128xf32>
    %393 = arith.mulf %392, %392 : vector<8x128xf32>
    %394 = arith.addf %332, %393 : vector<8x128xf32>
    %cst_99 = arith.constant 1.000000e+00 : f32
    %395 = vector.broadcast %cst_99 : f32 to vector<8x128xf32>
    %396 = arith.subf %395, %386 : vector<8x128xf32>
    %397 = arith.mulf %396, %396 : vector<8x128xf32>
    %398 = arith.addf %335, %397 : vector<8x128xf32>
    %cst_100 = arith.constant 0.000000e+00 : f32
    %399 = vector.broadcast %cst_100 : f32 to vector<8x128xf32>
    %c0_i32_101 = arith.constant 0 : i32
    %400 = vector.broadcast %c0_i32_101 : i32 to vector<8x128xi32>
    %401 = arith.cmpi eq, %289, %400 : vector<8x128xi32>
    %402 = arith.select %401, %384, %399 : vector<8x128xi1>, vector<8x128xf32>
    %c2_i32_102 = arith.constant 2 : i32
    %403 = vector.broadcast %c2_i32_102 : i32 to vector<8x128xi32>
    %404 = arith.cmpi eq, %289, %403 : vector<8x128xi32>
    %405 = arith.select %404, %385, %402 : vector<8x128xi1>, vector<8x128xf32>
    %c3_i32_103 = arith.constant 3 : i32
    %406 = vector.broadcast %c3_i32_103 : i32 to vector<8x128xi32>
    %407 = arith.cmpi eq, %289, %406 : vector<8x128xi32>
    %408 = arith.select %407, %386, %405 : vector<8x128xi1>, vector<8x128xf32>
    %c-100_i32_104 = arith.constant -100 : i32
    %409 = vector.broadcast %c-100_i32_104 : i32 to vector<8x128xi32>
    %410 = arith.cmpi eq, %289, %409 : vector<8x128xi32>
    %cst_105 = arith.constant 0.000000e+00 : f32
    %411 = vector.broadcast %cst_105 : f32 to vector<8x128xf32>
    %412 = arith.subf %411, %408 : vector<8x128xf32>
    %cst_106 = arith.constant 0.000000e+00 : f32
    %413 = vector.broadcast %cst_106 : f32 to vector<8x128xf32>
    %414 = arith.select %410, %413, %412 : vector<8x128xi1>, vector<8x128xf32>
    %c8_107 = arith.constant 8 : index
    %415 = arith.index_cast %287 : i32 to index
    %c0_108 = arith.constant 0 : index
    %416 = vector.load %arg2[%c8_107, %415, %c0_108] : memref<16x32x128xf32, #tpu.memory_space<vmem>>, vector<1x8x128xf32>
    %417 = vector.shape_cast %416 : vector<1x8x128xf32> to vector<8x128xf32>
    %c9_109 = arith.constant 9 : index
    %418 = arith.index_cast %287 : i32 to index
    %c0_110 = arith.constant 0 : index
    %419 = vector.load %arg2[%c9_109, %418, %c0_110] : memref<16x32x128xf32, #tpu.memory_space<vmem>>, vector<1x8x128xf32>
    %420 = vector.shape_cast %419 : vector<1x8x128xf32> to vector<8x128xf32>
    %c10_111 = arith.constant 10 : index
    %421 = arith.index_cast %287 : i32 to index
    %c0_112 = arith.constant 0 : index
    %422 = vector.load %arg2[%c10_111, %421, %c0_112] : memref<16x32x128xf32, #tpu.memory_space<vmem>>, vector<1x8x128xf32>
    %423 = vector.shape_cast %422 : vector<1x8x128xf32> to vector<8x128xf32>
    %c11_113 = arith.constant 11 : index
    %424 = arith.index_cast %287 : i32 to index
    %c0_114 = arith.constant 0 : index
    %425 = vector.load %arg2[%c11_113, %424, %c0_114] : memref<16x32x128xf32, #tpu.memory_space<vmem>>, vector<1x8x128xf32>
    %426 = vector.shape_cast %425 : vector<1x8x128xf32> to vector<8x128xf32>
    %427 = arith.maximumf %417, %420 : vector<8x128xf32>
    %428 = arith.maximumf %427, %423 : vector<8x128xf32>
    %429 = arith.maximumf %428, %426 : vector<8x128xf32>
    %430 = arith.subf %417, %429 : vector<8x128xf32>
    %431 = math.exp %430 : vector<8x128xf32>
    %432 = arith.subf %420, %429 : vector<8x128xf32>
    %433 = math.exp %432 : vector<8x128xf32>
    %434 = arith.subf %423, %429 : vector<8x128xf32>
    %435 = math.exp %434 : vector<8x128xf32>
    %436 = arith.subf %426, %429 : vector<8x128xf32>
    %437 = math.exp %436 : vector<8x128xf32>
    %438 = arith.addf %431, %433 : vector<8x128xf32>
    %439 = arith.addf %438, %435 : vector<8x128xf32>
    %440 = arith.addf %439, %437 : vector<8x128xf32>
    %441 = arith.addf %431, %433 : vector<8x128xf32>
    %cst_115 = arith.constant 9.99999991E-38 : f32
    %442 = vector.broadcast %cst_115 : f32 to vector<8x128xf32>
    %443 = arith.maximumf %441, %442 : vector<8x128xf32>
    %444 = math.log %440 : vector<8x128xf32>
    %445 = arith.addf %429, %444 : vector<8x128xf32>
    %446 = math.log %443 : vector<8x128xf32>
    %447 = arith.subf %446, %444 : vector<8x128xf32>
    %448 = arith.subf %423, %445 : vector<8x128xf32>
    %449 = arith.subf %426, %445 : vector<8x128xf32>
    %cst_116 = arith.constant 1.000000e+00 : f32
    %450 = vector.broadcast %cst_116 : f32 to vector<8x128xf32>
    %451 = arith.subf %450, %447 : vector<8x128xf32>
    %452 = arith.mulf %451, %451 : vector<8x128xf32>
    %453 = arith.addf %390, %452 : vector<8x128xf32>
    %cst_117 = arith.constant 1.000000e+00 : f32
    %454 = vector.broadcast %cst_117 : f32 to vector<8x128xf32>
    %455 = arith.subf %454, %448 : vector<8x128xf32>
    %456 = arith.mulf %455, %455 : vector<8x128xf32>
    %457 = arith.addf %394, %456 : vector<8x128xf32>
    %cst_118 = arith.constant 1.000000e+00 : f32
    %458 = vector.broadcast %cst_118 : f32 to vector<8x128xf32>
    %459 = arith.subf %458, %449 : vector<8x128xf32>
    %460 = arith.mulf %459, %459 : vector<8x128xf32>
    %461 = arith.addf %398, %460 : vector<8x128xf32>
    %cst_119 = arith.constant 0.000000e+00 : f32
    %462 = vector.broadcast %cst_119 : f32 to vector<8x128xf32>
    %c0_i32_120 = arith.constant 0 : i32
    %463 = vector.broadcast %c0_i32_120 : i32 to vector<8x128xi32>
    %464 = arith.cmpi eq, %290, %463 : vector<8x128xi32>
    %465 = arith.select %464, %447, %462 : vector<8x128xi1>, vector<8x128xf32>
    %c2_i32_121 = arith.constant 2 : i32
    %466 = vector.broadcast %c2_i32_121 : i32 to vector<8x128xi32>
    %467 = arith.cmpi eq, %290, %466 : vector<8x128xi32>
    %468 = arith.select %467, %448, %465 : vector<8x128xi1>, vector<8x128xf32>
    %c3_i32_122 = arith.constant 3 : i32
    %469 = vector.broadcast %c3_i32_122 : i32 to vector<8x128xi32>
    %470 = arith.cmpi eq, %290, %469 : vector<8x128xi32>
    %471 = arith.select %470, %449, %468 : vector<8x128xi1>, vector<8x128xf32>
    %c-100_i32_123 = arith.constant -100 : i32
    %472 = vector.broadcast %c-100_i32_123 : i32 to vector<8x128xi32>
    %473 = arith.cmpi eq, %290, %472 : vector<8x128xi32>
    %cst_124 = arith.constant 0.000000e+00 : f32
    %474 = vector.broadcast %cst_124 : f32 to vector<8x128xf32>
    %475 = arith.subf %474, %471 : vector<8x128xf32>
    %cst_125 = arith.constant 0.000000e+00 : f32
    %476 = vector.broadcast %cst_125 : f32 to vector<8x128xf32>
    %477 = arith.select %473, %476, %475 : vector<8x128xi1>, vector<8x128xf32>
    %c12_126 = arith.constant 12 : index
    %478 = arith.index_cast %287 : i32 to index
    %c0_127 = arith.constant 0 : index
    %479 = vector.load %arg2[%c12_126, %478, %c0_127] : memref<16x32x128xf32, #tpu.memory_space<vmem>>, vector<1x8x128xf32>
    %480 = vector.shape_cast %479 : vector<1x8x128xf32> to vector<8x128xf32>
    %c13_128 = arith.constant 13 : index
    %481 = arith.index_cast %287 : i32 to index
    %c0_129 = arith.constant 0 : index
    %482 = vector.load %arg2[%c13_128, %481, %c0_129] : memref<16x32x128xf32, #tpu.memory_space<vmem>>, vector<1x8x128xf32>
    %483 = vector.shape_cast %482 : vector<1x8x128xf32> to vector<8x128xf32>
    %c14_130 = arith.constant 14 : index
    %484 = arith.index_cast %287 : i32 to index
    %c0_131 = arith.constant 0 : index
    %485 = vector.load %arg2[%c14_130, %484, %c0_131] : memref<16x32x128xf32, #tpu.memory_space<vmem>>, vector<1x8x128xf32>
    %486 = vector.shape_cast %485 : vector<1x8x128xf32> to vector<8x128xf32>
    %c15_132 = arith.constant 15 : index
    %487 = arith.index_cast %287 : i32 to index
    %c0_133 = arith.constant 0 : index
    %488 = vector.load %arg2[%c15_132, %487, %c0_133] : memref<16x32x128xf32, #tpu.memory_space<vmem>>, vector<1x8x128xf32>
    %489 = vector.shape_cast %488 : vector<1x8x128xf32> to vector<8x128xf32>
    %490 = arith.maximumf %480, %483 : vector<8x128xf32>
    %491 = arith.maximumf %490, %486 : vector<8x128xf32>
    %492 = arith.maximumf %491, %489 : vector<8x128xf32>
    %493 = arith.subf %480, %492 : vector<8x128xf32>
    %494 = math.exp %493 : vector<8x128xf32>
    %495 = arith.subf %483, %492 : vector<8x128xf32>
    %496 = math.exp %495 : vector<8x128xf32>
    %497 = arith.subf %486, %492 : vector<8x128xf32>
    %498 = math.exp %497 : vector<8x128xf32>
    %499 = arith.subf %489, %492 : vector<8x128xf32>
    %500 = math.exp %499 : vector<8x128xf32>
    %501 = arith.addf %494, %496 : vector<8x128xf32>
    %502 = arith.addf %501, %498 : vector<8x128xf32>
    %503 = arith.addf %502, %500 : vector<8x128xf32>
    %504 = arith.addf %494, %496 : vector<8x128xf32>
    %cst_134 = arith.constant 9.99999991E-38 : f32
    %505 = vector.broadcast %cst_134 : f32 to vector<8x128xf32>
    %506 = arith.maximumf %504, %505 : vector<8x128xf32>
    %507 = math.log %503 : vector<8x128xf32>
    %508 = arith.addf %492, %507 : vector<8x128xf32>
    %509 = math.log %506 : vector<8x128xf32>
    %510 = arith.subf %509, %507 : vector<8x128xf32>
    %511 = arith.subf %486, %508 : vector<8x128xf32>
    %512 = arith.subf %489, %508 : vector<8x128xf32>
    %cst_135 = arith.constant 1.000000e+00 : f32
    %513 = vector.broadcast %cst_135 : f32 to vector<8x128xf32>
    %514 = arith.subf %513, %510 : vector<8x128xf32>
    %515 = arith.mulf %514, %514 : vector<8x128xf32>
    %516 = arith.addf %453, %515 : vector<8x128xf32>
    %cst_136 = arith.constant 1.000000e+00 : f32
    %517 = vector.broadcast %cst_136 : f32 to vector<8x128xf32>
    %518 = arith.subf %517, %511 : vector<8x128xf32>
    %519 = arith.mulf %518, %518 : vector<8x128xf32>
    %520 = arith.addf %457, %519 : vector<8x128xf32>
    %cst_137 = arith.constant 1.000000e+00 : f32
    %521 = vector.broadcast %cst_137 : f32 to vector<8x128xf32>
    %522 = arith.subf %521, %512 : vector<8x128xf32>
    %523 = arith.mulf %522, %522 : vector<8x128xf32>
    %524 = arith.addf %461, %523 : vector<8x128xf32>
    %cst_138 = arith.constant 0.000000e+00 : f32
    %525 = vector.broadcast %cst_138 : f32 to vector<8x128xf32>
    %c0_i32_139 = arith.constant 0 : i32
    %526 = vector.broadcast %c0_i32_139 : i32 to vector<8x128xi32>
    %527 = arith.cmpi eq, %291, %526 : vector<8x128xi32>
    %528 = arith.select %527, %510, %525 : vector<8x128xi1>, vector<8x128xf32>
    %c2_i32_140 = arith.constant 2 : i32
    %529 = vector.broadcast %c2_i32_140 : i32 to vector<8x128xi32>
    %530 = arith.cmpi eq, %291, %529 : vector<8x128xi32>
    %531 = arith.select %530, %511, %528 : vector<8x128xi1>, vector<8x128xf32>
    %c3_i32_141 = arith.constant 3 : i32
    %532 = vector.broadcast %c3_i32_141 : i32 to vector<8x128xi32>
    %533 = arith.cmpi eq, %291, %532 : vector<8x128xi32>
    %534 = arith.select %533, %512, %531 : vector<8x128xi1>, vector<8x128xf32>
    %c-100_i32_142 = arith.constant -100 : i32
    %535 = vector.broadcast %c-100_i32_142 : i32 to vector<8x128xi32>
    %536 = arith.cmpi eq, %291, %535 : vector<8x128xi32>
    %cst_143 = arith.constant 0.000000e+00 : f32
    %537 = vector.broadcast %cst_143 : f32 to vector<8x128xf32>
    %538 = arith.subf %537, %534 : vector<8x128xf32>
    %cst_144 = arith.constant 0.000000e+00 : f32
    %539 = vector.broadcast %cst_144 : f32 to vector<8x128xf32>
    %540 = arith.select %536, %539, %538 : vector<8x128xi1>, vector<8x128xf32>
    %541 = arith.mulf %351, %516 : vector<8x128xf32>
    %cst_145 = arith.constant 4.000000e+00 : f32
    %542 = vector.broadcast %cst_145 : f32 to vector<8x128xf32>
    %543 = arith.mulf %414, %542 : vector<8x128xf32>
    %544 = arith.addf %541, %543 : vector<8x128xf32>
    %545 = arith.mulf %477, %520 : vector<8x128xf32>
    %546 = arith.addf %544, %545 : vector<8x128xf32>
    %547 = arith.mulf %540, %524 : vector<8x128xf32>
    %548 = arith.addf %546, %547 : vector<8x128xf32>
    %549 = arith.addf %285, %548 : vector<8x128xf32>
    %c16_i32 = arith.constant 16 : i32
    %550 = arith.addi %5, %c16_i32 : i32
    %551 = tpu.assume_multiple %550, 8 : i32
    %552 = vector.extract_strided_slice %9 {offsets = [16, 0], sizes = [8, 128], strides = [1, 1]} : vector<32x128xi32> to vector<8x128xi32>
    %553 = vector.extract_strided_slice %13 {offsets = [16, 0], sizes = [8, 128], strides = [1, 1]} : vector<32x128xi32> to vector<8x128xi32>
    %554 = vector.extract_strided_slice %17 {offsets = [16, 0], sizes = [8, 128], strides = [1, 1]} : vector<32x128xi32> to vector<8x128xi32>
    %555 = vector.extract_strided_slice %21 {offsets = [16, 0], sizes = [8, 128], strides = [1, 1]} : vector<32x128xi32> to vector<8x128xi32>
    %c0_146 = arith.constant 0 : index
    %556 = arith.index_cast %551 : i32 to index
    %c0_147 = arith.constant 0 : index
    %557 = vector.load %arg2[%c0_146, %556, %c0_147] : memref<16x32x128xf32, #tpu.memory_space<vmem>>, vector<1x8x128xf32>
    %558 = vector.shape_cast %557 : vector<1x8x128xf32> to vector<8x128xf32>
    %c1_148 = arith.constant 1 : index
    %559 = arith.index_cast %551 : i32 to index
    %c0_149 = arith.constant 0 : index
    %560 = vector.load %arg2[%c1_148, %559, %c0_149] : memref<16x32x128xf32, #tpu.memory_space<vmem>>, vector<1x8x128xf32>
    %561 = vector.shape_cast %560 : vector<1x8x128xf32> to vector<8x128xf32>
    %c2_150 = arith.constant 2 : index
    %562 = arith.index_cast %551 : i32 to index
    %c0_151 = arith.constant 0 : index
    %563 = vector.load %arg2[%c2_150, %562, %c0_151] : memref<16x32x128xf32, #tpu.memory_space<vmem>>, vector<1x8x128xf32>
    %564 = vector.shape_cast %563 : vector<1x8x128xf32> to vector<8x128xf32>
    %c3_152 = arith.constant 3 : index
    %565 = arith.index_cast %551 : i32 to index
    %c0_153 = arith.constant 0 : index
    %566 = vector.load %arg2[%c3_152, %565, %c0_153] : memref<16x32x128xf32, #tpu.memory_space<vmem>>, vector<1x8x128xf32>
    %567 = vector.shape_cast %566 : vector<1x8x128xf32> to vector<8x128xf32>
    %568 = arith.maximumf %558, %561 : vector<8x128xf32>
    %569 = arith.maximumf %568, %564 : vector<8x128xf32>
    %570 = arith.maximumf %569, %567 : vector<8x128xf32>
    %571 = arith.subf %558, %570 : vector<8x128xf32>
    %572 = math.exp %571 : vector<8x128xf32>
    %573 = arith.subf %561, %570 : vector<8x128xf32>
    %574 = math.exp %573 : vector<8x128xf32>
    %575 = arith.subf %564, %570 : vector<8x128xf32>
    %576 = math.exp %575 : vector<8x128xf32>
    %577 = arith.subf %567, %570 : vector<8x128xf32>
    %578 = math.exp %577 : vector<8x128xf32>
    %579 = arith.addf %572, %574 : vector<8x128xf32>
    %580 = arith.addf %579, %576 : vector<8x128xf32>
    %581 = arith.addf %580, %578 : vector<8x128xf32>
    %582 = arith.addf %572, %574 : vector<8x128xf32>
    %cst_154 = arith.constant 9.99999991E-38 : f32
    %583 = vector.broadcast %cst_154 : f32 to vector<8x128xf32>
    %584 = arith.maximumf %582, %583 : vector<8x128xf32>
    %585 = math.log %581 : vector<8x128xf32>
    %586 = arith.addf %570, %585 : vector<8x128xf32>
    %587 = math.log %584 : vector<8x128xf32>
    %588 = arith.subf %587, %585 : vector<8x128xf32>
    %589 = arith.subf %564, %586 : vector<8x128xf32>
    %590 = arith.subf %567, %586 : vector<8x128xf32>
    %cst_155 = arith.constant 1.000000e+00 : f32
    %591 = vector.broadcast %cst_155 : f32 to vector<8x128xf32>
    %592 = arith.subf %591, %588 : vector<8x128xf32>
    %593 = arith.mulf %592, %592 : vector<8x128xf32>
    %cst_156 = arith.constant 1.000000e+00 : f32
    %594 = vector.broadcast %cst_156 : f32 to vector<8x128xf32>
    %595 = arith.subf %594, %589 : vector<8x128xf32>
    %596 = arith.mulf %595, %595 : vector<8x128xf32>
    %cst_157 = arith.constant 1.000000e+00 : f32
    %597 = vector.broadcast %cst_157 : f32 to vector<8x128xf32>
    %598 = arith.subf %597, %590 : vector<8x128xf32>
    %599 = arith.mulf %598, %598 : vector<8x128xf32>
    %cst_158 = arith.constant 0.000000e+00 : f32
    %600 = vector.broadcast %cst_158 : f32 to vector<8x128xf32>
    %c0_i32_159 = arith.constant 0 : i32
    %601 = vector.broadcast %c0_i32_159 : i32 to vector<8x128xi32>
    %602 = arith.cmpi eq, %552, %601 : vector<8x128xi32>
    %603 = arith.select %602, %588, %600 : vector<8x128xi1>, vector<8x128xf32>
    %c2_i32_160 = arith.constant 2 : i32
    %604 = vector.broadcast %c2_i32_160 : i32 to vector<8x128xi32>
    %605 = arith.cmpi eq, %552, %604 : vector<8x128xi32>
    %606 = arith.select %605, %589, %603 : vector<8x128xi1>, vector<8x128xf32>
    %c3_i32_161 = arith.constant 3 : i32
    %607 = vector.broadcast %c3_i32_161 : i32 to vector<8x128xi32>
    %608 = arith.cmpi eq, %552, %607 : vector<8x128xi32>
    %609 = arith.select %608, %590, %606 : vector<8x128xi1>, vector<8x128xf32>
    %c-100_i32_162 = arith.constant -100 : i32
    %610 = vector.broadcast %c-100_i32_162 : i32 to vector<8x128xi32>
    %611 = arith.cmpi eq, %552, %610 : vector<8x128xi32>
    %cst_163 = arith.constant 0.000000e+00 : f32
    %612 = vector.broadcast %cst_163 : f32 to vector<8x128xf32>
    %613 = arith.subf %612, %609 : vector<8x128xf32>
    %cst_164 = arith.constant 0.000000e+00 : f32
    %614 = vector.broadcast %cst_164 : f32 to vector<8x128xf32>
    %615 = arith.select %611, %614, %613 : vector<8x128xi1>, vector<8x128xf32>
    %c4_165 = arith.constant 4 : index
    %616 = arith.index_cast %551 : i32 to index
    %c0_166 = arith.constant 0 : index
    %617 = vector.load %arg2[%c4_165, %616, %c0_166] : memref<16x32x128xf32, #tpu.memory_space<vmem>>, vector<1x8x128xf32>
    %618 = vector.shape_cast %617 : vector<1x8x128xf32> to vector<8x128xf32>
    %c5_167 = arith.constant 5 : index
    %619 = arith.index_cast %551 : i32 to index
    %c0_168 = arith.constant 0 : index
    %620 = vector.load %arg2[%c5_167, %619, %c0_168] : memref<16x32x128xf32, #tpu.memory_space<vmem>>, vector<1x8x128xf32>
    %621 = vector.shape_cast %620 : vector<1x8x128xf32> to vector<8x128xf32>
    %c6_169 = arith.constant 6 : index
    %622 = arith.index_cast %551 : i32 to index
    %c0_170 = arith.constant 0 : index
    %623 = vector.load %arg2[%c6_169, %622, %c0_170] : memref<16x32x128xf32, #tpu.memory_space<vmem>>, vector<1x8x128xf32>
    %624 = vector.shape_cast %623 : vector<1x8x128xf32> to vector<8x128xf32>
    %c7_171 = arith.constant 7 : index
    %625 = arith.index_cast %551 : i32 to index
    %c0_172 = arith.constant 0 : index
    %626 = vector.load %arg2[%c7_171, %625, %c0_172] : memref<16x32x128xf32, #tpu.memory_space<vmem>>, vector<1x8x128xf32>
    %627 = vector.shape_cast %626 : vector<1x8x128xf32> to vector<8x128xf32>
    %628 = arith.maximumf %618, %621 : vector<8x128xf32>
    %629 = arith.maximumf %628, %624 : vector<8x128xf32>
    %630 = arith.maximumf %629, %627 : vector<8x128xf32>
    %631 = arith.subf %618, %630 : vector<8x128xf32>
    %632 = math.exp %631 : vector<8x128xf32>
    %633 = arith.subf %621, %630 : vector<8x128xf32>
    %634 = math.exp %633 : vector<8x128xf32>
    %635 = arith.subf %624, %630 : vector<8x128xf32>
    %636 = math.exp %635 : vector<8x128xf32>
    %637 = arith.subf %627, %630 : vector<8x128xf32>
    %638 = math.exp %637 : vector<8x128xf32>
    %639 = arith.addf %632, %634 : vector<8x128xf32>
    %640 = arith.addf %639, %636 : vector<8x128xf32>
    %641 = arith.addf %640, %638 : vector<8x128xf32>
    %642 = arith.addf %632, %634 : vector<8x128xf32>
    %cst_173 = arith.constant 9.99999991E-38 : f32
    %643 = vector.broadcast %cst_173 : f32 to vector<8x128xf32>
    %644 = arith.maximumf %642, %643 : vector<8x128xf32>
    %645 = math.log %641 : vector<8x128xf32>
    %646 = arith.addf %630, %645 : vector<8x128xf32>
    %647 = math.log %644 : vector<8x128xf32>
    %648 = arith.subf %647, %645 : vector<8x128xf32>
    %649 = arith.subf %624, %646 : vector<8x128xf32>
    %650 = arith.subf %627, %646 : vector<8x128xf32>
    %cst_174 = arith.constant 1.000000e+00 : f32
    %651 = vector.broadcast %cst_174 : f32 to vector<8x128xf32>
    %652 = arith.subf %651, %648 : vector<8x128xf32>
    %653 = arith.mulf %652, %652 : vector<8x128xf32>
    %654 = arith.addf %593, %653 : vector<8x128xf32>
    %cst_175 = arith.constant 1.000000e+00 : f32
    %655 = vector.broadcast %cst_175 : f32 to vector<8x128xf32>
    %656 = arith.subf %655, %649 : vector<8x128xf32>
    %657 = arith.mulf %656, %656 : vector<8x128xf32>
    %658 = arith.addf %596, %657 : vector<8x128xf32>
    %cst_176 = arith.constant 1.000000e+00 : f32
    %659 = vector.broadcast %cst_176 : f32 to vector<8x128xf32>
    %660 = arith.subf %659, %650 : vector<8x128xf32>
    %661 = arith.mulf %660, %660 : vector<8x128xf32>
    %662 = arith.addf %599, %661 : vector<8x128xf32>
    %cst_177 = arith.constant 0.000000e+00 : f32
    %663 = vector.broadcast %cst_177 : f32 to vector<8x128xf32>
    %c0_i32_178 = arith.constant 0 : i32
    %664 = vector.broadcast %c0_i32_178 : i32 to vector<8x128xi32>
    %665 = arith.cmpi eq, %553, %664 : vector<8x128xi32>
    %666 = arith.select %665, %648, %663 : vector<8x128xi1>, vector<8x128xf32>
    %c2_i32_179 = arith.constant 2 : i32
    %667 = vector.broadcast %c2_i32_179 : i32 to vector<8x128xi32>
    %668 = arith.cmpi eq, %553, %667 : vector<8x128xi32>
    %669 = arith.select %668, %649, %666 : vector<8x128xi1>, vector<8x128xf32>
    %c3_i32_180 = arith.constant 3 : i32
    %670 = vector.broadcast %c3_i32_180 : i32 to vector<8x128xi32>
    %671 = arith.cmpi eq, %553, %670 : vector<8x128xi32>
    %672 = arith.select %671, %650, %669 : vector<8x128xi1>, vector<8x128xf32>
    %c-100_i32_181 = arith.constant -100 : i32
    %673 = vector.broadcast %c-100_i32_181 : i32 to vector<8x128xi32>
    %674 = arith.cmpi eq, %553, %673 : vector<8x128xi32>
    %cst_182 = arith.constant 0.000000e+00 : f32
    %675 = vector.broadcast %cst_182 : f32 to vector<8x128xf32>
    %676 = arith.subf %675, %672 : vector<8x128xf32>
    %cst_183 = arith.constant 0.000000e+00 : f32
    %677 = vector.broadcast %cst_183 : f32 to vector<8x128xf32>
    %678 = arith.select %674, %677, %676 : vector<8x128xi1>, vector<8x128xf32>
    %c8_184 = arith.constant 8 : index
    %679 = arith.index_cast %551 : i32 to index
    %c0_185 = arith.constant 0 : index
    %680 = vector.load %arg2[%c8_184, %679, %c0_185] : memref<16x32x128xf32, #tpu.memory_space<vmem>>, vector<1x8x128xf32>
    %681 = vector.shape_cast %680 : vector<1x8x128xf32> to vector<8x128xf32>
    %c9_186 = arith.constant 9 : index
    %682 = arith.index_cast %551 : i32 to index
    %c0_187 = arith.constant 0 : index
    %683 = vector.load %arg2[%c9_186, %682, %c0_187] : memref<16x32x128xf32, #tpu.memory_space<vmem>>, vector<1x8x128xf32>
    %684 = vector.shape_cast %683 : vector<1x8x128xf32> to vector<8x128xf32>
    %c10_188 = arith.constant 10 : index
    %685 = arith.index_cast %551 : i32 to index
    %c0_189 = arith.constant 0 : index
    %686 = vector.load %arg2[%c10_188, %685, %c0_189] : memref<16x32x128xf32, #tpu.memory_space<vmem>>, vector<1x8x128xf32>
    %687 = vector.shape_cast %686 : vector<1x8x128xf32> to vector<8x128xf32>
    %c11_190 = arith.constant 11 : index
    %688 = arith.index_cast %551 : i32 to index
    %c0_191 = arith.constant 0 : index
    %689 = vector.load %arg2[%c11_190, %688, %c0_191] : memref<16x32x128xf32, #tpu.memory_space<vmem>>, vector<1x8x128xf32>
    %690 = vector.shape_cast %689 : vector<1x8x128xf32> to vector<8x128xf32>
    %691 = arith.maximumf %681, %684 : vector<8x128xf32>
    %692 = arith.maximumf %691, %687 : vector<8x128xf32>
    %693 = arith.maximumf %692, %690 : vector<8x128xf32>
    %694 = arith.subf %681, %693 : vector<8x128xf32>
    %695 = math.exp %694 : vector<8x128xf32>
    %696 = arith.subf %684, %693 : vector<8x128xf32>
    %697 = math.exp %696 : vector<8x128xf32>
    %698 = arith.subf %687, %693 : vector<8x128xf32>
    %699 = math.exp %698 : vector<8x128xf32>
    %700 = arith.subf %690, %693 : vector<8x128xf32>
    %701 = math.exp %700 : vector<8x128xf32>
    %702 = arith.addf %695, %697 : vector<8x128xf32>
    %703 = arith.addf %702, %699 : vector<8x128xf32>
    %704 = arith.addf %703, %701 : vector<8x128xf32>
    %705 = arith.addf %695, %697 : vector<8x128xf32>
    %cst_192 = arith.constant 9.99999991E-38 : f32
    %706 = vector.broadcast %cst_192 : f32 to vector<8x128xf32>
    %707 = arith.maximumf %705, %706 : vector<8x128xf32>
    %708 = math.log %704 : vector<8x128xf32>
    %709 = arith.addf %693, %708 : vector<8x128xf32>
    %710 = math.log %707 : vector<8x128xf32>
    %711 = arith.subf %710, %708 : vector<8x128xf32>
    %712 = arith.subf %687, %709 : vector<8x128xf32>
    %713 = arith.subf %690, %709 : vector<8x128xf32>
    %cst_193 = arith.constant 1.000000e+00 : f32
    %714 = vector.broadcast %cst_193 : f32 to vector<8x128xf32>
    %715 = arith.subf %714, %711 : vector<8x128xf32>
    %716 = arith.mulf %715, %715 : vector<8x128xf32>
    %717 = arith.addf %654, %716 : vector<8x128xf32>
    %cst_194 = arith.constant 1.000000e+00 : f32
    %718 = vector.broadcast %cst_194 : f32 to vector<8x128xf32>
    %719 = arith.subf %718, %712 : vector<8x128xf32>
    %720 = arith.mulf %719, %719 : vector<8x128xf32>
    %721 = arith.addf %658, %720 : vector<8x128xf32>
    %cst_195 = arith.constant 1.000000e+00 : f32
    %722 = vector.broadcast %cst_195 : f32 to vector<8x128xf32>
    %723 = arith.subf %722, %713 : vector<8x128xf32>
    %724 = arith.mulf %723, %723 : vector<8x128xf32>
    %725 = arith.addf %662, %724 : vector<8x128xf32>
    %cst_196 = arith.constant 0.000000e+00 : f32
    %726 = vector.broadcast %cst_196 : f32 to vector<8x128xf32>
    %c0_i32_197 = arith.constant 0 : i32
    %727 = vector.broadcast %c0_i32_197 : i32 to vector<8x128xi32>
    %728 = arith.cmpi eq, %554, %727 : vector<8x128xi32>
    %729 = arith.select %728, %711, %726 : vector<8x128xi1>, vector<8x128xf32>
    %c2_i32_198 = arith.constant 2 : i32
    %730 = vector.broadcast %c2_i32_198 : i32 to vector<8x128xi32>
    %731 = arith.cmpi eq, %554, %730 : vector<8x128xi32>
    %732 = arith.select %731, %712, %729 : vector<8x128xi1>, vector<8x128xf32>
    %c3_i32_199 = arith.constant 3 : i32
    %733 = vector.broadcast %c3_i32_199 : i32 to vector<8x128xi32>
    %734 = arith.cmpi eq, %554, %733 : vector<8x128xi32>
    %735 = arith.select %734, %713, %732 : vector<8x128xi1>, vector<8x128xf32>
    %c-100_i32_200 = arith.constant -100 : i32
    %736 = vector.broadcast %c-100_i32_200 : i32 to vector<8x128xi32>
    %737 = arith.cmpi eq, %554, %736 : vector<8x128xi32>
    %cst_201 = arith.constant 0.000000e+00 : f32
    %738 = vector.broadcast %cst_201 : f32 to vector<8x128xf32>
    %739 = arith.subf %738, %735 : vector<8x128xf32>
    %cst_202 = arith.constant 0.000000e+00 : f32
    %740 = vector.broadcast %cst_202 : f32 to vector<8x128xf32>
    %741 = arith.select %737, %740, %739 : vector<8x128xi1>, vector<8x128xf32>
    %c12_203 = arith.constant 12 : index
    %742 = arith.index_cast %551 : i32 to index
    %c0_204 = arith.constant 0 : index
    %743 = vector.load %arg2[%c12_203, %742, %c0_204] : memref<16x32x128xf32, #tpu.memory_space<vmem>>, vector<1x8x128xf32>
    %744 = vector.shape_cast %743 : vector<1x8x128xf32> to vector<8x128xf32>
    %c13_205 = arith.constant 13 : index
    %745 = arith.index_cast %551 : i32 to index
    %c0_206 = arith.constant 0 : index
    %746 = vector.load %arg2[%c13_205, %745, %c0_206] : memref<16x32x128xf32, #tpu.memory_space<vmem>>, vector<1x8x128xf32>
    %747 = vector.shape_cast %746 : vector<1x8x128xf32> to vector<8x128xf32>
    %c14_207 = arith.constant 14 : index
    %748 = arith.index_cast %551 : i32 to index
    %c0_208 = arith.constant 0 : index
    %749 = vector.load %arg2[%c14_207, %748, %c0_208] : memref<16x32x128xf32, #tpu.memory_space<vmem>>, vector<1x8x128xf32>
    %750 = vector.shape_cast %749 : vector<1x8x128xf32> to vector<8x128xf32>
    %c15_209 = arith.constant 15 : index
    %751 = arith.index_cast %551 : i32 to index
    %c0_210 = arith.constant 0 : index
    %752 = vector.load %arg2[%c15_209, %751, %c0_210] : memref<16x32x128xf32, #tpu.memory_space<vmem>>, vector<1x8x128xf32>
    %753 = vector.shape_cast %752 : vector<1x8x128xf32> to vector<8x128xf32>
    %754 = arith.maximumf %744, %747 : vector<8x128xf32>
    %755 = arith.maximumf %754, %750 : vector<8x128xf32>
    %756 = arith.maximumf %755, %753 : vector<8x128xf32>
    %757 = arith.subf %744, %756 : vector<8x128xf32>
    %758 = math.exp %757 : vector<8x128xf32>
    %759 = arith.subf %747, %756 : vector<8x128xf32>
    %760 = math.exp %759 : vector<8x128xf32>
    %761 = arith.subf %750, %756 : vector<8x128xf32>
    %762 = math.exp %761 : vector<8x128xf32>
    %763 = arith.subf %753, %756 : vector<8x128xf32>
    %764 = math.exp %763 : vector<8x128xf32>
    %765 = arith.addf %758, %760 : vector<8x128xf32>
    %766 = arith.addf %765, %762 : vector<8x128xf32>
    %767 = arith.addf %766, %764 : vector<8x128xf32>
    %768 = arith.addf %758, %760 : vector<8x128xf32>
    %cst_211 = arith.constant 9.99999991E-38 : f32
    %769 = vector.broadcast %cst_211 : f32 to vector<8x128xf32>
    %770 = arith.maximumf %768, %769 : vector<8x128xf32>
    %771 = math.log %767 : vector<8x128xf32>
    %772 = arith.addf %756, %771 : vector<8x128xf32>
    %773 = math.log %770 : vector<8x128xf32>
    %774 = arith.subf %773, %771 : vector<8x128xf32>
    %775 = arith.subf %750, %772 : vector<8x128xf32>
    %776 = arith.subf %753, %772 : vector<8x128xf32>
    %cst_212 = arith.constant 1.000000e+00 : f32
    %777 = vector.broadcast %cst_212 : f32 to vector<8x128xf32>
    %778 = arith.subf %777, %774 : vector<8x128xf32>
    %779 = arith.mulf %778, %778 : vector<8x128xf32>
    %780 = arith.addf %717, %779 : vector<8x128xf32>
    %cst_213 = arith.constant 1.000000e+00 : f32
    %781 = vector.broadcast %cst_213 : f32 to vector<8x128xf32>
    %782 = arith.subf %781, %775 : vector<8x128xf32>
    %783 = arith.mulf %782, %782 : vector<8x128xf32>
    %784 = arith.addf %721, %783 : vector<8x128xf32>
    %cst_214 = arith.constant 1.000000e+00 : f32
    %785 = vector.broadcast %cst_214 : f32 to vector<8x128xf32>
    %786 = arith.subf %785, %776 : vector<8x128xf32>
    %787 = arith.mulf %786, %786 : vector<8x128xf32>
    %788 = arith.addf %725, %787 : vector<8x128xf32>
    %cst_215 = arith.constant 0.000000e+00 : f32
    %789 = vector.broadcast %cst_215 : f32 to vector<8x128xf32>
    %c0_i32_216 = arith.constant 0 : i32
    %790 = vector.broadcast %c0_i32_216 : i32 to vector<8x128xi32>
    %791 = arith.cmpi eq, %555, %790 : vector<8x128xi32>
    %792 = arith.select %791, %774, %789 : vector<8x128xi1>, vector<8x128xf32>
    %c2_i32_217 = arith.constant 2 : i32
    %793 = vector.broadcast %c2_i32_217 : i32 to vector<8x128xi32>
    %794 = arith.cmpi eq, %555, %793 : vector<8x128xi32>
    %795 = arith.select %794, %775, %792 : vector<8x128xi1>, vector<8x128xf32>
    %c3_i32_218 = arith.constant 3 : i32
    %796 = vector.broadcast %c3_i32_218 : i32 to vector<8x128xi32>
    %797 = arith.cmpi eq, %555, %796 : vector<8x128xi32>
    %798 = arith.select %797, %776, %795 : vector<8x128xi1>, vector<8x128xf32>
    %c-100_i32_219 = arith.constant -100 : i32
    %799 = vector.broadcast %c-100_i32_219 : i32 to vector<8x128xi32>
    %800 = arith.cmpi eq, %555, %799 : vector<8x128xi32>
    %cst_220 = arith.constant 0.000000e+00 : f32
    %801 = vector.broadcast %cst_220 : f32 to vector<8x128xf32>
    %802 = arith.subf %801, %798 : vector<8x128xf32>
    %cst_221 = arith.constant 0.000000e+00 : f32
    %803 = vector.broadcast %cst_221 : f32 to vector<8x128xf32>
    %804 = arith.select %800, %803, %802 : vector<8x128xi1>, vector<8x128xf32>
    %805 = arith.mulf %615, %780 : vector<8x128xf32>
    %cst_222 = arith.constant 4.000000e+00 : f32
    %806 = vector.broadcast %cst_222 : f32 to vector<8x128xf32>
    %807 = arith.mulf %678, %806 : vector<8x128xf32>
    %808 = arith.addf %805, %807 : vector<8x128xf32>
    %809 = arith.mulf %741, %784 : vector<8x128xf32>
    %810 = arith.addf %808, %809 : vector<8x128xf32>
    %811 = arith.mulf %804, %788 : vector<8x128xf32>
    %812 = arith.addf %810, %811 : vector<8x128xf32>
    %813 = arith.addf %549, %812 : vector<8x128xf32>
    %c24_i32 = arith.constant 24 : i32
    %814 = arith.addi %5, %c24_i32 : i32
    %815 = tpu.assume_multiple %814, 8 : i32
    %816 = vector.extract_strided_slice %9 {offsets = [24, 0], sizes = [8, 128], strides = [1, 1]} : vector<32x128xi32> to vector<8x128xi32>
    %817 = vector.extract_strided_slice %13 {offsets = [24, 0], sizes = [8, 128], strides = [1, 1]} : vector<32x128xi32> to vector<8x128xi32>
    %818 = vector.extract_strided_slice %17 {offsets = [24, 0], sizes = [8, 128], strides = [1, 1]} : vector<32x128xi32> to vector<8x128xi32>
    %819 = vector.extract_strided_slice %21 {offsets = [24, 0], sizes = [8, 128], strides = [1, 1]} : vector<32x128xi32> to vector<8x128xi32>
    %c0_223 = arith.constant 0 : index
    %820 = arith.index_cast %815 : i32 to index
    %c0_224 = arith.constant 0 : index
    %821 = vector.load %arg2[%c0_223, %820, %c0_224] : memref<16x32x128xf32, #tpu.memory_space<vmem>>, vector<1x8x128xf32>
    %822 = vector.shape_cast %821 : vector<1x8x128xf32> to vector<8x128xf32>
    %c1_225 = arith.constant 1 : index
    %823 = arith.index_cast %815 : i32 to index
    %c0_226 = arith.constant 0 : index
    %824 = vector.load %arg2[%c1_225, %823, %c0_226] : memref<16x32x128xf32, #tpu.memory_space<vmem>>, vector<1x8x128xf32>
    %825 = vector.shape_cast %824 : vector<1x8x128xf32> to vector<8x128xf32>
    %c2_227 = arith.constant 2 : index
    %826 = arith.index_cast %815 : i32 to index
    %c0_228 = arith.constant 0 : index
    %827 = vector.load %arg2[%c2_227, %826, %c0_228] : memref<16x32x128xf32, #tpu.memory_space<vmem>>, vector<1x8x128xf32>
    %828 = vector.shape_cast %827 : vector<1x8x128xf32> to vector<8x128xf32>
    %c3_229 = arith.constant 3 : index
    %829 = arith.index_cast %815 : i32 to index
    %c0_230 = arith.constant 0 : index
    %830 = vector.load %arg2[%c3_229, %829, %c0_230] : memref<16x32x128xf32, #tpu.memory_space<vmem>>, vector<1x8x128xf32>
    %831 = vector.shape_cast %830 : vector<1x8x128xf32> to vector<8x128xf32>
    %832 = arith.maximumf %822, %825 : vector<8x128xf32>
    %833 = arith.maximumf %832, %828 : vector<8x128xf32>
    %834 = arith.maximumf %833, %831 : vector<8x128xf32>
    %835 = arith.subf %822, %834 : vector<8x128xf32>
    %836 = math.exp %835 : vector<8x128xf32>
    %837 = arith.subf %825, %834 : vector<8x128xf32>
    %838 = math.exp %837 : vector<8x128xf32>
    %839 = arith.subf %828, %834 : vector<8x128xf32>
    %840 = math.exp %839 : vector<8x128xf32>
    %841 = arith.subf %831, %834 : vector<8x128xf32>
    %842 = math.exp %841 : vector<8x128xf32>
    %843 = arith.addf %836, %838 : vector<8x128xf32>
    %844 = arith.addf %843, %840 : vector<8x128xf32>
    %845 = arith.addf %844, %842 : vector<8x128xf32>
    %846 = arith.addf %836, %838 : vector<8x128xf32>
    %cst_231 = arith.constant 9.99999991E-38 : f32
    %847 = vector.broadcast %cst_231 : f32 to vector<8x128xf32>
    %848 = arith.maximumf %846, %847 : vector<8x128xf32>
    %849 = math.log %845 : vector<8x128xf32>
    %850 = arith.addf %834, %849 : vector<8x128xf32>
    %851 = math.log %848 : vector<8x128xf32>
    %852 = arith.subf %851, %849 : vector<8x128xf32>
    %853 = arith.subf %828, %850 : vector<8x128xf32>
    %854 = arith.subf %831, %850 : vector<8x128xf32>
    %cst_232 = arith.constant 1.000000e+00 : f32
    %855 = vector.broadcast %cst_232 : f32 to vector<8x128xf32>
    %856 = arith.subf %855, %852 : vector<8x128xf32>
    %857 = arith.mulf %856, %856 : vector<8x128xf32>
    %cst_233 = arith.constant 1.000000e+00 : f32
    %858 = vector.broadcast %cst_233 : f32 to vector<8x128xf32>
    %859 = arith.subf %858, %853 : vector<8x128xf32>
    %860 = arith.mulf %859, %859 : vector<8x128xf32>
    %cst_234 = arith.constant 1.000000e+00 : f32
    %861 = vector.broadcast %cst_234 : f32 to vector<8x128xf32>
    %862 = arith.subf %861, %854 : vector<8x128xf32>
    %863 = arith.mulf %862, %862 : vector<8x128xf32>
    %cst_235 = arith.constant 0.000000e+00 : f32
    %864 = vector.broadcast %cst_235 : f32 to vector<8x128xf32>
    %c0_i32_236 = arith.constant 0 : i32
    %865 = vector.broadcast %c0_i32_236 : i32 to vector<8x128xi32>
    %866 = arith.cmpi eq, %816, %865 : vector<8x128xi32>
    %867 = arith.select %866, %852, %864 : vector<8x128xi1>, vector<8x128xf32>
    %c2_i32_237 = arith.constant 2 : i32
    %868 = vector.broadcast %c2_i32_237 : i32 to vector<8x128xi32>
    %869 = arith.cmpi eq, %816, %868 : vector<8x128xi32>
    %870 = arith.select %869, %853, %867 : vector<8x128xi1>, vector<8x128xf32>
    %c3_i32_238 = arith.constant 3 : i32
    %871 = vector.broadcast %c3_i32_238 : i32 to vector<8x128xi32>
    %872 = arith.cmpi eq, %816, %871 : vector<8x128xi32>
    %873 = arith.select %872, %854, %870 : vector<8x128xi1>, vector<8x128xf32>
    %c-100_i32_239 = arith.constant -100 : i32
    %874 = vector.broadcast %c-100_i32_239 : i32 to vector<8x128xi32>
    %875 = arith.cmpi eq, %816, %874 : vector<8x128xi32>
    %cst_240 = arith.constant 0.000000e+00 : f32
    %876 = vector.broadcast %cst_240 : f32 to vector<8x128xf32>
    %877 = arith.subf %876, %873 : vector<8x128xf32>
    %cst_241 = arith.constant 0.000000e+00 : f32
    %878 = vector.broadcast %cst_241 : f32 to vector<8x128xf32>
    %879 = arith.select %875, %878, %877 : vector<8x128xi1>, vector<8x128xf32>
    %c4_242 = arith.constant 4 : index
    %880 = arith.index_cast %815 : i32 to index
    %c0_243 = arith.constant 0 : index
    %881 = vector.load %arg2[%c4_242, %880, %c0_243] : memref<16x32x128xf32, #tpu.memory_space<vmem>>, vector<1x8x128xf32>
    %882 = vector.shape_cast %881 : vector<1x8x128xf32> to vector<8x128xf32>
    %c5_244 = arith.constant 5 : index
    %883 = arith.index_cast %815 : i32 to index
    %c0_245 = arith.constant 0 : index
    %884 = vector.load %arg2[%c5_244, %883, %c0_245] : memref<16x32x128xf32, #tpu.memory_space<vmem>>, vector<1x8x128xf32>
    %885 = vector.shape_cast %884 : vector<1x8x128xf32> to vector<8x128xf32>
    %c6_246 = arith.constant 6 : index
    %886 = arith.index_cast %815 : i32 to index
    %c0_247 = arith.constant 0 : index
    %887 = vector.load %arg2[%c6_246, %886, %c0_247] : memref<16x32x128xf32, #tpu.memory_space<vmem>>, vector<1x8x128xf32>
    %888 = vector.shape_cast %887 : vector<1x8x128xf32> to vector<8x128xf32>
    %c7_248 = arith.constant 7 : index
    %889 = arith.index_cast %815 : i32 to index
    %c0_249 = arith.constant 0 : index
    %890 = vector.load %arg2[%c7_248, %889, %c0_249] : memref<16x32x128xf32, #tpu.memory_space<vmem>>, vector<1x8x128xf32>
    %891 = vector.shape_cast %890 : vector<1x8x128xf32> to vector<8x128xf32>
    %892 = arith.maximumf %882, %885 : vector<8x128xf32>
    %893 = arith.maximumf %892, %888 : vector<8x128xf32>
    %894 = arith.maximumf %893, %891 : vector<8x128xf32>
    %895 = arith.subf %882, %894 : vector<8x128xf32>
    %896 = math.exp %895 : vector<8x128xf32>
    %897 = arith.subf %885, %894 : vector<8x128xf32>
    %898 = math.exp %897 : vector<8x128xf32>
    %899 = arith.subf %888, %894 : vector<8x128xf32>
    %900 = math.exp %899 : vector<8x128xf32>
    %901 = arith.subf %891, %894 : vector<8x128xf32>
    %902 = math.exp %901 : vector<8x128xf32>
    %903 = arith.addf %896, %898 : vector<8x128xf32>
    %904 = arith.addf %903, %900 : vector<8x128xf32>
    %905 = arith.addf %904, %902 : vector<8x128xf32>
    %906 = arith.addf %896, %898 : vector<8x128xf32>
    %cst_250 = arith.constant 9.99999991E-38 : f32
    %907 = vector.broadcast %cst_250 : f32 to vector<8x128xf32>
    %908 = arith.maximumf %906, %907 : vector<8x128xf32>
    %909 = math.log %905 : vector<8x128xf32>
    %910 = arith.addf %894, %909 : vector<8x128xf32>
    %911 = math.log %908 : vector<8x128xf32>
    %912 = arith.subf %911, %909 : vector<8x128xf32>
    %913 = arith.subf %888, %910 : vector<8x128xf32>
    %914 = arith.subf %891, %910 : vector<8x128xf32>
    %cst_251 = arith.constant 1.000000e+00 : f32
    %915 = vector.broadcast %cst_251 : f32 to vector<8x128xf32>
    %916 = arith.subf %915, %912 : vector<8x128xf32>
    %917 = arith.mulf %916, %916 : vector<8x128xf32>
    %918 = arith.addf %857, %917 : vector<8x128xf32>
    %cst_252 = arith.constant 1.000000e+00 : f32
    %919 = vector.broadcast %cst_252 : f32 to vector<8x128xf32>
    %920 = arith.subf %919, %913 : vector<8x128xf32>
    %921 = arith.mulf %920, %920 : vector<8x128xf32>
    %922 = arith.addf %860, %921 : vector<8x128xf32>
    %cst_253 = arith.constant 1.000000e+00 : f32
    %923 = vector.broadcast %cst_253 : f32 to vector<8x128xf32>
    %924 = arith.subf %923, %914 : vector<8x128xf32>
    %925 = arith.mulf %924, %924 : vector<8x128xf32>
    %926 = arith.addf %863, %925 : vector<8x128xf32>
    %cst_254 = arith.constant 0.000000e+00 : f32
    %927 = vector.broadcast %cst_254 : f32 to vector<8x128xf32>
    %c0_i32_255 = arith.constant 0 : i32
    %928 = vector.broadcast %c0_i32_255 : i32 to vector<8x128xi32>
    %929 = arith.cmpi eq, %817, %928 : vector<8x128xi32>
    %930 = arith.select %929, %912, %927 : vector<8x128xi1>, vector<8x128xf32>
    %c2_i32_256 = arith.constant 2 : i32
    %931 = vector.broadcast %c2_i32_256 : i32 to vector<8x128xi32>
    %932 = arith.cmpi eq, %817, %931 : vector<8x128xi32>
    %933 = arith.select %932, %913, %930 : vector<8x128xi1>, vector<8x128xf32>
    %c3_i32_257 = arith.constant 3 : i32
    %934 = vector.broadcast %c3_i32_257 : i32 to vector<8x128xi32>
    %935 = arith.cmpi eq, %817, %934 : vector<8x128xi32>
    %936 = arith.select %935, %914, %933 : vector<8x128xi1>, vector<8x128xf32>
    %c-100_i32_258 = arith.constant -100 : i32
    %937 = vector.broadcast %c-100_i32_258 : i32 to vector<8x128xi32>
    %938 = arith.cmpi eq, %817, %937 : vector<8x128xi32>
    %cst_259 = arith.constant 0.000000e+00 : f32
    %939 = vector.broadcast %cst_259 : f32 to vector<8x128xf32>
    %940 = arith.subf %939, %936 : vector<8x128xf32>
    %cst_260 = arith.constant 0.000000e+00 : f32
    %941 = vector.broadcast %cst_260 : f32 to vector<8x128xf32>
    %942 = arith.select %938, %941, %940 : vector<8x128xi1>, vector<8x128xf32>
    %c8_261 = arith.constant 8 : index
    %943 = arith.index_cast %815 : i32 to index
    %c0_262 = arith.constant 0 : index
    %944 = vector.load %arg2[%c8_261, %943, %c0_262] : memref<16x32x128xf32, #tpu.memory_space<vmem>>, vector<1x8x128xf32>
    %945 = vector.shape_cast %944 : vector<1x8x128xf32> to vector<8x128xf32>
    %c9_263 = arith.constant 9 : index
    %946 = arith.index_cast %815 : i32 to index
    %c0_264 = arith.constant 0 : index
    %947 = vector.load %arg2[%c9_263, %946, %c0_264] : memref<16x32x128xf32, #tpu.memory_space<vmem>>, vector<1x8x128xf32>
    %948 = vector.shape_cast %947 : vector<1x8x128xf32> to vector<8x128xf32>
    %c10_265 = arith.constant 10 : index
    %949 = arith.index_cast %815 : i32 to index
    %c0_266 = arith.constant 0 : index
    %950 = vector.load %arg2[%c10_265, %949, %c0_266] : memref<16x32x128xf32, #tpu.memory_space<vmem>>, vector<1x8x128xf32>
    %951 = vector.shape_cast %950 : vector<1x8x128xf32> to vector<8x128xf32>
    %c11_267 = arith.constant 11 : index
    %952 = arith.index_cast %815 : i32 to index
    %c0_268 = arith.constant 0 : index
    %953 = vector.load %arg2[%c11_267, %952, %c0_268] : memref<16x32x128xf32, #tpu.memory_space<vmem>>, vector<1x8x128xf32>
    %954 = vector.shape_cast %953 : vector<1x8x128xf32> to vector<8x128xf32>
    %955 = arith.maximumf %945, %948 : vector<8x128xf32>
    %956 = arith.maximumf %955, %951 : vector<8x128xf32>
    %957 = arith.maximumf %956, %954 : vector<8x128xf32>
    %958 = arith.subf %945, %957 : vector<8x128xf32>
    %959 = math.exp %958 : vector<8x128xf32>
    %960 = arith.subf %948, %957 : vector<8x128xf32>
    %961 = math.exp %960 : vector<8x128xf32>
    %962 = arith.subf %951, %957 : vector<8x128xf32>
    %963 = math.exp %962 : vector<8x128xf32>
    %964 = arith.subf %954, %957 : vector<8x128xf32>
    %965 = math.exp %964 : vector<8x128xf32>
    %966 = arith.addf %959, %961 : vector<8x128xf32>
    %967 = arith.addf %966, %963 : vector<8x128xf32>
    %968 = arith.addf %967, %965 : vector<8x128xf32>
    %969 = arith.addf %959, %961 : vector<8x128xf32>
    %cst_269 = arith.constant 9.99999991E-38 : f32
    %970 = vector.broadcast %cst_269 : f32 to vector<8x128xf32>
    %971 = arith.maximumf %969, %970 : vector<8x128xf32>
    %972 = math.log %968 : vector<8x128xf32>
    %973 = arith.addf %957, %972 : vector<8x128xf32>
    %974 = math.log %971 : vector<8x128xf32>
    %975 = arith.subf %974, %972 : vector<8x128xf32>
    %976 = arith.subf %951, %973 : vector<8x128xf32>
    %977 = arith.subf %954, %973 : vector<8x128xf32>
    %cst_270 = arith.constant 1.000000e+00 : f32
    %978 = vector.broadcast %cst_270 : f32 to vector<8x128xf32>
    %979 = arith.subf %978, %975 : vector<8x128xf32>
    %980 = arith.mulf %979, %979 : vector<8x128xf32>
    %981 = arith.addf %918, %980 : vector<8x128xf32>
    %cst_271 = arith.constant 1.000000e+00 : f32
    %982 = vector.broadcast %cst_271 : f32 to vector<8x128xf32>
    %983 = arith.subf %982, %976 : vector<8x128xf32>
    %984 = arith.mulf %983, %983 : vector<8x128xf32>
    %985 = arith.addf %922, %984 : vector<8x128xf32>
    %cst_272 = arith.constant 1.000000e+00 : f32
    %986 = vector.broadcast %cst_272 : f32 to vector<8x128xf32>
    %987 = arith.subf %986, %977 : vector<8x128xf32>
    %988 = arith.mulf %987, %987 : vector<8x128xf32>
    %989 = arith.addf %926, %988 : vector<8x128xf32>
    %cst_273 = arith.constant 0.000000e+00 : f32
    %990 = vector.broadcast %cst_273 : f32 to vector<8x128xf32>
    %c0_i32_274 = arith.constant 0 : i32
    %991 = vector.broadcast %c0_i32_274 : i32 to vector<8x128xi32>
    %992 = arith.cmpi eq, %818, %991 : vector<8x128xi32>
    %993 = arith.select %992, %975, %990 : vector<8x128xi1>, vector<8x128xf32>
    %c2_i32_275 = arith.constant 2 : i32
    %994 = vector.broadcast %c2_i32_275 : i32 to vector<8x128xi32>
    %995 = arith.cmpi eq, %818, %994 : vector<8x128xi32>
    %996 = arith.select %995, %976, %993 : vector<8x128xi1>, vector<8x128xf32>
    %c3_i32_276 = arith.constant 3 : i32
    %997 = vector.broadcast %c3_i32_276 : i32 to vector<8x128xi32>
    %998 = arith.cmpi eq, %818, %997 : vector<8x128xi32>
    %999 = arith.select %998, %977, %996 : vector<8x128xi1>, vector<8x128xf32>
    %c-100_i32_277 = arith.constant -100 : i32
    %1000 = vector.broadcast %c-100_i32_277 : i32 to vector<8x128xi32>
    %1001 = arith.cmpi eq, %818, %1000 : vector<8x128xi32>
    %cst_278 = arith.constant 0.000000e+00 : f32
    %1002 = vector.broadcast %cst_278 : f32 to vector<8x128xf32>
    %1003 = arith.subf %1002, %999 : vector<8x128xf32>
    %cst_279 = arith.constant 0.000000e+00 : f32
    %1004 = vector.broadcast %cst_279 : f32 to vector<8x128xf32>
    %1005 = arith.select %1001, %1004, %1003 : vector<8x128xi1>, vector<8x128xf32>
    %c12_280 = arith.constant 12 : index
    %1006 = arith.index_cast %815 : i32 to index
    %c0_281 = arith.constant 0 : index
    %1007 = vector.load %arg2[%c12_280, %1006, %c0_281] : memref<16x32x128xf32, #tpu.memory_space<vmem>>, vector<1x8x128xf32>
    %1008 = vector.shape_cast %1007 : vector<1x8x128xf32> to vector<8x128xf32>
    %c13_282 = arith.constant 13 : index
    %1009 = arith.index_cast %815 : i32 to index
    %c0_283 = arith.constant 0 : index
    %1010 = vector.load %arg2[%c13_282, %1009, %c0_283] : memref<16x32x128xf32, #tpu.memory_space<vmem>>, vector<1x8x128xf32>
    %1011 = vector.shape_cast %1010 : vector<1x8x128xf32> to vector<8x128xf32>
    %c14_284 = arith.constant 14 : index
    %1012 = arith.index_cast %815 : i32 to index
    %c0_285 = arith.constant 0 : index
    %1013 = vector.load %arg2[%c14_284, %1012, %c0_285] : memref<16x32x128xf32, #tpu.memory_space<vmem>>, vector<1x8x128xf32>
    %1014 = vector.shape_cast %1013 : vector<1x8x128xf32> to vector<8x128xf32>
    %c15_286 = arith.constant 15 : index
    %1015 = arith.index_cast %815 : i32 to index
    %c0_287 = arith.constant 0 : index
    %1016 = vector.load %arg2[%c15_286, %1015, %c0_287] : memref<16x32x128xf32, #tpu.memory_space<vmem>>, vector<1x8x128xf32>
    %1017 = vector.shape_cast %1016 : vector<1x8x128xf32> to vector<8x128xf32>
    %1018 = arith.maximumf %1008, %1011 : vector<8x128xf32>
    %1019 = arith.maximumf %1018, %1014 : vector<8x128xf32>
    %1020 = arith.maximumf %1019, %1017 : vector<8x128xf32>
    %1021 = arith.subf %1008, %1020 : vector<8x128xf32>
    %1022 = math.exp %1021 : vector<8x128xf32>
    %1023 = arith.subf %1011, %1020 : vector<8x128xf32>
    %1024 = math.exp %1023 : vector<8x128xf32>
    %1025 = arith.subf %1014, %1020 : vector<8x128xf32>
    %1026 = math.exp %1025 : vector<8x128xf32>
    %1027 = arith.subf %1017, %1020 : vector<8x128xf32>
    %1028 = math.exp %1027 : vector<8x128xf32>
    %1029 = arith.addf %1022, %1024 : vector<8x128xf32>
    %1030 = arith.addf %1029, %1026 : vector<8x128xf32>
    %1031 = arith.addf %1030, %1028 : vector<8x128xf32>
    %1032 = arith.addf %1022, %1024 : vector<8x128xf32>
    %cst_288 = arith.constant 9.99999991E-38 : f32
    %1033 = vector.broadcast %cst_288 : f32 to vector<8x128xf32>
    %1034 = arith.maximumf %1032, %1033 : vector<8x128xf32>
    %1035 = math.log %1031 : vector<8x128xf32>
    %1036 = arith.addf %1020, %1035 : vector<8x128xf32>
    %1037 = math.log %1034 : vector<8x128xf32>
    %1038 = arith.subf %1037, %1035 : vector<8x128xf32>
    %1039 = arith.subf %1014, %1036 : vector<8x128xf32>
    %1040 = arith.subf %1017, %1036 : vector<8x128xf32>
    %cst_289 = arith.constant 1.000000e+00 : f32
    %1041 = vector.broadcast %cst_289 : f32 to vector<8x128xf32>
    %1042 = arith.subf %1041, %1038 : vector<8x128xf32>
    %1043 = arith.mulf %1042, %1042 : vector<8x128xf32>
    %1044 = arith.addf %981, %1043 : vector<8x128xf32>
    %cst_290 = arith.constant 1.000000e+00 : f32
    %1045 = vector.broadcast %cst_290 : f32 to vector<8x128xf32>
    %1046 = arith.subf %1045, %1039 : vector<8x128xf32>
    %1047 = arith.mulf %1046, %1046 : vector<8x128xf32>
    %1048 = arith.addf %985, %1047 : vector<8x128xf32>
    %cst_291 = arith.constant 1.000000e+00 : f32
    %1049 = vector.broadcast %cst_291 : f32 to vector<8x128xf32>
    %1050 = arith.subf %1049, %1040 : vector<8x128xf32>
    %1051 = arith.mulf %1050, %1050 : vector<8x128xf32>
    %1052 = arith.addf %989, %1051 : vector<8x128xf32>
    %cst_292 = arith.constant 0.000000e+00 : f32
    %1053 = vector.broadcast %cst_292 : f32 to vector<8x128xf32>
    %c0_i32_293 = arith.constant 0 : i32
    %1054 = vector.broadcast %c0_i32_293 : i32 to vector<8x128xi32>
    %1055 = arith.cmpi eq, %819, %1054 : vector<8x128xi32>
    %1056 = arith.select %1055, %1038, %1053 : vector<8x128xi1>, vector<8x128xf32>
    %c2_i32_294 = arith.constant 2 : i32
    %1057 = vector.broadcast %c2_i32_294 : i32 to vector<8x128xi32>
    %1058 = arith.cmpi eq, %819, %1057 : vector<8x128xi32>
    %1059 = arith.select %1058, %1039, %1056 : vector<8x128xi1>, vector<8x128xf32>
    %c3_i32_295 = arith.constant 3 : i32
    %1060 = vector.broadcast %c3_i32_295 : i32 to vector<8x128xi32>
    %1061 = arith.cmpi eq, %819, %1060 : vector<8x128xi32>
    %1062 = arith.select %1061, %1040, %1059 : vector<8x128xi1>, vector<8x128xf32>
    %c-100_i32_296 = arith.constant -100 : i32
    %1063 = vector.broadcast %c-100_i32_296 : i32 to vector<8x128xi32>
    %1064 = arith.cmpi eq, %819, %1063 : vector<8x128xi32>
    %cst_297 = arith.constant 0.000000e+00 : f32
    %1065 = vector.broadcast %cst_297 : f32 to vector<8x128xf32>
    %1066 = arith.subf %1065, %1062 : vector<8x128xf32>
    %cst_298 = arith.constant 0.000000e+00 : f32
    %1067 = vector.broadcast %cst_298 : f32 to vector<8x128xf32>
    %1068 = arith.select %1064, %1067, %1066 : vector<8x128xi1>, vector<8x128xf32>
    %1069 = arith.mulf %879, %1044 : vector<8x128xf32>
    %cst_299 = arith.constant 4.000000e+00 : f32
    %1070 = vector.broadcast %cst_299 : f32 to vector<8x128xf32>
    %1071 = arith.mulf %942, %1070 : vector<8x128xf32>
    %1072 = arith.addf %1069, %1071 : vector<8x128xf32>
    %1073 = arith.mulf %1005, %1048 : vector<8x128xf32>
    %1074 = arith.addf %1072, %1073 : vector<8x128xf32>
    %1075 = arith.mulf %1068, %1052 : vector<8x128xf32>
    %1076 = arith.addf %1074, %1075 : vector<8x128xf32>
    %1077 = arith.addf %813, %1076 : vector<8x128xf32>
    %c1_i32 = arith.constant 1 : i32
    %c0_300 = arith.constant 0 : index
    %c0_301 = arith.constant 0 : index
    %1078 = vector.load %arg5[%c0_300, %c0_301] : memref<8x128xf32, #tpu.memory_space<vmem>>, vector<8x128xf32>
    %1079 = arith.addf %1078, %1077 : vector<8x128xf32>
    %c0_302 = arith.constant 0 : index
    %c0_303 = arith.constant 0 : index
    %1080 = vector.load %arg5[%c0_302, %c0_303] : memref<8x128xf32, #tpu.memory_space<vmem>>, vector<8x128xf32>
    tpu.vector_store %arg5[%c0_302, %c0_303], %1079 {strides = array<i32>} : memref<8x128xf32, #tpu.memory_space<vmem>>, vector<8x128xf32>,
    %c0_i32_304 = arith.constant 0 : i32
    %1081 = arith.cmpi eq, %arg1, %c0_i32_304 : i32
    %1082 = arith.extui %1081 : i1 to i32
    %c0_i32_305 = arith.constant 0 : i32
    %1083 = arith.cmpi ne, %1082, %c0_i32_305 : i32
    scf.if %1083 {
      %c0_306 = arith.constant 0 : index
      %c0_307 = arith.constant 0 : index
      %1084 = vector.load %arg5[%c0_306, %c0_307] : memref<8x128xf32, #tpu.memory_space<vmem>>, vector<8x128xf32>
      %cst_308 = arith.constant dense<0.000000e+00> : vector<128xf32>
      %1085 = vector.multi_reduction <add>, %1084, %cst_308 [0] : vector<8x128xf32> to vector<128xf32>
      %1086 = vector.shape_cast %1085 : vector<128xf32> to vector<1x128xf32>
      %1087 = vector.shape_cast %1086 : vector<1x128xf32> to vector<1x1x128xf32>
      %c0_309 = arith.constant 0 : index
      %c0_310 = arith.constant 0 : index
      %c0_311 = arith.constant 0 : index
      %1088 = vector.load %arg4[%c0_309, %c0_310, %c0_311] : memref<1x1x128xf32, #tpu.memory_space<vmem>>, vector<1x1x128xf32>
      tpu.vector_store %arg4[%c0_309, %c0_310, %c0_311], %1087 {strides = array<i32>} : memref<1x1x128xf32, #tpu.memory_space<vmem>>, vector<1x1x128xf32>,
    } else {
    }
    return
  }
  func.func @transform_0(%arg0: i32, %arg1: i32) -> (i32, i32, i32) {
    %c1_i32 = arith.constant 1 : i32
    %0 = arith.muli %arg0, %c1_i32 : i32
    %1 = arith.addi %0, %arg1 : i32
    %c0_i32 = arith.constant 0 : i32
    %c0_i32_0 = arith.constant 0 : i32
    %c0_i32_1 = arith.constant 0 : i32
    return %c0_i32, %1, %c0_i32_0 : i32, i32, i32
  }
  func.func @transform_1(%arg0: i32, %arg1: i32) -> (i32, i32, i32) {
    %c1_i32 = arith.constant 1 : i32
    %0 = arith.muli %arg0, %c1_i32 : i32
    %1 = arith.addi %0, %arg1 : i32
    %c0_i32 = arith.constant 0 : i32
    %c0_i32_0 = arith.constant 0 : i32
    %c0_i32_1 = arith.constant 0 : i32
    return %c0_i32, %1, %c0_i32_0 : i32, i32, i32
  }
  func.func @transform_2(%arg0: i32, %arg1: i32) -> (i32, i32, i32) {
    %c0_i32 = arith.constant 0 : i32
    %c0_i32_0 = arith.constant 0 : i32
    %c0_i32_1 = arith.constant 0 : i32
    return %arg0, %c0_i32, %c0_i32_0 : i32, i32, i32
  }
}

</mosaic_0001>

<bundles_post_ra>
// kernel: tpu_custom_call.1
= control target key start
LH: loop header
LB: loop body
LE: loop exit
PB: predicated region body
PF: predicated region fallthrough
CT: control target
= control target key end

     0   :  { %7 = vsyncpa [#allocation4], 0  ;;  %s2117_s0 = inlined_call_operand.hbm [shape: f32[16,32,128], index: 0, kind: input, shape index: {}]   ;;  %s2118_s1 = inlined_call_operand.hbm [shape: s8[4,32,128], index: 1, kind: input, shape index: {}]   ;;  %s2119_s2 = inlined_call_operand.hbm [shape: f32[1,1,128], index: 2, kind: output, shape index: {}]  }
   0x1   :  { %8 = vsyncpa [#allocation7], 0 }
   0x2   :  { %9 = vsyncpa [#allocation5], 0  ;;  %s1379_s9 = smov [#allocation3]   ;;  %s1307_s13 = scalar_lea.hbm %s2117_s0, 8192 }
   0x3   :  { %s19_s10 = sshll.u32 %s1379_s9, 4  ;;  %p1308_p0 = scmp.ne.s32.totalorder %s2117_s0, %s1307_s13  ;;  %s20_s10 = int_to_ptr.vmem [resolvable:$true] %s19_s10 }
   0x4   :  { %p1311_p1 = scmp.lt.u32.totalorder %s1307_s13, %s2117_s0 }
   0x6   :  { %p1313_p2 = pnand %p1311_p1, %p1308_p0 }
   0x8   :  { %1316 = shalt.err (!%p1313_p2)
}
   0x9   :  { %s1317_s18 = scalar_lea.vmem %s20_s10, 8192  ;;  %p1322_p4 = scmp.lt.s32.totalorder %s20_s10, %s20_s10 }
   0xa   :  { %p1318_p3 = scmp.ne.s32.totalorder %s20_s10, %s1317_s18  ;;  %p1323_p5 = scmp.lt.s32.totalorder %s1317_s18, %s1317_s18 }
   0xc   :  { %p1324_p6 = por %p1323_p5, %p1322_p4 }
   0xe   :  { %p1325_p7 = pnand %p1324_p6, %p1318_p3 }
  0x10   :  { %1328 = shalt.err (!%p1325_p7)
}
  0x11   :  { %s1380_s19 = smov 128   ;;  %s1381_s20 = smov 8  }
  0x12   :  { %25 = dma.hbm_to_vmem [thread:$0]  %s2117_s0, 8192, %s20_s10, [#allocation4], %s1380_s19, %s1380_s19, %s1381_s20  }
  0x13   :  { %s1382_s23 = smov [#allocation6]   ;;  %s1329_s27 = scalar_lea.hbm %s2118_s1, 512 }
  0x14   :  { %s34_s24 = sshll.u32 %s1382_s23, 4  ;;  %p1330_p8 = scmp.ne.s32.totalorder %s2118_s1, %s1329_s27  ;;  %s35_s24 = int_to_ptr.vmem [resolvable:$true] %s34_s24 }
  0x15   :  { %p1333_p9 = scmp.lt.u32.totalorder %s1329_s27, %s2118_s1 }
  0x17   :  { %p1335_p10 = pnand %p1333_p9, %p1330_p8 }
  0x19   :  { %1338 = shalt.err (!%p1335_p10)
}
  0x1a   :  { %s1339_s4 = scalar_lea.vmem %s35_s24, 512  ;;  %p1344_p12 = scmp.lt.s32.totalorder %s35_s24, %s35_s24 }
  0x1b   :  { %p1340_p11 = scmp.ne.s32.totalorder %s35_s24, %s1339_s4  ;;  %p1345_p13 = scmp.lt.s32.totalorder %s1339_s4, %s1339_s4 }
  0x1d   :  { %p1346_p0 = por %p1345_p13, %p1344_p12 }
  0x1f   :  { %p1347_p1 = pnand %p1346_p0, %p1340_p11 }
  0x21   :  { %1350 = shalt.err (!%p1347_p1)
}
  0x22   :  { %40 = dma.hbm_to_vmem [thread:$0]  %s2118_s1, 512, %s35_s24, [#allocation7], %s1380_s19, %s1380_s19, %s1381_s20  }
  0x23   :  { %1373 = dma.done.wait [#allocation4], 8192  }
  0x24   :  { %1374 = vsyncadd [#allocation4], 4294959104 }
  0x25   :  { %1375 = dma.done.wait [#allocation7], 512  }
  0x26   :  { %1376 = vsyncadd [#allocation7], 4294966784  ;;  %v84_v0 = vld [vmem:[#allocation3] sm:$0xff]  ;;  %v317_v43 = vld [vmem:[#allocation3 + $0x8] sm:$0xff]  ;;  %s1383_s1 = smov [#allocation8]  }
  0x27   :  { %v87_v1 = vld [vmem:[#allocation3 + $0x20] sm:$0xff]  ;;  %v1464_v44 = vld [vmem:[#allocation3 + $0x28] sm:$0xff]  ;;  %s1034_s6 = sshll.u32 %s1383_s1, 4  ;;  %s1035_s6 = int_to_ptr.vmem [resolvable:$true] %s1034_s6 }
  0x28   :  { %v138_v2 = vld [vmem:[#allocation3 + $0x80] sm:$0xff]  ;;  %v94_v5 = vmax.f32 %v84_v0, %v87_v1  ;;  %v327_v51 = vmax.f32 %v317_v43, %v1464_v44  ;;  %v1476_v54 = vld [vmem:[#allocation3 + $0x48] sm:$0xff]  ;;  %s1351_s7 = scalar_lea.vmem %s1035_s6, 16  ;;  %s1355_s8 = scalar_lea.vmem %s1035_s6, 32 }
  0x29   :  { %v141_v3 = vld [vmem:[#allocation3 + $0xa0] sm:$0xff]  ;;  %v1478_v55 = vld [vmem:[#allocation3 + $0x88] sm:$0xff]  ;;  %p1352_p2 = scmp.ne.s32.totalorder %s1035_s6, %s1351_s7  ;;  %p1356_p3 = scmp.lt.s32.totalorder %s1035_s6, %s1035_s6 }
  0x2a   :  { %v1423_v4 = vld [vmem:[#allocation3 + $0x40] sm:$0xff]  ;;  %v148_v7 = vmax.f32 %v138_v2, %v141_v3  ;;  %v1480_v56 = vld [vmem:[#allocation3 + $0xa8] sm:$0xff]  ;;  %v328_v62 = vmax.f32 %v327_v51, %v1476_v54  ;;  %p1357_p4 = scmp.lt.s32.totalorder %s1355_s8, %s1351_s7 }
  0x2b   :  { %v1425_v6 = vld [vmem:[#allocation3 + $0x60] sm:$0xff]  ;;  %v95_v8 = vmax.f32 %v94_v5, %v1423_v4  ;;  %v381_v63 = vmax.f32 %v1478_v55, %v1480_v56  ;;  %v1517_v51 = vld [vmem:[#allocation3 + $0x128] sm:$0xff] }
  0x2c   :  { %v1428_v9 = vld [vmem:[#allocation3 + $0xc0] sm:$0xff]  ;;  %p1358_p5 = por %p1357_p4, %p1356_p3 }
  0x2d   :  { %v195_v10 = vld [vmem:[#allocation3 + $0x100] sm:$0xff]  ;;  %v1431_v12 = vmax.f32 %v95_v8, %v1425_v6  ;;  %v149_v13 = vmax.f32 %v148_v7, %v1428_v9 }
  0x2e   :  { %v198_v11 = vld [vmem:[#allocation3 + $0x120] sm:$0xff]  ;;  %p1359_p6 = pnand %p1358_p5, %p1352_p2 }
  0x2f   :  { %v97_v14 = vsub.f32 %v84_v0, %v1431_v12  ;;  %v1435_v15 = vld [vmem:[#allocation3 + $0xe0] sm:$0xff]  ;;  %v205_v16 = vmax.f32 %v195_v10, %v198_v11  ;;  %v100_v17 = vsub.f32 %v87_v1, %v1431_v12  ;;  %v103_v23 = vsub.f32 %v1423_v4, %v1431_v12 }
  0x30   :  { %v1438_v18 = vld [vmem:[#allocation3 + $0x140] sm:$0xff]  ;;  %v1441_v19 = vmax.f32 %v149_v13, %v1435_v15  ;;  %v106_v32 = vsub.f32 %v1425_v6, %v1431_v12 }
  0x31   :  { %v98_v20 = vmul.f32 1.442695, %v97_v14  ;;  %v206_v21 = vmax.f32 %v205_v16, %v1438_v18  ;;  %v101_v22 = vmul.f32 1.442695, %v100_v17  ;;  %v1446_v24 = vld [vmem:[#allocation3 + $0x160] sm:$0xff] }
  0x32   :  { %v252_v25 = vld [vmem:[#allocation3 + $0x180] sm:$0xff]  ;;  %v151_v27 = vsub.f32 %v138_v2, %v1441_v19  ;;  %v154_v28 = vsub.f32 %v141_v3, %v1441_v19  ;;  %v104_v31 = vmul.f32 1.442695, %v103_v23  ;;  %v157_v35 = vsub.f32 %v1428_v9, %v1441_v19  ;;  %v1487_v2 = vld [vmem:[#allocation3 + $0x68] sm:$0xff] }
  0x33   :  { %v255_v26 = vld [vmem:[#allocation3 + $0x1a0] sm:$0xff]  ;;  %1115 = vpow2.f32 %v98_v20  ;;  %v1451_v29 = vmax.f32 %v206_v21, %v1446_v24  ;;  %v107_v39 = vmul.f32 1.442695, %v106_v32  ;;  %v160_v45 = vsub.f32 %v1435_v15, %v1441_v19  ;;  %v1489_v3 = vld [vmem:[#allocation3 + $0xc8] sm:$0xff] }
  0x34   :  { %v262_v30 = vmax.f32 %v252_v25, %v255_v26  ;;  %1117 = vpow2.f32 %v101_v22  ;;  %v1455_v33 = vld [vmem:[#allocation3 + $0x1c0] sm:$0xff]  ;;  %v152_v34 = vmul.f32 1.442695, %v151_v27  ;;  %v155_v36 = vmul.f32 1.442695, %v154_v28  ;;  %v1497_v20 = vld [vmem:[#allocation3 + $0xe8] sm:$0xff] }
  0x35   :  { %v208_v37 = vsub.f32 %v195_v10, %v1451_v29  ;;  %1119 = vpow2.f32 %v104_v31  ;;  %v211_v40 = vsub.f32 %v198_v11, %v1451_v29  ;;  %v1462_v41 = vld [vmem:[#allocation3 + $0x1e0] sm:$0xff]  ;;  %v158_v42 = vmul.f32 1.442695, %v157_v35 }
  0x36   :  { %v263_v38 = vmax.f32 %v262_v30, %v1455_v33  ;;  %1121 = vpow2.f32 %v152_v34  ;;  %v214_v49 = vsub.f32 %v1438_v18, %v1451_v29  ;;  %v217_v53 = vsub.f32 %v1446_v24, %v1451_v29 }
  0x37   :  { %1123 = vpow2.f32 %v155_v36  ;;  %v209_v46 = vmul.f32 1.442695, %v208_v37  ;;  %v212_v48 = vmul.f32 1.442695, %v211_v40  ;;  %v161_v57 = vmul.f32 1.442695, %v160_v45 }
  0x38   :  { %v1469_v47 = vmax.f32 %v263_v38, %v1462_v41  ;;  %1125 = vpow2.f32 %v107_v39  ;;  %v215_v59 = vmul.f32 1.442695, %v214_v49  ;;  %v218_v1 = vmul.f32 1.442695, %v217_v53  ;;  %v55_v53 = vld [vmem:[#allocation6] sm:$0xff] }
  0x39   :  { %1127 = vpow2.f32 %v158_v42  ;;  %v1494_v14 = vmax.f32 %v328_v62, %v1487_v2  ;;  %v382_v16 = vmax.f32 %v381_v63, %v1489_v3  ;;  %v1526_v63 = vunpack.c.0.s8 %v55_v53 }
  0x3a   :  { %1129 = vpow2.f32 %v209_v46  ;;  %v265_v58 = vsub.f32 %v252_v25, %v1469_v47  ;;  %v268_v60 = vsub.f32 %v255_v26, %v1469_v47  ;;  %v271_v10 = vsub.f32 %v1455_v33, %v1469_v47 }
  0x3b   :  { %1131 = vpow2.f32 %v212_v48  ;;  %v274_v21 = vsub.f32 %v1462_v41, %v1469_v47  ;;  %v330_v28 = vsub.f32 %v317_v43, %v1494_v14  ;;  %v1503_v30 = vmax.f32 %v382_v16, %v1497_v20 }
  0x3c   :  { %1133 = vpow2.f32 %v161_v57  ;;  %v266_v5 = vmul.f32 1.442695, %v265_v58  ;;  %v269_v8 = vmul.f32 1.442695, %v268_v60  ;;  %v272_v25 = vmul.f32 1.442695, %v271_v10 }
  0x3d   :  { %v1116_v50 = vpop.eup %1115  ;;  %1135 = vpow2.f32 %v215_v59  ;;  %v333_v32 = vsub.f32 %v1464_v44, %v1494_v14  ;;  %v275_v34 = vmul.f32 1.442695, %v274_v21  ;;  %v331_v39 = vmul.f32 1.442695, %v330_v28  ;;  %v1532_v10 = vld [vmem:[#allocation3 + $0x188] sm:$0xff] }
  0x3e   :  { %v1118_v52 = vpop.eup %1117  ;;  %1137 = vpow2.f32 %v218_v1  ;;  %v384_v40 = vsub.f32 %v1478_v55, %v1503_v30  ;;  %v387_v45 = vsub.f32 %v1480_v56, %v1503_v30  ;;  %v336_v44 = vsub.f32 %v1476_v54, %v1494_v14 }
  0x3f   :  { %v109_v61 = vadd.f32 %v1118_v52, %v1116_v50  ;;  %v1120_v0 = vpop.eup %1119  ;;  %1139 = vpow2.f32 %v266_v5  ;;  %v334_v43 = vmul.f32 1.442695, %v333_v32  ;;  %v1515_v50 = vld [vmem:[#allocation3 + $0x108] sm:$0xff]  ;;  %v390_v59 = vsub.f32 %v1489_v3, %v1503_v30 }
  0x40   :  { %v1122_v7 = vpop.eup %1121  ;;  %1141 = vpow2.f32 %v269_v8  ;;  %v385_v57 = vmul.f32 1.442695, %v384_v40  ;;  %v388_v56 = vmul.f32 1.442695, %v387_v45  ;;  %v337_v60 = vmul.f32 1.442695, %v336_v44 }
  0x41   :  { %v1124_v11 = vpop.eup %1123  ;;  %v110_v13 = vadd.f32 %v1120_v0, %v109_v61  ;;  %v112_v35 = vmax.f32 %v109_v61, 1e-37  ;;  %1143 = vpow2.f32 %v272_v25  ;;  %v339_v61 = vsub.f32 %v1487_v2, %v1494_v14  ;;  %v1528_v0 = vld [vmem:[#allocation3 + $0x148] sm:$0xff]  ;;  %v71_v25 = vld [vmem:[#allocation6 + $0x10] sm:$0xff] }
  0x42   :  { %v1126_v17 = vpop.eup %1125  ;;  %v163_v23 = vadd.f32 %v1124_v11, %v1122_v7  ;;  %v438_v62 = vmax.f32 %v1515_v50, %v1517_v51  ;;  %v1530_v1 = vunpack.c.1.s8 %v55_v53  ;;  %v63_v5 = vld [vmem:[#allocation6 + $0x8] sm:$0xff]  ;;  %v1536_v16 = vunpack.c.2.s8 %v55_v53 }
  0x43   :  { %v1128_v22 = vpop.eup %1127  ;;  %v111_v27 = vadd.f32 %v1126_v17, %v110_v13  ;;  %v1534_v11 = vld [vmem:[#allocation3 + $0x1a8] sm:$0xff]  ;;  %v391_v17 = vmul.f32 1.442695, %v390_v59  ;;  %v393_v21 = vsub.f32 %v1497_v20, %v1503_v30  ;;  %v1543_v28 = vunpack.c.0.s8 %v63_v5 }
  0x44   :  { %v1130_v26 = vpop.eup %1129  ;;  %v164_v36 = vadd.f32 %v1128_v22, %v163_v23  ;;  %v166_v46 = vmax.f32 %v163_v23, 1e-37  ;;  %v1540_v23 = vunpack.c.3.s8 %v55_v53  ;;  %v1558_v45 = vunpack.c.0.s8 %v71_v25 }
  0x45   :  { %v1132_v31 = vpop.eup %1131  ;;  %1145 = vlog2.f32 %v111_v27  ;;  %v439_v27 = vmax.f32 %v438_v62, %v1528_v0  ;;  %vm127_vm0 = vcmp.eq.s32.totalorder %v1526_v63, 0  ;;  %vm129_vm1 = vcmp.eq.s32.totalorder %v1526_v63, 2 }
  0x46   :  { %v1134_v37 = vpop.eup %1133  ;;  %v1507_v38 = vadd.f32 %v1132_v31, %v1130_v26  ;;  %1147 = vpow2.f32 %v275_v34  ;;  %2126 = vst [vmem:[#allocation12_spill] sm:$0xff] %v1540_v23  ;;  %v340_v26 = vmul.f32 1.442695, %v339_v61  ;;  %v1545_v31 = vunpack.c.1.s8 %v63_v5  ;;  %v1548_v34 = vld [vmem:[#allocation3 + $0x168] sm:$0xff] }
  0x47   :  { %v1136_v42 = vpop.eup %1135  ;;  %1149 = vlog2.f32 %v112_v35  ;;  %v165_v49 = vadd.f32 %v1134_v37, %v164_v36  ;;  %v495_v35 = vmax.f32 %v1532_v10, %v1534_v11  ;;  %v1552_v37 = vunpack.c.2.s8 %v63_v5 }
  0x48   :  { %v1138_v48 = vpop.eup %1137  ;;  %v221_v55 = vadd.f32 %v1136_v42, %v1507_v38  ;;  %1151 = vpow2.f32 %v331_v39  ;;  %v223_v32 = vmax.f32 %v1507_v38, 1e-37  ;;  %v1554_v39 = vunpack.c.3.s8 %v63_v5  ;;  %v1556_v42 = vld [vmem:[#allocation3 + $0x1c8] sm:$0xff] }
  0x49   :  { %v1140_v52 = vpop.eup %1139  ;;  %1153 = vpow2.f32 %v334_v43  ;;  %v394_v38 = vmul.f32 1.442695, %v393_v21  ;;  %v1565_v53 = vmax.f32 %v439_v27, %v1548_v34  ;;  %vm131_vm2 = vcmp.eq.s32.totalorder %v1526_v63, 3 }
  0x4a   :  { %v1142_v58 = vpop.eup %1141  ;;  %1155 = vlog2.f32 %v166_v46  ;;  %v222_v7 = vadd.f32 %v1138_v48, %v221_v55  ;;  %2127 = vst [vmem:[#allocation13_spill] sm:$0xff] %v1554_v39  ;;  %v79_v46 = vld [vmem:[#allocation6 + $0x18] sm:$0xff]  ;;  %vm184_vm3 = vcmp.eq.s32.totalorder %v1543_v28, 0  ;;  %vm186_vm4 = vcmp.eq.s32.totalorder %v1543_v28, 2 }
  0x4b   :  { %1157 = vlog2.f32 %v165_v49  ;;  %v277_v8 = vadd.f32 %v1142_v58, %v1140_v52  ;;  %v1144_v13 = vpop.eup %1143  ;;  %v1560_v49 = vunpack.c.1.s8 %v71_v25  ;;  %v1562_v52 = vunpack.c.2.s8 %v71_v25 }
  0x4c   :  { %1159 = vpow2.f32 %v385_v57  ;;  %v1567_v57 = vunpack.c.3.s8 %v71_v25  ;;  %v1572_v61 = vunpack.c.1.s8 %v79_v46  ;;  %v1578_v21 = vunpack.c.3.s8 %v79_v46 }
  0x4d   :  { %1161 = vpow2.f32 %v388_v56  ;;  %v278_v40 = vadd.f32 %v1144_v13, %v277_v8  ;;  %v280_v58 = vmax.f32 %v277_v8, 1e-37  ;;  %v496_v56 = vmax.f32 %v495_v35, %v1556_v42 }
  0x4e   :  { %1163 = vpow2.f32 %v337_v60  ;;  %2128 = vst [vmem:[#allocation14_spill] sm:$0xff] %v1567_v57  ;;  %v1570_v60 = vunpack.c.0.s8 %v79_v46  ;;  %2130 = vst [vmem:[#allocation16_spill] sm:$0xff] %v1578_v21  ;;  %v441_v25 = vsub.f32 %v1515_v50, %v1565_v53  ;;  %vm188_vm5 = vcmp.eq.s32.totalorder %v1543_v28, 3 }
  0x4f   :  { %v1146_v22 = vpop.eup %1145  ;;  %1165 = vlog2.f32 %v222_v7  ;;  %v1574_v7 = vld [vmem:[#allocation3 + $0x1e8] sm:$0xff]  ;;  %vm241_vm6 = vcmp.eq.s32.totalorder %v1558_v45, 0  ;;  %vm243_vm7 = vcmp.eq.s32.totalorder %v1558_v45, 2  ;;  %vm133_vm8 = vcmp.eq.s32.totalorder %v1526_v63, 4294967196 }
  0x50   :  { %v1148_v36 = vpop.eup %1147  ;;  %v114_v44 = vmul.f32 0.6931472, %v1146_v22  ;;  %1167 = vpow2.f32 %v391_v17  ;;  %v1576_v17 = vunpack.c.2.s8 %v79_v46  ;;  %v1589_v35 = vmax.f32 %v496_v56, %v1574_v7 }
  0x51   :  { %v1150_v43 = vpop.eup %1149  ;;  %1169 = vpow2.f32 %v340_v26  ;;  %v279_v5 = vadd.f32 %v1148_v36, %v278_v40  ;;  %v447_v40 = vsub.f32 %v1528_v0, %v1565_v53  ;;  %v442_v56 = vmul.f32 1.442695, %v441_v25 }
  0x52   :  { %v1152_v48 = vpop.eup %1151  ;;  %1171 = vlog2.f32 %v223_v32  ;;  %v117_v62 = vmul.f32 0.6931472, %v1150_v43  ;;  %2129 = vst [vmem:[#allocation15_spill] sm:$0xff] %v1576_v17  ;;  %v115_v22 = vadd.f32 %v114_v44, %v1431_v12  ;;  %v444_v32 = vsub.f32 %v1517_v51, %v1565_v53  ;;  %v1598_v51 = vld [vmem:[#allocation3 + $0x10] sm:$0xff] }
  0x53   :  { %v1154_v55 = vpop.eup %1153  ;;  %1173 = vpow2.f32 %v394_v38  ;;  %v450_v43 = vsub.f32 %v1548_v34, %v1565_v53  ;;  %v1600_v38 = vld [vmem:[#allocation3 + $0x30] sm:$0xff]  ;;  %v498_v21 = vsub.f32 %v1532_v10, %v1589_v35  ;;  %v448_v23 = vmul.f32 1.442695, %v447_v40 }
  0x54   :  { %v1156_v59 = vpop.eup %1155  ;;  %1175 = vlog2.f32 %v280_v58  ;;  %v342_v27 = vadd.f32 %v1154_v55, %v1152_v48  ;;  %v118_v36 = vsub.f32 %v117_v62, %v114_v44  ;;  %v119_v50 = vsub.f32 %v1423_v4, %v115_v22 }
  0x55   :  { %v1158_v13 = vpop.eup %1157  ;;  %1177 = vlog2.f32 %v279_v5  ;;  %v171_v55 = vmul.f32 0.6931472, %v1156_v59  ;;  %v120_v4 = vsub.f32 %v1425_v6, %v115_v22  ;;  %v445_v39 = vmul.f32 1.442695, %v444_v32 }
  0x56   :  { %v1160_v8 = vpop.eup %1159  ;;  %v168_v46 = vmul.f32 0.6931472, %v1158_v13  ;;  %v128_v44 = vsel %vm127_vm0, %v118_v36, 0.0  ;;  %v345_v13 = vmax.f32 %v342_v27, 1e-37  ;;  %v121_v25 = vsub.f32 1.0, %v118_v36 }
  0x57   :  { %v1162_v26 = vpop.eup %1161  ;;  %v1611_v17 = vmul.f32 1.442695, %v450_v43  ;;  %v123_v6 = vsub.f32 1.0, %v119_v50  ;;  %v130_v22 = vsel %vm129_vm1, %v119_v50, %v128_v44  ;;  %1179 = vpow2.f32 %v442_v56 }
  0x58   :  { %v1164_v12 = vpop.eup %1163  ;;  %v1604_v58 = vadd.f32 %v1162_v26, %v1160_v8  ;;  %v169_v26 = vadd.f32 %v168_v46, %v1441_v19  ;;  %v125_v40 = vsub.f32 1.0, %v120_v4  ;;  %1181 = vlog2.f32 %v345_v13 }
  0x59   :  { %v1166_v48 = vpop.eup %1165  ;;  %v343_v5 = vadd.f32 %v1164_v12, %v342_v27  ;;  %v172_v27 = vsub.f32 %v171_v55, %v168_v46  ;;  %v499_v59 = vmul.f32 1.442695, %v498_v21  ;;  %v132_v36 = vsel %vm131_vm2, %v120_v4, %v130_v22 }
  0x5a   :  { %v1168_v62 = vpop.eup %1167  ;;  %v225_v10 = vmul.f32 0.6931472, %v1166_v48  ;;  %v501_v46 = vsub.f32 %v1534_v11, %v1589_v35  ;;  %v122_v44 = vmul.f32 %v121_v25, %v121_v25  ;;  %v124_v55 = vmul.f32 %v123_v6, %v123_v6 }
  0x5b   :  { %v1170_v57 = vpop.eup %1169  ;;  %v397_v12 = vadd.f32 %v1168_v62, %v1604_v58  ;;  %v185_v19 = vsel %vm184_vm3, %v172_v27, 0.0  ;;  %v173_v56 = vsub.f32 %v1428_v9, %v169_v26  ;;  %v175_v62 = vsub.f32 1.0, %v172_v27 }
  0x5c   :  { %v1172_v8 = vpop.eup %1171  ;;  %v344_v43 = vadd.f32 %v1170_v57, %v343_v5  ;;  %v174_v57 = vsub.f32 %v1435_v15, %v169_v26  ;;  %v226_v4 = vadd.f32 %v225_v10, %v1451_v29  ;;  %vm245_vm9 = vcmp.eq.s32.totalorder %v1558_v45, 3 }
  0x5d   :  { %v1174_v32 = vpop.eup %1173  ;;  %v228_v50 = vmul.f32 0.6931472, %v1172_v8  ;;  %1183 = vpow2.f32 %v445_v39  ;;  %v126_v13 = vmul.f32 %v125_v40, %v125_v40  ;;  %v134_v8 = vsub.f32 0.0, %v132_v36 }
  0x5e   :  { %v1176_v48 = vpop.eup %1175  ;;  %v398_v5 = vadd.f32 %v1174_v32, %v397_v12  ;;  %v187_v11 = vsel %vm186_vm4, %v173_v56, %v185_v19  ;;  %vm190_vm10 = vcmp.eq.s32.totalorder %v1543_v28, 4294967196  ;;  %vm298_vm11 = vcmp.eq.s32.totalorder %v1570_v60, 0  ;;  %v1641_v32 = vld [vmem:[#allocation3 + $0x50] sm:$0xff] }
  0x5f   :  { %v1178_v21 = vpop.eup %1177  ;;  %1185 = vlog2.f32 %v344_v43  ;;  %v229_v9 = vsub.f32 %v228_v50, %v225_v10  ;;  %v285_v15 = vmul.f32 0.6931472, %v1176_v48  ;;  %v502_v25 = vmul.f32 1.442695, %v501_v46 }
  0x60   :  { %v504_v29 = vsub.f32 %v1556_v42, %v1589_v35  ;;  %v178_v6 = vsub.f32 1.0, %v173_v56  ;;  %v181_v22 = vsub.f32 1.0, %v174_v57  ;;  %v282_v26 = vmul.f32 0.6931472, %v1178_v21 }
  0x61   :  { %1187 = vpow2.f32 %v448_v23  ;;  %v176_v39 = vmul.f32 %v175_v62, %v175_v62  ;;  %v189_v27 = vsel %vm188_vm5, %v174_v57, %v187_v11  ;;  %v230_v12 = vsub.f32 %v1438_v18, %v226_v4  ;;  %v1180_v23 = vpop.eup %1179  ;;  %v1658_v62 = vld [vmem:[#allocation3 + $0x70] sm:$0xff] }
  0x62   :  { %vm300_vm12 = vcmp.eq.s32.totalorder %v1570_v60, 2  ;;  %1189 = vlog2.f32 %v398_v5  ;;  %v231_v10 = vsub.f32 %v1446_v24, %v226_v4  ;;  %v242_v40 = vsel %vm241_vm6, %v229_v9, 0.0  ;;  %v1182_v50 = vpop.eup %1181 }
  0x63   :  { %v399_v43 = vmax.f32 %v1604_v58, 1e-37  ;;  %1191 = vpow2.f32 %v499_v59  ;;  %v232_v36 = vsub.f32 1.0, %v229_v9  ;;  %v505_v19 = vmul.f32 1.442695, %v504_v29 }
  0x64   :  { %1193 = vpow2.f32 %v502_v25  ;;  %v507_v18 = vsub.f32 %v1574_v7, %v1589_v35  ;;  %v179_v46 = vmul.f32 %v178_v6, %v178_v6  ;;  %v182_v48 = vmul.f32 %v181_v22, %v181_v22 }
  0x65   :  { %vm247_vm13 = vcmp.eq.s32.totalorder %v1558_v45, 4294967196  ;;  %v286_v56 = vsub.f32 %v285_v15, %v282_v26  ;;  %vm302_vm14 = vcmp.eq.s32.totalorder %v1570_v60, 3  ;;  %v2131_v24 = vmax.f32 %v1598_v51, %v1600_v38 }
  0x66   :  { %v191_v59 = vsub.f32 0.0, %v189_v27  ;;  %v235_v57 = vsub.f32 1.0, %v230_v12  ;;  %v244_v21 = vsel %vm243_vm7, %v230_v12, %v242_v40  ;;  %1195 = vpow2.f32 %v1611_v17 }
  0x67   :  { %v561_v58 = vmax.f32 %v2131_v24, %v1641_v32  ;;  %v1662_v4 = vsel %vm133_vm8, 0.0, %v134_v8  ;;  %v238_v5 = vsub.f32 1.0, %v231_v10  ;;  %v283_v11 = vadd.f32 %v282_v26, %v1469_v47  ;;  %v1184_v9 = vpop.eup %1183 }
  0x68   :  { %1197 = vlog2.f32 %v399_v43  ;;  %v177_v15 = vadd.f32 %v176_v39, %v122_v44  ;;  %v233_v25 = vmul.f32 %v232_v36, %v232_v36  ;;  %v508_v29 = vmul.f32 1.442695, %v507_v18  ;;  %v1677_v43 = vld [vmem:[#allocation3 + $0x90] sm:$0xff] }
  0x69   :  { %1199 = vpow2.f32 %v505_v19  ;;  %v1186_v6 = vpop.eup %1185  ;;  %v180_v22 = vadd.f32 %v179_v46, %v124_v55  ;;  %v246_v17 = vsel %vm245_vm9, %v231_v10, %v244_v21  ;;  %v289_v27 = vsub.f32 1.0, %v286_v56  ;;  %v1679_v36 = vld [vmem:[#allocation3 + $0xb0] sm:$0xff] }
  0x6a   :  { %vm360_vm15 = vcmp.eq.s32.totalorder %v1530_v1, 0  ;;  %v1669_v63 = vmax.f32 %v561_v58, %v1658_v62  ;;  %v183_v8 = vadd.f32 %v182_v48, %v126_v13  ;;  %v192_v47 = vsel %vm190_vm10, 0.0, %v191_v59 }
  0x6b   :  { %v236_v26 = vmul.f32 %v235_v57, %v235_v57  ;;  %v299_v44 = vsel %vm298_vm11, %v286_v56, 0.0  ;;  %v1188_v39 = vpop.eup %1187  ;;  %v239_v12 = vmul.f32 %v238_v5, %v238_v5  ;;  %v287_v55 = vsub.f32 %v1455_v33, %v283_v11 }
  0x6c   :  { %v288_v10 = vsub.f32 %v1462_v41, %v283_v11  ;;  %v453_v40 = vadd.f32 %v1184_v9, %v1180_v23  ;;  %v1190_v19 = vpop.eup %1189  ;;  %v234_v13 = vadd.f32 %v233_v25, %v177_v15  ;;  %v248_v18 = vsub.f32 0.0, %v246_v17  ;;  %v1693_v15 = vld [vmem:[#allocation3 + $0xd0] sm:$0xff] }
  0x6d   :  { %vm304_vm0 = vcmp.eq.s32.totalorder %v1570_v60, 4294967196  ;;  %v347_v28 = vmul.f32 0.6931472, %v1186_v6  ;;  %1201 = vpow2.f32 %v508_v29  ;;  %v1192_v46 = vpop.eup %1191  ;;  %v290_v48 = vmul.f32 %v289_v27, %v289_v27  ;;  %v1745_v60 = vld [vmem:[#allocation3 + $0x1b0] sm:$0xff] }
  0x6e   :  { %v301_v56 = vsel %vm300_vm12, %v287_v55, %v299_v44  ;;  %v1684_v33 = vmul.f32 4.0, %v192_v47  ;;  %vm362_vm1 = vcmp.eq.s32.totalorder %v1530_v1, 2  ;;  %v563_v41 = vsub.f32 %v1598_v51, %v1669_v63  ;;  %v1194_v23 = vpop.eup %1193 }
  0x6f   :  { %v237_v24 = vadd.f32 %v236_v26, %v180_v22  ;;  %v350_v58 = vmul.f32 0.6931472, %v1182_v50  ;;  %v566_v59 = vsub.f32 %v1600_v38, %v1669_v63  ;;  %v614_v57 = vmax.f32 %v1677_v43, %v1679_v36 }
  0x70   :  { %v240_v21 = vadd.f32 %v239_v12, %v183_v8  ;;  %v292_v5 = vsub.f32 1.0, %v287_v55  ;;  %v295_v11 = vsub.f32 1.0, %v288_v10  ;;  %v454_v9 = vadd.f32 %v1188_v39, %v453_v40  ;;  %v1196_v25 = vpop.eup %1195  ;;  %v1711_v12 = vld [vmem:[#allocation3 + $0x130] sm:$0xff] }
  0x71   :  { %v1697_v29 = vsel %vm247_vm13, 0.0, %v248_v18  ;;  %v303_v51 = vsel %vm302_vm14, %v288_v10, %v301_v56  ;;  %v348_v50 = vadd.f32 %v347_v28, %v1494_v14  ;;  %vm417_vm2 = vcmp.eq.s32.totalorder %v1545_v31, 0  ;;  %v1709_v14 = vld [vmem:[#allocation3 + $0x110] sm:$0xff] }
  0x72   :  { %v456_v38 = vmax.f32 %v453_v40, 1e-37  ;;  %v1198_v6 = vpop.eup %1197  ;;  %v291_v22 = vadd.f32 %v290_v48, %v234_v13  ;;  %vm364_vm3 = vcmp.eq.s32.totalorder %v1530_v1, 3  ;;  %v401_v17 = vmul.f32 0.6931472, %v1190_v19  ;;  %v1714_v13 = vld [vmem:[#allocation3 + $0xf0] sm:$0xff] }
  0x73   :  { %v510_v27 = vadd.f32 %v1194_v23, %v1192_v46  ;;  %v564_v8 = vmul.f32 1.442695, %v563_v41  ;;  %v1200_v47 = vpop.eup %1199  ;;  %v1704_v26 = vsub.f32 %v350_v58, %v347_v28  ;;  %v567_v45 = vmul.f32 1.442695, %v566_v59 }
  0x74   :  { %v569_v44 = vsub.f32 %v1641_v32, %v1669_v63  ;;  %v615_v39 = vmax.f32 %v614_v57, %v1693_v15  ;;  %v293_v55 = vmul.f32 %v292_v5, %v292_v5  ;;  %v296_v10 = vmul.f32 %v295_v11, %v295_v11  ;;  %v1729_v57 = vld [vmem:[#allocation3 + $0x150] sm:$0xff] }
  0x75   :  { %v305_v40 = vsub.f32 0.0, %v303_v51  ;;  %vm419_vm4 = vcmp.eq.s32.totalorder %v1545_v31, 2  ;;  %v455_v19 = vadd.f32 %v1196_v25, %v454_v9  ;;  %v352_v18 = vsub.f32 %v1476_v54, %v348_v50 }
  0x76   :  { %v361_v28 = vsel %vm360_vm15, %v1704_v26, 0.0  ;;  %v404_v46 = vmul.f32 0.6931472, %v1198_v6  ;;  %1203 = vlog2.f32 %v456_v38  ;;  %v402_v48 = vadd.f32 %v401_v17, %v1503_v30 }
  0x77   :  { %v511_v56 = vadd.f32 %v1200_v47, %v510_v27  ;;  %1205 = vpow2.f32 %v564_v8  ;;  %v671_v41 = vmax.f32 %v1709_v14, %v1711_v12  ;;  %v1202_v23 = vpop.eup %1201  ;;  %vm421_vm5 = vcmp.eq.s32.totalorder %v1545_v31, 3 }
  0x78   :  { %1207 = vpow2.f32 %v567_v45  ;;  %v570_v58 = vmul.f32 1.442695, %v569_v44  ;;  %v572_v54 = vsub.f32 %v1658_v62, %v1669_v63  ;;  %v1727_v59 = vmax.f32 %v615_v39, %v1714_v13 }
  0x79   :  { %v294_v5 = vadd.f32 %v293_v55, %v237_v24  ;;  %v1731_v30 = vadd.f32 %v296_v10, %v240_v21  ;;  %v1735_v11 = vsel %vm304_vm0, 0.0, %v305_v40  ;;  %1209 = vlog2.f32 %v455_v19  ;;  %v1743_v21 = vld [vmem:[#allocation3 + $0x190] sm:$0xff] }
  0x7a   :  { %v307_v9 = vmul.f32 %v291_v22, %v1662_v4  ;;  %v353_v25 = vsub.f32 %v1487_v2, %v348_v50  ;;  %v363_v51 = vsel %vm362_vm1, %v352_v18, %v361_v28  ;;  %v513_v38 = vmax.f32 %v510_v27, 1e-37  ;;  %v1751_v22 = vld [vmem:[#allocation3 + $0x170] sm:$0xff] }
  0x7b   :  { %v405_v6 = vsub.f32 %v404_v46, %v401_v17  ;;  %v406_v8 = vsub.f32 %v1489_v3, %v402_v48  ;;  %v512_v47 = vadd.f32 %v1202_v23, %v511_v56  ;;  %v672_v24 = vmax.f32 %v671_v41, %v1729_v57  ;;  %v1766_v10 = vld [vmem:[#allocation3 + $0x1d0] sm:$0xff] }
  0x7c   :  { %vm366_vm6 = vcmp.eq.s32.totalorder %v1530_v1, 4294967196  ;;  %v407_v4 = vsub.f32 %v1497_v20, %v402_v48  ;;  %1211 = vpow2.f32 %v570_v58  ;;  %v573_v2 = vmul.f32 1.442695, %v572_v54 }
  0x7d   :  { %v617_v50 = vsub.f32 %v1677_v43, %v1727_v59  ;;  %v354_v3 = vsub.f32 1.0, %v1704_v26  ;;  %v356_v17 = vsub.f32 1.0, %v352_v18  ;;  %v418_v27 = vsel %vm417_vm2, %v405_v6, 0.0 }
  0x7e   :  { %v620_v45 = vsub.f32 %v1679_v36, %v1727_v59  ;;  %v358_v44 = vsub.f32 1.0, %v353_v25  ;;  %v365_v20 = vsel %vm364_vm3, %v353_v25, %v363_v51  ;;  %1213 = vlog2.f32 %v513_v38 }
  0x7f   :  { %v728_v39 = vmax.f32 %v1743_v21, %v1745_v60  ;;  %v408_v43 = vsub.f32 1.0, %v405_v6  ;;  %v411_v55 = vsub.f32 1.0, %v406_v8  ;;  %vm423_vm7 = vcmp.eq.s32.totalorder %v1545_v31, 4294967196 }
  0x80   :  { %1215 = vlog2.f32 %v512_v47  ;;  %v1764_v26 = vmax.f32 %v672_v24, %v1751_v22  ;;  %v1204_v40 = vpop.eup %1203  ;;  %v414_v36 = vsub.f32 1.0, %v407_v4  ;;  %v420_v19 = vsel %vm419_vm4, %v406_v8, %v418_v27 }
  0x81   :  { %1217 = vpow2.f32 %v573_v2  ;;  %v618_v18 = vmul.f32 1.442695, %v617_v50  ;;  %v1206_v28 = vpop.eup %1205  ;;  %v309_v46 = vadd.f32 %v1684_v33, %v307_v9  ;;  %v310_v48 = vmul.f32 %v294_v5, %v1697_v29  ;;  %v1780_v5 = vld [vmem:[#allocation3 + $0x1f0] sm:$0xff] }
  0x82   :  { %v621_v56 = vmul.f32 1.442695, %v620_v45  ;;  %v623_v41 = vsub.f32 %v1693_v15, %v1727_v59  ;;  %v1208_v23 = vpop.eup %1207  ;;  %v355_v58 = vmul.f32 %v354_v3, %v354_v3  ;;  %v357_v54 = vmul.f32 %v356_v17, %v356_v17 }
  0x83   :  { %v359_v25 = vmul.f32 %v358_v44, %v358_v44  ;;  %vm474_vm8 = vcmp.eq.s32.totalorder %v1560_v49, 0  ;;  %v729_v51 = vmax.f32 %v728_v39, %v1766_v10  ;;  %v1210_v38 = vpop.eup %1209  ;;  %v367_v6 = vsub.f32 0.0, %v365_v20 }
  0x84   :  { %v409_v8 = vmul.f32 %v408_v43, %v408_v43  ;;  %v422_v33 = vsel %vm421_vm5, %v407_v4, %v420_v19  ;;  %v674_v29 = vsub.f32 %v1709_v14, %v1764_v26  ;;  %v412_v9 = vmul.f32 %v411_v55, %v411_v55 }
  0x85   :  { %v415_v47 = vmul.f32 %v414_v36, %v414_v36  ;;  %1219 = vpow2.f32 %v618_v18  ;;  %v677_v24 = vsub.f32 %v1711_v12, %v1764_v26  ;;  %vm476_vm9 = vcmp.eq.s32.totalorder %v1560_v49, 2  ;;  %v1806_v18 = vld [vmem:[#allocation3 + $0x18] sm:$0xff] }
  0x86   :  { %v575_v2 = vadd.f32 %v1208_v23, %v1206_v28  ;;  %1221 = vpow2.f32 %v621_v56  ;;  %v624_v50 = vmul.f32 1.442695, %v623_v41  ;;  %v626_v3 = vsub.f32 %v1714_v13, %v1727_v59  ;;  %v1212_v4 = vpop.eup %1211  ;;  %v1808_v28 = vld [vmem:[#allocation3 + $0x38] sm:$0xff] }
  0x87   :  { %v424_v17 = vsub.f32 0.0, %v422_v33  ;;  %v458_v27 = vmul.f32 0.6931472, %v1210_v38  ;;  %v461_v14 = vmul.f32 0.6931472, %v1204_v40  ;;  %v1788_v45 = vmax.f32 %v729_v51, %v1780_v5 }
  0x88   :  { %v1790_v44 = vadd.f32 %v310_v48, %v309_v46  ;;  %v1794_v12 = vmul.f32 %v1735_v11, %v1731_v30  ;;  %v1798_v20 = vsel %vm366_vm6, 0.0, %v367_v6  ;;  %v675_v39 = vmul.f32 1.442695, %v674_v29  ;;  %v1214_v43 = vpop.eup %1213 }
  0x89   :  { %v1800_v55 = vadd.f32 %v409_v8, %v355_v58  ;;  %v1802_v36 = vadd.f32 %v412_v9, %v357_v54  ;;  %v678_v40 = vmul.f32 1.442695, %v677_v24  ;;  %v680_v19 = vsub.f32 %v1729_v57, %v1764_v26  ;;  %v1830_v24 = vld [vmem:[#allocation3 + $0x58] sm:$0xff] }
  0x8a   :  { %v1216_v30 = vpop.eup %1215  ;;  %v1810_v11 = vadd.f32 %v415_v47, %v359_v25  ;;  %vm478_vm10 = vcmp.eq.s32.totalorder %v1560_v49, 3  ;;  %v576_v1 = vadd.f32 %v1212_v4, %v575_v2  ;;  %1223 = vpow2.f32 %v624_v50 }
  0x8b   :  { %v627_v46 = vmul.f32 1.442695, %v626_v3  ;;  %v1218_v48 = vpop.eup %1217  ;;  %v425_v56 = vsel %vm423_vm7, 0.0, %v424_v17  ;;  %v459_v41 = vadd.f32 %v458_v27, %v1565_v53  ;;  %v462_v23 = vsub.f32 %v461_v14, %v458_v27  ;;  %v1839_v14 = vld [vmem:[#allocation3 + $0x78] sm:$0xff] }
  0x8c   :  { %v731_v58 = vsub.f32 %v1743_v21, %v1788_v45  ;;  %vm531_vm11 = vcmp.eq.s32.totalorder %v1572_v61, 0  ;;  %v578_v54 = vmax.f32 %v575_v2, 1e-37  ;;  %1225 = vpow2.f32 %v675_v39  ;;  %2132 = vst [vmem:[#allocation17_spill] sm:$0xff] %v1839_v14  ;;  %v1841_v39 = vld [vmem:[#allocation3 + $0x98] sm:$0xff] }
  0x8d   :  { %v734_v25 = vsub.f32 %v1745_v60, %v1788_v45  ;;  %v793_v51 = vmax.f32 %v1806_v18, %v1808_v28  ;;  %v515_v38 = vmul.f32 0.6931472, %v1216_v30  ;;  %1227 = vpow2.f32 %v678_v40 }
  0x8e   :  { %v681_v31 = vmul.f32 1.442695, %v680_v19  ;;  %v683_v53 = vsub.f32 %v1751_v22, %v1764_v26  ;;  %v475_v6 = vsel %vm474_vm8, %v462_v23, 0.0  ;;  %v518_v21 = vmul.f32 0.6931472, %v1214_v43  ;;  %v1843_v43 = vld [vmem:[#allocation3 + $0xb8] sm:$0xff] }
  0x8f   :  { %v577_v8 = vadd.f32 %v1218_v48, %v576_v1  ;;  %1229 = vpow2.f32 %v627_v46  ;;  %v1220_v33 = vpop.eup %1219  ;;  %v463_v29 = vsub.f32 %v1528_v0, %v459_v41  ;;  %v465_v9 = vsub.f32 1.0, %v462_v23 }
  0x90   :  { %v1828_v60 = vmul.f32 4.0, %v425_v56  ;;  %v732_v47 = vmul.f32 1.442695, %v731_v58  ;;  %v1222_v2 = vpop.eup %1221  ;;  %v464_v50 = vsub.f32 %v1548_v34, %v459_v41  ;;  %vm533_vm12 = vcmp.eq.s32.totalorder %v1572_v61, 2  ;;  %v1854_v41 = vld [vmem:[#allocation3 + $0xd8] sm:$0xff] }
  0x91   :  { %1231 = vlog2.f32 %v578_v54  ;;  %v735_v3 = vmul.f32 1.442695, %v734_v25  ;;  %v737_v4 = vsub.f32 %v1766_v10, %v1788_v45  ;;  %v477_v17 = vsel %vm476_vm9, %v463_v29, %v475_v6 }
  0x92   :  { %v516_v0 = vadd.f32 %v515_v38, %v1589_v35  ;;  %1233 = vpow2.f32 %v681_v31  ;;  %v684_v27 = vmul.f32 1.442695, %v683_v53  ;;  %v519_v34 = vsub.f32 %v518_v21, %v515_v38  ;;  %v1867_v21 = vld [vmem:[#allocation3 + $0xf8] sm:$0xff] }
  0x93   :  { %1235 = vlog2.f32 %v577_v8  ;;  %v740_v40 = vsub.f32 %v1780_v5, %v1788_v45  ;;  %v794_v19 = vmax.f32 %v793_v51, %v1830_v24  ;;  %v466_v30 = vmul.f32 %v465_v9, %v465_v9 }
  0x94   :  { %v468_v1 = vsub.f32 1.0, %v463_v29  ;;  %vm535_vm13 = vcmp.eq.s32.totalorder %v1572_v61, 3  ;;  %v1849_v35 = vadd.f32 %v1222_v2, %v1220_v33  ;;  %1237 = vpow2.f32 %v732_v47  ;;  %v1224_v46 = vpop.eup %1223 }
  0x95   :  { %1239 = vpow2.f32 %v735_v3  ;;  %v738_v48 = vmul.f32 1.442695, %v737_v4  ;;  %v1852_v56 = vmax.f32 %v794_v19, %v1839_v14  ;;  %v847_v23 = vmax.f32 %v1841_v39, %v1843_v43  ;;  %v1885_v19 = vld [vmem:[#allocation3 + $0x138] sm:$0xff] }
  0x96   :  { %v471_v58 = vsub.f32 1.0, %v464_v50  ;;  %v1860_v54 = vsel %vm478_vm10, %v464_v50, %v477_v17  ;;  %v520_v25 = vsub.f32 %v1556_v42, %v516_v0  ;;  %1241 = vpow2.f32 %v684_v27  ;;  %v1226_v51 = vpop.eup %1225 }
  0x97   :  { %v522_v38 = vsub.f32 1.0, %v519_v34  ;;  %v741_v31 = vmul.f32 1.442695, %v740_v40  ;;  %v796_v53 = vsub.f32 %v1806_v18, %v1852_v56  ;;  %v799_v6 = vsub.f32 %v1808_v28, %v1852_v56  ;;  %v1228_v8 = vpop.eup %1227  ;;  %v1883_v40 = vld [vmem:[#allocation3 + $0x118] sm:$0xff] }
  0x98   :  { %v521_v33 = vsub.f32 %v1574_v7, %v516_v0  ;;  %v532_v29 = vsel %vm531_vm11, %v519_v34, 0.0  ;;  %v630_v42 = vadd.f32 %v1224_v46, %v1849_v35  ;;  %v848_v9 = vmax.f32 %v847_v23, %v1854_v41 }
  0x99   :  { %v1230_v47 = vpop.eup %1229  ;;  %1243 = vpow2.f32 %v738_v48  ;;  %v797_v2 = vmul.f32 1.442695, %v796_v53  ;;  %v800_v50 = vmul.f32 1.442695, %v799_v6  ;;  %v802_v18 = vsub.f32 %v1830_v24, %v1852_v56 }
  0x9a   :  { %v467_v28 = vadd.f32 %v466_v30, %v1800_v55  ;;  %v469_v3 = vmul.f32 %v468_v1, %v468_v1  ;;  %v472_v4 = vmul.f32 %v471_v58, %v471_v58  ;;  %vm480_vm14 = vcmp.eq.s32.totalorder %v1560_v49, 4294967196 }
  0x9b   :  { %v1879_v7 = vmax.f32 %v848_v9, %v1867_v21  ;;  %v1232_v17 = vpop.eup %1231  ;;  %v523_v0 = vmul.f32 %v522_v38, %v522_v38  ;;  %v525_v27 = vsub.f32 1.0, %v520_v25  ;;  %v1881_v34 = vadd.f32 %v1228_v8, %v1226_v51 }
  0x9c   :  { %1245 = vpow2.f32 %v741_v31  ;;  %v1234_v46 = vpop.eup %1233  ;;  %v534_v55 = vsel %vm533_vm12, %v520_v25, %v532_v29  ;;  %vm537_vm15 = vcmp.eq.s32.totalorder %v1572_v61, 4294967196  ;;  %v631_v30 = vadd.f32 %v1230_v47, %v630_v42  ;;  %v1904_v47 = vld [vmem:[#allocation3 + $0x158] sm:$0xff] }
  0x9d   :  { %1247 = vpow2.f32 %v797_v2  ;;  %v850_v1 = vsub.f32 %v1841_v39, %v1879_v7  ;;  %v1236_v48 = vpop.eup %1235  ;;  %v528_v23 = vsub.f32 1.0, %v521_v33  ;;  %v803_v58 = vmul.f32 1.442695, %v802_v18 }
  0x9e   :  { %1249 = vpow2.f32 %v800_v50  ;;  %v805_v51 = vsub.f32 %v1839_v14, %v1852_v56  ;;  %v1238_v38 = vpop.eup %1237  ;;  %v470_v31 = vadd.f32 %v469_v3, %v1802_v36  ;;  %v481_v53 = vsub.f32 0.0, %v1860_v54 }
  0x9f   :  { %v853_v25 = vsub.f32 %v1843_v43, %v1879_v7  ;;  %v904_v6 = vmax.f32 %v1883_v40, %v1885_v19  ;;  %v1240_v8 = vpop.eup %1239  ;;  %v526_v39 = vmul.f32 %v525_v27, %v525_v27  ;;  %v536_v29 = vsel %vm535_vm13, %v521_v33, %v534_v55 }
  0xa0   :  { %v632_v42 = vmax.f32 %v1849_v35, 1e-37  ;;  %v687_v9 = vadd.f32 %v1234_v46, %v1881_v34  ;;  %v1242_v36 = vpop.eup %1241  ;;  %v524_v2 = vadd.f32 %v523_v0, %v467_v28  ;;  %1251 = vlog2.f32 %v631_v30  ;;  %v1912_v30 = vld [vmem:[#allocation3 + $0x178] sm:$0xff] }
  0xa1   :  { %v851_v54 = vmul.f32 1.442695, %v850_v1  ;;  %v856_v43 = vsub.f32 %v1854_v41, %v1879_v7  ;;  %v473_v50 = vadd.f32 %v472_v4, %v1810_v11  ;;  %v529_v18 = vmul.f32 %v528_v23, %v528_v23 }
  0xa2   :  { %1253 = vpow2.f32 %v803_v58  ;;  %v806_v3 = vmul.f32 1.442695, %v805_v51  ;;  %v743_v27 = vadd.f32 %v1240_v8, %v1238_v38  ;;  %v854_v33 = vmul.f32 1.442695, %v853_v25 }
  0xa3   :  { %v859_v35 = vsub.f32 %v1867_v21, %v1879_v7  ;;  %v905_v46 = vmax.f32 %v904_v6, %v1904_v47  ;;  %v1244_v55 = vpop.eup %1243  ;;  %v527_v14 = vadd.f32 %v526_v39, %v470_v31  ;;  %v538_v28 = vsub.f32 0.0, %v536_v29  ;;  %v1929_v29 = vld [vmem:[#allocation3 + $0x1b8] sm:$0xff] }
  0xa4   :  { %1255 = vlog2.f32 %v632_v42  ;;  %v688_v0 = vadd.f32 %v1242_v36, %v687_v9  ;;  %v540_v1 = vmul.f32 %v524_v2, %v1798_v20  ;;  %v580_v11 = vmul.f32 0.6931472, %v1236_v48 }
  0xa5   :  { %vm593_vm0 = vcmp.eq.s32.totalorder %v1536_v16, 0  ;;  %1257 = vpow2.f32 %v851_v54  ;;  %v857_v4 = vmul.f32 1.442695, %v856_v43  ;;  %v482_v58 = vsel %vm480_vm14, 0.0, %v481_v53  ;;  %v1927_v53 = vld [vmem:[#allocation3 + $0x198] sm:$0xff] }
  0xa6   :  { %v1246_v23 = vpop.eup %1245  ;;  %v583_v51 = vmul.f32 0.6931472, %v1232_v17  ;;  %v689_v38 = vmax.f32 %v1881_v34, 1e-37  ;;  %1259 = vpow2.f32 %v806_v3  ;;  %v744_v25 = vadd.f32 %v1244_v55, %v743_v27 }
  0xa7   :  { %v1248_v31 = vpop.eup %1247  ;;  %1261 = vpow2.f32 %v854_v33  ;;  %v860_v6 = vmul.f32 1.442695, %v859_v35  ;;  %v1920_v8 = vmax.f32 %v905_v46, %v1912_v30  ;;  %v530_v48 = vadd.f32 %v529_v18, %v473_v50 }
  0xa8   :  { %v1250_v20 = vpop.eup %1249  ;;  %v539_v39 = vsel %vm537_vm15, 0.0, %v538_v28  ;;  %vm595_vm1 = vcmp.eq.s32.totalorder %v1536_v16, 2  ;;  %1263 = vlog2.f32 %v688_v0  ;;  %v542_v49 = vadd.f32 %v1828_v60, %v540_v1 }
  0xa9   :  { %v543_v17 = vmul.f32 %v527_v14, %v482_v58  ;;  %v581_v34 = vadd.f32 %v580_v11, %v1669_v63  ;;  %1265 = vpow2.f32 %v857_v4  ;;  %v1933_v42 = vadd.f32 %v1794_v12, %v1790_v44 }
  0xaa   :  { %v584_v9 = vsub.f32 %v583_v51, %v580_v11  ;;  %1267 = vlog2.f32 %v689_v38  ;;  %v746_v61 = vmax.f32 %v743_v27, 1e-37  ;;  %v1252_v36 = vpop.eup %1251  ;;  %vm597_vm2 = vcmp.eq.s32.totalorder %v1536_v16, 3  ;;  %v1948_v27 = vld [vmem:[#allocation3 + $0x1d8] sm:$0xff] }
  0xab   :  { %v745_v2 = vadd.f32 %v1246_v23, %v744_v25  ;;  %v1936_v60 = vadd.f32 %v1250_v20, %v1248_v31  ;;  %1269 = vpow2.f32 %v860_v6  ;;  %v907_v63 = vsub.f32 %v1883_v40, %v1920_v8 }
  0xac   :  { %v1254_v14 = vpop.eup %1253  ;;  %v545_v54 = vmul.f32 %v539_v39, %v530_v48  ;;  %vm650_vm3 = vcmp.eq.s32.totalorder %v1552_v37, 0  ;;  %v910_v44 = vsub.f32 %v1885_v19, %v1920_v8  ;;  %v961_v12 = vmax.f32 %v1927_v53, %v1929_v29 }
  0xad   :  { %v544_v43 = vadd.f32 %v543_v17, %v542_v49  ;;  %v585_v50 = vsub.f32 %v1641_v32, %v581_v34  ;;  %v908_v18 = vmul.f32 1.442695, %v907_v63  ;;  %v913_v3 = vsub.f32 %v1904_v47, %v1920_v8  ;;  %v1953_v32 = vld [vmem:[#allocation3 + $0x1f8] sm:$0xff] }
  0xae   :  { %v1256_v40 = vpop.eup %1255  ;;  %v587_v33 = vsub.f32 1.0, %v584_v9  ;;  %1271 = vlog2.f32 %v746_v61  ;;  %v911_v35 = vmul.f32 1.442695, %v910_v44  ;;  %v916_v46 = vsub.f32 %v1912_v30, %v1920_v8 }
  0xaf   :  { %v1258_v19 = vpop.eup %1257  ;;  %v634_v55 = vmul.f32 0.6931472, %v1252_v36  ;;  %1273 = vlog2.f32 %v745_v2  ;;  %v809_v28 = vadd.f32 %v1254_v14, %v1936_v60  ;;  %v914_v0 = vmul.f32 1.442695, %v913_v3 }
  0xb0   :  { %v1260_v1 = vpop.eup %1259  ;;  %v594_v11 = vsel %vm593_vm0, %v584_v9, 0.0  ;;  %1275 = vpow2.f32 %v908_v18  ;;  %v917_v4 = vmul.f32 1.442695, %v916_v46  ;;  %v962_v23 = vmax.f32 %v961_v12, %v1948_v27 }
  0xb1   :  { %v1262_v58 = vpop.eup %1261  ;;  %v586_v51 = vsub.f32 %v1658_v62, %v581_v34  ;;  %v637_v38 = vmul.f32 0.6931472, %v1256_v40  ;;  %vm652_vm4 = vcmp.eq.s32.totalorder %v1552_v37, 2  ;;  %1277 = vpow2.f32 %v911_v35 }
  0xb2   :  { %v1264_v31 = vpop.eup %1263  ;;  %v589_v25 = vsub.f32 1.0, %v585_v50  ;;  %vm654_vm5 = vcmp.eq.s32.totalorder %v1552_v37, 3  ;;  %v862_v6 = vadd.f32 %v1262_v58, %v1258_v19  ;;  %1279 = vpow2.f32 %v914_v0 }
  0xb3   :  { %v1962_v20 = vmax.f32 %v962_v23, %v1953_v32  ;;  %v1266_v48 = vpop.eup %1265  ;;  %v1964_v39 = vadd.f32 %v545_v54, %v544_v43  ;;  %v596_v49 = vsel %vm595_vm1, %v585_v50, %v594_v11  ;;  %v635_v62 = vadd.f32 %v634_v55, %v1727_v59 }
  0xb4   :  { %vm707_vm6 = vcmp.eq.s32.totalorder %v1562_v52, 0  ;;  %v810_v17 = vadd.f32 %v1260_v1, %v809_v28  ;;  %v1268_v34 = vpop.eup %1267  ;;  %v1970_v9 = vmul.f32 %v587_v33, %v587_v33  ;;  %v863_v61 = vadd.f32 %v1266_v48, %v862_v6 }
  0xb5   :  { %1281 = vpow2.f32 %v917_v4  ;;  %v964_v36 = vsub.f32 %v1927_v53, %v1962_v20  ;;  %v1270_v2 = vpop.eup %1269  ;;  %v591_v63 = vsub.f32 1.0, %v586_v51  ;;  %v638_v14 = vsub.f32 %v637_v38, %v634_v55 }
  0xb6   :  { %v691_v54 = vmul.f32 0.6931472, %v1264_v31  ;;  %v811_v44 = vmax.f32 %v1936_v60, 1e-37  ;;  %v1975_v12 = vmul.f32 %v589_v25, %v589_v25  ;;  %v598_v59 = vsel %vm597_vm2, %v586_v51, %v596_v49 }
  0xb7   :  { %vm709_vm7 = vcmp.eq.s32.totalorder %v1562_v52, 2  ;;  %v864_v43 = vadd.f32 %v1270_v2, %v863_v61  ;;  %v865_v50 = vmax.f32 %v862_v6, 1e-37  ;;  %vm599_vm8 = vcmp.eq.s32.totalorder %v1536_v16, 4294967196 }
  0xb8   :  { %v639_v18 = vsub.f32 %v1693_v15, %v635_v62  ;;  %v651_v53 = vsel %vm650_vm3, %v638_v14, 0.0  ;;  %1283 = vlog2.f32 %v810_v17  ;;  %v965_v3 = vmul.f32 1.442695, %v964_v36  ;;  %v1272_v40 = vpop.eup %1271 }
  0xb9   :  { %v694_v60 = vmul.f32 0.6931472, %v1268_v34  ;;  %1285 = vlog2.f32 %v864_v43  ;;  %v967_v33 = vsub.f32 %v1929_v29, %v1962_v20  ;;  %v970_v35 = vsub.f32 %v1948_v27, %v1962_v20  ;;  %v1274_v46 = vpop.eup %1273 }
  0xba   :  { %v1988_v19 = vmul.f32 %v591_v63, %v591_v63  ;;  %v640_v55 = vsub.f32 %v1714_v13, %v635_v62  ;;  %vm656_vm9 = vcmp.eq.s32.totalorder %v1552_v37, 4294967196  ;;  %v692_v15 = vadd.f32 %v691_v54, %v1764_v26  ;;  %v1276_v28 = vpop.eup %1275 }
  0xbb   :  { %vm711_vm10 = vcmp.eq.s32.totalorder %v1562_v52, 3  ;;  %1287 = vlog2.f32 %v811_v44  ;;  %v653_v0 = vsel %vm652_vm4, %v639_v18, %v651_v53  ;;  %v968_v29 = vmul.f32 1.442695, %v967_v33  ;;  %v1278_v11 = vpop.eup %1277 }
  0xbc   :  { %1289 = vlog2.f32 %v865_v50  ;;  %v971_v1 = vmul.f32 1.442695, %v970_v35  ;;  %v600_v4 = vsub.f32 0.0, %v598_v59  ;;  %v641_v23 = vsub.f32 1.0, %v638_v14  ;;  %v1280_v58 = vpop.eup %1279 }
  0xbd   :  { %1291 = vpow2.f32 %v965_v3  ;;  %v973_v13 = vsub.f32 %v1953_v32, %v1962_v20  ;;  %v644_v51 = vsub.f32 1.0, %v639_v18  ;;  %v695_v26 = vsub.f32 %v694_v60, %v691_v54 }
  0xbe   :  { %v919_v38 = vadd.f32 %v1278_v11, %v1276_v28  ;;  %1293 = vpow2.f32 %v968_v29  ;;  %v655_v31 = vsel %vm654_vm5, %v640_v55, %v653_v0  ;;  %v696_v25 = vsub.f32 %v1729_v57, %v692_v15  ;;  %v2133_v57 = vld [vmem:[#allocation15_spill] sm:$0xff] }
  0xbf   :  { %1295 = vpow2.f32 %v971_v1  ;;  %v974_v6 = vmul.f32 1.442695, %v973_v13  ;;  %v1282_v48 = vpop.eup %1281  ;;  %v647_v49 = vsub.f32 1.0, %v640_v55  ;;  %v697_v62 = vsub.f32 %v1751_v22, %v692_v15 }
  0xc0   :  { %v708_v17 = vsel %vm707_vm6, %v695_v26, 0.0  ;;  %v751_v34 = vmul.f32 0.6931472, %v1272_v40  ;;  %v748_v61 = vmul.f32 0.6931472, %v1274_v46  ;;  %v920_v36 = vadd.f32 %v1280_v58, %v919_v38 }
  0xc1   :  { %v922_v2 = vmax.f32 %v919_v38, 1e-37  ;;  %1297 = vpow2.f32 %v974_v6  ;;  %v642_v63 = vmul.f32 %v641_v23, %v641_v23  ;;  %v645_v14 = vmul.f32 %v644_v51, %v644_v51 }
  0xc2   :  { %v657_v54 = vsub.f32 0.0, %v655_v31  ;;  %vm713_vm11 = vcmp.eq.s32.totalorder %v1562_v52, 4294967196  ;;  %vm764_vm12 = vcmp.eq.s32.totalorder %v2133_v57, 0  ;;  %v1284_v44 = vpop.eup %1283  ;;  %v698_v59 = vsub.f32 1.0, %v695_v26 }
  0xc3   :  { %v701_v43 = vsub.f32 1.0, %v696_v25  ;;  %v710_v22 = vsel %vm709_vm7, %v696_v25, %v708_v17  ;;  %v921_v50 = vadd.f32 %v1282_v48, %v920_v36  ;;  %v1286_v18 = vpop.eup %1285  ;;  %v2010_v53 = vsel %vm599_vm8, 0.0, %v600_v4  ;;  %v2136_v36 = vld [vmem:[#allocation14_spill] sm:$0xff] }
  0xc4   :  { %v648_v3 = vmul.f32 %v647_v49, %v647_v49  ;;  %v704_v40 = vsub.f32 1.0, %v697_v62  ;;  %1299 = vlog2.f32 %v922_v2  ;;  %v749_v33 = vadd.f32 %v748_v61, %v1788_v45 }
  0xc5   :  { %v1288_v60 = vpop.eup %1287  ;;  %v752_v35 = vsub.f32 %v751_v34, %v748_v61  ;;  %vm766_vm13 = vcmp.eq.s32.totalorder %v2133_v57, 2  ;;  %1301 = vlog2.f32 %v921_v50  ;;  %v643_v55 = vadd.f32 %v642_v63, %v1970_v9  ;;  %v2134_v9 = vld [vmem:[#allocation12_spill] sm:$0xff] }
  0xc6   :  { %v1290_v46 = vpop.eup %1289  ;;  %v646_v15 = vadd.f32 %v645_v14, %v1975_v12  ;;  %v658_v16 = vsel %vm656_vm9, 0.0, %v657_v54  ;;  %v712_v28 = vsel %vm711_vm10, %v697_v62, %v710_v22  ;;  %vm768_vm14 = vcmp.eq.s32.totalorder %v2133_v57, 3  ;;  %v2135_v12 = vld [vmem:[#allocation13_spill] sm:$0xff] }
  0xc7   :  { %v1292_v0 = vpop.eup %1291  ;;  %v699_v29 = vmul.f32 %v698_v59, %v698_v59  ;;  %v702_v45 = vmul.f32 %v701_v43, %v701_v43  ;;  %v813_v1 = vmul.f32 0.6931472, %v1284_v44  ;;  %v867_v11 = vmul.f32 0.6931472, %v1286_v18  ;;  %v2137_v18 = vld [vmem:[#allocation17_spill] sm:$0xff] }
  0xc8   :  { %v1294_v4 = vpop.eup %1293  ;;  %v649_v23 = vadd.f32 %v648_v3, %v1988_v19  ;;  %v705_v13 = vmul.f32 %v704_v40, %v704_v40  ;;  %vm826_vm15 = vcmp.eq.s32.totalorder %v2134_v9, 0  ;;  %vm883_vm0 = vcmp.eq.s32.totalorder %v2135_v12, 0 }
  0xc9   :  { %v1296_v37 = vpop.eup %1295  ;;  %v714_v58 = vsub.f32 0.0, %v712_v28  ;;  %v753_v51 = vsub.f32 %v1766_v10, %v749_v33  ;;  %v755_v26 = vsub.f32 1.0, %v752_v35  ;;  %v2025_v38 = vmul.f32 4.0, %v658_v16 }
  0xca   :  { %vm885_vm1 = vcmp.eq.s32.totalorder %v2135_v12, 2  ;;  %v765_v31 = vsel %vm764_vm12, %v752_v35, 0.0  ;;  %v816_v25 = vmul.f32 0.6931472, %v1288_v60  ;;  %v870_v6 = vmul.f32 0.6931472, %v1290_v46 }
  0xcb   :  { %v976_v19 = vadd.f32 %v1294_v4, %v1292_v0  ;;  %v1298_v48 = vpop.eup %1297  ;;  %v700_v49 = vadd.f32 %v699_v29, %v643_v55  ;;  %v703_v62 = vadd.f32 %v702_v45, %v646_v15  ;;  %v814_v17 = vadd.f32 %v813_v1, %v1852_v56 }
  0xcc   :  { %vm828_vm2 = vcmp.eq.s32.totalorder %v2134_v9, 2  ;;  %v868_v10 = vadd.f32 %v867_v11, %v1879_v7  ;;  %v2033_v34 = vadd.f32 %v705_v13, %v649_v23  ;;  %v754_v61 = vsub.f32 %v1780_v5, %v749_v33 }
  0xcd   :  { %vm887_vm3 = vcmp.eq.s32.totalorder %v2135_v12, 3  ;;  %vm940_vm4 = vcmp.eq.s32.totalorder %v2136_v36, 0  ;;  %v977_v2 = vadd.f32 %v1296_v37, %v976_v19  ;;  %v979_v63 = vmax.f32 %v976_v19, 1e-37 }
  0xce   :  { %v2040_v14 = vsel %vm713_vm11, 0.0, %v714_v58  ;;  %v756_v54 = vmul.f32 %v755_v26, %v755_v26  ;;  %v758_v56 = vsub.f32 1.0, %v753_v51  ;;  %v767_v44 = vsel %vm766_vm13, %v753_v51, %v765_v31  ;;  %v1300_v7 = vpop.eup %1299 }
  0xcf   :  { %vm770_vm5 = vcmp.eq.s32.totalorder %v2133_v57, 4294967196  ;;  %v817_v59 = vsub.f32 %v816_v25, %v813_v1  ;;  %v871_v5 = vsub.f32 %v870_v6, %v867_v11  ;;  %v978_v43 = vadd.f32 %v1298_v48, %v977_v2  ;;  %v1302_v22 = vpop.eup %1301 }
  0xd0   :  { %1303 = vlog2.f32 %v979_v63  ;;  %v818_v50 = vsub.f32 %v1830_v24, %v814_v17  ;;  %v819_v3 = vsub.f32 %v2137_v18, %v814_v17  ;;  %v872_v52 = vsub.f32 %v1854_v41, %v868_v10 }
  0xd1   :  { %v927_v40 = vmul.f32 0.6931472, %v1300_v7  ;;  %vm942_vm6 = vcmp.eq.s32.totalorder %v2136_v36, 2  ;;  %v761_v60 = vsub.f32 1.0, %v754_v61  ;;  %vm830_vm7 = vcmp.eq.s32.totalorder %v2134_v9, 3 }
  0xd2   :  { %v873_v33 = vsub.f32 %v1867_v21, %v868_v10  ;;  %v924_v35 = vmul.f32 0.6931472, %v1302_v22  ;;  %1305 = vlog2.f32 %v978_v43  ;;  %v757_v46 = vadd.f32 %v756_v54, %v700_v49 }
  0xd3   :  { %v759_v55 = vmul.f32 %v758_v56, %v758_v56  ;;  %v769_v15 = vsel %vm768_vm14, %v754_v61, %v767_v44  ;;  %v884_v24 = vsel %vm883_vm0, %v871_v5, 0.0  ;;  %v820_v16 = vsub.f32 1.0, %v817_v59 }
  0xd4   :  { %v874_v41 = vsub.f32 1.0, %v871_v5  ;;  %v925_v28 = vadd.f32 %v924_v35, %v1920_v8  ;;  %v928_v0 = vsub.f32 %v927_v40, %v924_v35  ;;  %vm944_vm8 = vcmp.eq.s32.totalorder %v2136_v36, 3  ;;  %v2138_v8 = vld [vmem:[#allocation16_spill] sm:$0xff] }
  0xd5   :  { %v822_v29 = vsub.f32 1.0, %v818_v50  ;;  %v824_v45 = vsub.f32 1.0, %v819_v3  ;;  %v827_v21 = vsel %vm826_vm15, %v817_v59, 0.0  ;;  %v877_v1 = vsub.f32 1.0, %v872_v52 }
  0xd6   :  { %vm889_vm9 = vcmp.eq.s32.totalorder %v2135_v12, 4294967196  ;;  %v880_v11 = vsub.f32 1.0, %v873_v33  ;;  %v886_v4 = vsel %vm885_vm1, %v872_v52, %v884_v24  ;;  %v929_v23 = vsub.f32 %v1904_v47, %v925_v28 }
  0xd7   :  { %v930_v13 = vsub.f32 %v1912_v30, %v925_v28  ;;  %vm997_vm10 = vcmp.eq.s32.totalorder %v2138_v8, 0  ;;  %v760_v37 = vadd.f32 %v759_v55, %v703_v62  ;;  %v762_v58 = vmul.f32 %v761_v60, %v761_v60 }
  0xd8   :  { %v771_v51 = vsub.f32 0.0, %v769_v15  ;;  %v773_v26 = vmul.f32 %v757_v46, %v2010_v53  ;;  %v821_v31 = vmul.f32 %v820_v16, %v820_v16  ;;  %v829_v25 = vsel %vm828_vm2, %v818_v50, %v827_v21 }
  0xd9   :  { %v875_v6 = vmul.f32 %v874_v41, %v874_v41  ;;  %v931_v19 = vsub.f32 1.0, %v928_v0  ;;  %v823_v48 = vmul.f32 %v822_v29, %v822_v29  ;;  %v825_v49 = vmul.f32 %v824_v45, %v824_v45 }
  0xda   :  { %vm832_vm11 = vcmp.eq.s32.totalorder %v2134_v9, 4294967196  ;;  %v888_v47 = vsel %vm887_vm3, %v873_v33, %v886_v4  ;;  %v941_v30 = vsel %vm940_vm4, %v928_v0, 0.0  ;;  %v1304_v62 = vpop.eup %1303  ;;  %v878_v17 = vmul.f32 %v877_v1, %v877_v1 }
  0xdb   :  { %v881_v10 = vmul.f32 %v880_v11, %v880_v11  ;;  %v934_v53 = vsub.f32 1.0, %v929_v23  ;;  %v937_v61 = vsub.f32 1.0, %v930_v13  ;;  %v763_v2 = vadd.f32 %v762_v58, %v2033_v34 }
  0xdc   :  { %v772_v63 = vsel %vm770_vm5, 0.0, %v771_v51  ;;  %vm946_vm12 = vcmp.eq.s32.totalorder %v2136_v36, 4294967196  ;;  %v984_v54 = vmul.f32 0.6931472, %v1304_v62  ;;  %vm999_vm13 = vcmp.eq.s32.totalorder %v2138_v8, 2  ;;  %v1306_v56 = vpop.eup %1305 }
  0xdd   :  { %v876_v44 = vadd.f32 %v875_v6, %v821_v31  ;;  %v890_v7 = vsub.f32 0.0, %v888_v47  ;;  %v932_v59 = vmul.f32 %v931_v19, %v931_v19  ;;  %v943_v5 = vsel %vm942_vm6, %v929_v23, %v941_v30 }
  0xde   :  { %v775_v43 = vadd.f32 %v2025_v38, %v773_v26  ;;  %v776_v22 = vmul.f32 %v760_v37, %v2040_v14  ;;  %v831_v57 = vsel %vm830_vm7, %v819_v3, %v829_v25  ;;  %v981_v34 = vmul.f32 0.6931472, %v1306_v56 }
  0xdf   :  { %v879_v50 = vadd.f32 %v878_v17, %v823_v48  ;;  %v882_v18 = vadd.f32 %v881_v10, %v825_v49  ;;  %v935_v52 = vmul.f32 %v934_v53, %v934_v53  ;;  %v938_v40 = vmul.f32 %v937_v61, %v937_v61 }
  0xe0   :  { %v945_v60 = vsel %vm944_vm8, %v930_v13, %v943_v5  ;;  %v982_v33 = vadd.f32 %v981_v34, %v1962_v20  ;;  %v985_v35 = vsub.f32 %v984_v54, %v981_v34  ;;  %vm1001_vm14 = vcmp.eq.s32.totalorder %v2138_v8, 3 }
  0xe1   :  { %v778_v46 = vmul.f32 %v772_v63, %v763_v2  ;;  %v833_v38 = vsub.f32 0.0, %v831_v57  ;;  %v891_v14 = vsel %vm889_vm9, 0.0, %v890_v7  ;;  %v933_v55 = vadd.f32 %v932_v59, %v876_v44 }
  0xe2   :  { %v986_v3 = vsub.f32 %v1948_v27, %v982_v33  ;;  %v987_v15 = vsub.f32 %v1953_v32, %v982_v33  ;;  %v988_v24 = vsub.f32 1.0, %v985_v35  ;;  %v998_v16 = vsel %vm997_vm10, %v985_v35, 0.0 }
  0xe3   :  { %v777_v41 = vadd.f32 %v776_v22, %v775_v43  ;;  %v936_v28 = vadd.f32 %v935_v52, %v879_v50  ;;  %v939_v20 = vadd.f32 %v938_v40, %v882_v18  ;;  %v947_v0 = vsub.f32 0.0, %v945_v60 }
  0xe4   :  { %v989_v29 = vmul.f32 %v988_v24, %v988_v24  ;;  %v991_v45 = vsub.f32 1.0, %v986_v3  ;;  %v994_v21 = vsub.f32 1.0, %v987_v15  ;;  %v1000_v12 = vsel %vm999_vm13, %v986_v3, %v998_v16 }
  0xe5   :  { %v834_v1 = vsel %vm832_vm11, 0.0, %v833_v38  ;;  %v1002_v27 = vsel %vm1001_vm14, %v987_v15, %v1000_v12  ;;  %vm1003_vm15 = vcmp.eq.s32.totalorder %v2138_v8, 4294967196  ;;  %v1007_v32 = vmul.f32 4.0, %v891_v14 }
  0xe6   :  { %v990_v11 = vadd.f32 %v989_v29, %v933_v55  ;;  %v992_v4 = vmul.f32 %v991_v45, %v991_v45  ;;  %v995_v23 = vmul.f32 %v994_v21, %v994_v21  ;;  %v1004_v13 = vsub.f32 0.0, %v1002_v27 }
  0xe7   :  { %v547_v37 = vadd.f32 %v1964_v39, %v1933_v42  ;;  %v779_v58 = vadd.f32 %v778_v46, %v777_v41  ;;  %v948_v51 = vsel %vm946_vm12, 0.0, %v947_v0 }
  0xe8   :  { %v993_v26 = vadd.f32 %v992_v4, %v936_v28  ;;  %v996_v9 = vadd.f32 %v995_v23, %v939_v20  ;;  %v1005_v31 = vsel %vm1003_vm15, 0.0, %v1004_v13  ;;  %v1006_v25 = vmul.f32 %v990_v11, %v834_v1 }
  0xe9   :  { %v780_v8 = vadd.f32 %v779_v58, %v547_v37 }
  0xea   :  { %v1008_v6 = vadd.f32 %v1007_v32, %v1006_v25  ;;  %v1009_v19 = vmul.f32 %v993_v26, %v948_v51  ;;  %v1011_v48 = vmul.f32 %v1005_v31, %v996_v9 }
  0xec   :  { %v1010_v49 = vadd.f32 %v1009_v19, %v1008_v6 }
  0xee   :  { %v1012_v47 = vadd.f32 %v1011_v48, %v1010_v49 }
  0xf0   :  { %v1013_v30 = vadd.f32 %v1012_v47, %v780_v8 }
  0xf2   :  { %v1021_v62 = vrot.slane %v1013_v30, 4 }
  0xf4   :  { %v1022_v17 = vadd.f32 %v1021_v62, %v1013_v30 }
  0xf6   :  { %v1023_v10 = vrot.slane %v1022_v17, 2 }
  0xf8   :  { %v1024_v53 = vadd.f32 %v1023_v10, %v1022_v17 }
  0xfa   :  { %v1025_v42 = vrot.slane %v1024_v53, 1 }
  0xfc   :  { %v1026_v39 = vadd.f32 %v1025_v42, %v1024_v53 }
  0xfe   :  { %1027 = vst [vmem:[#allocation8] sm:$0x1] %v1026_v39 }
  0xff   :  { %1362 = shalt.err (!%p1359_p6)
}
 0x100   :  { %s1363_s11 = scalar_lea.hbm %s2119_s2, 16 }
 0x101   :  { %p1364_p7 = scmp.ne.s32.totalorder %s2119_s2, %s1363_s11  ;;  %p1367_p8 = scmp.lt.u32.totalorder %s1363_s11, %s2119_s2 }
 0x103   :  { %p1369_p9 = pnand %p1367_p8, %p1364_p7 }
 0x105   :  { %1372 = shalt.err (!%p1369_p9)
}
 0x106   :  { %1037 = dma.vmem_to_hbm [thread:$0]  %s1035_s6, 16, %s2119_s2, [#allocation5]  }
 0x107   :  { %1377 = dma.done.wait [#allocation5], 16  }
 0x108   :  { %1378 = vsyncadd [#allocation5], 4294967280 }
 0x109   :  { %1041 = vsyncpa [#allocation4], 1 }
 0x10a   :  { %1042 = vsyncpa [#allocation7], 1 }
 0x10b   :  { %1043 = vsyncpa [#allocation5], 1 }

</bundles_post_ra>
